<compile_context>
chip_gen: v7x
topology: tpu7x:2x2x1
jax: 0.10.0
libtpu: 0.0.40
codegen_flags: <defaults>
</compile_context>

<pallas_src>
import functools

import jax
import jax.numpy as jnp
from jax.experimental import pallas as pl
from jax.experimental.pallas import tpu as pltpu


_SUB = 16  # bf16 sublane packing: keep row offsets / extents 16-aligned


def _round_up(a, b):
    return (a + b - 1) // b * b


def _layout(D, H):
    """Row layout of the H-padded, row-shifted activation slab."""
    # rows per d-slice; >= H+1 so one trailing zero row serves as both the
    # h = H halo of this slice and the h = -1 halo of the next slice.
    Hp = _round_up(H + 1, _SUB)
    # leading zero rows: the d = -1 halo slice plus an alignment shift so the
    # interior writeback offset is 16-row aligned.
    lead = _round_up(Hp + 1, _SUB)
    m = D * Hp                       # matmul M (includes garbage rows h >= H)
    # last row touched by any tap window: (m-1) + 2*Hp + 2 + (lead - Hp - 1)
    p_rows = _round_up(m + Hp + lead + 1, _SUB)
    return Hp, lead, m, p_rows


def _resblock_kernel(slab_ref, x_ref, w1_ref, b1_ref, w2_ref, b2_ref,
                     out_ref, h1pad_ref, *, D, H, Hp, LEAD, W, C, P_ROWS):
    """Fused conv1 -> ReLU -> conv2 -> +identity for one batch element.

    slab_ref : (1, P_ROWS, W*C) bf16  zero-padded, row-shifted input slab
    x_ref    : (1, D*H,   W*C) f32    lane-dense identity
    w*_ref   : (9, W*C,   W*C) bf16   block-banded weights, taps over (kd, kh)
    b*_ref   : (1, W*C)        f32    bias tiled along W
    out_ref  : (1, D*H,   W*C) f32
    h1pad_ref: VMEM (P_ROWS, W*C) bf16 scratch for the padded ReLU intermediate
    """
    DH, WC, M = D * H, W * C, D * Hp
    base = LEAD - Hp - 1             # tap-window offset for (kd, kh) = (0, 0)
    bf16 = h1pad_ref.dtype

    def conv(get_patch, w_ref, b_ref):
        # 9 taps over (kd, kh); kw + Cin are folded into the banded K = W*C.
        # Chained acc += keeps the accumulation in one f32 accumulator
        # (in-place MRB accumulation on v7x).
        acc = jnp.zeros((M, WC), jnp.float32)
        for kd in range(3):
            for kh in range(3):
                off = kd * Hp + kh + base          # static python int
                acc += jnp.dot(get_patch(off), w_ref[kd * 3 + kh],
                               preferred_element_type=jnp.float32)
        return acc + b_ref[...]

    # ---- conv1 + bias + ReLU: taps read the pre-padded input slab directly,
    #      each as one contiguous (M, W*C) row window ----
    h1 = jnp.maximum(conv(lambda o: slab_ref[0, o:o + M, :], w1_ref, b1_ref),
                     0.0)

    # Zero the garbage rows (within-slice rows >= H) so the contiguous
    # writeback below also re-establishes conv2's h-halo zeros every step.
    row = jax.lax.broadcasted_iota(jnp.int32, (M, WC), 0)
    h1 = jnp.where((row % Hp) < H, h1, 0.0).astype(bf16)

    # ---- rebuild the padded intermediate slab.  All three stores are
    #      full-width, contiguous and 16-row aligned; done every step so it is
    #      correct under megacore partitioning of the parallel batch axis. ----
    h1pad_ref[0:LEAD, :] = jnp.zeros((LEAD, WC), bf16)                # d = -1 halo
    h1pad_ref[LEAD:LEAD + M, :] = h1                                  # interior
    h1pad_ref[LEAD + M:P_ROWS, :] = jnp.zeros((P_ROWS - LEAD - M, WC), bf16)  # d = D halo

    # ---- conv2 + bias ----
    h2 = conv(lambda o: h1pad_ref[o:o + M, :], w2_ref, b2_ref)

    # ---- drop garbage rows, add identity, lane-dense output store ----
    for d in range(D):
        out_ref[0, d * H:(d + 1) * H, :] = (
            x_ref[0, d * H:(d + 1) * H, :] +
            h2[d * Hp:d * Hp + H, :]).astype(out_ref.dtype)


def prepare_weights(w1, b1, w2, b2, W):
    """Fold kw + Cin into block-banded (9, W*C, W*C) weights and tile biases.

    Static across forward calls: call once per parameter set and cache.
    """
    C = w1.shape[0]
    WC = W * C

    def to_banded(w):
        # (Cout, Cin, kd, kh, kw) -> banded (9, W*C, W*C):
        #   B[kd*3+kh, wi*C + cin, wo*C + cout] = w[cout, cin, kd, kh, wi-wo+1]
        # for |wi - wo| <= 1, else 0.  Out-of-range (zero-padded) kw taps are
        # simply absent, so no W-halo columns are needed and K = W*C exactly.
        wt = jnp.transpose(w, (2, 3, 4, 1, 0))            # (kd, kh, kw, Cin, Cout)
        sel = (jnp.arange(W)[None, :, None] ==
               jnp.arange(W)[None, None, :] - 1 +
               jnp.arange(3)[:, None, None]).astype(w.dtype)   # (kw, wi, wo)
        band = jnp.einsum('kiw,dhkco->dhicwo', sel, wt)    # (kd,kh,wi,cin,wo,cout)
        return band.reshape(9, WC, WC).astype(jnp.bfloat16)

    b1t = jnp.tile(b1, W).reshape(1, WC).astype(jnp.float32)
    b2t = jnp.tile(b2, W).reshape(1, WC).astype(jnp.float32)
    return to_banded(w1), b1t, to_banded(w2), b2t


def residual_block_nobn_3d_apply(x, w1b, b1t, w2b, b2t):
    """x: (N, C, D, H, W) f32 NCDHW; w*b / b*t from prepare_weights."""
    N, C, D, H, W = x.shape
    DH, WC = D * H, W * C
    Hp, LEAD, M, P_ROWS = _layout(D, H)

    # NCDHW -> lane-dense (N, D*H, W*C) identity ...
    xt = jnp.transpose(x, (0, 2, 3, 4, 1)).reshape(N, D, H, WC)
    x_l = xt.reshape(N, DH, WC)
    # ... and the zero-padded, row-shifted bf16 conv-input slab:
    #   slab[n, LEAD + d*Hp + h, w*C + c] = x[n, c, d, h, w]; zeros elsewhere.
    slab = jnp.pad(xt, ((0, 0), (0, 0), (0, Hp - H), (0, 0))).reshape(N, M, WC)
    slab = jnp.pad(slab, ((0, 0), (LEAD, P_ROWS - LEAD - M), (0, 0)))
    slab = slab.astype(jnp.bfloat16)

    kernel = functools.partial(_resblock_kernel, D=D, H=H, Hp=Hp, LEAD=LEAD,
                               W=W, C=C, P_ROWS=P_ROWS)

    flops = 2 * 9 * 2 * N * M * WC * WC               # 2 convs x 9 taps, M*K*N
    bytes_accessed = (N * P_ROWS * WC * 2             # input slab (bf16)
                      + 2 * N * DH * WC * 4           # identity + output (f32)
                      + 2 * 9 * WC * WC * 2           # banded weights (bf16)
                      + 2 * WC * 4)                   # biases

    out = pl.pallas_call(
        kernel,
        out_shape=jax.ShapeDtypeStruct((N, DH, WC), x.dtype),
        grid_spec=pltpu.PrefetchScalarGridSpec(
            num_scalar_prefetch=0,
            grid=(N,),
            in_specs=[
                pl.BlockSpec((1, P_ROWS, WC), lambda n: (n, 0, 0)),   # input slab
                pl.BlockSpec((1, DH, WC), lambda n: (n, 0, 0)),       # identity
                pl.BlockSpec((9, WC, WC), lambda n: (0, 0, 0)),       # w1 banded
                pl.BlockSpec((1, WC), lambda n: (0, 0)),              # b1
                pl.BlockSpec((9, WC, WC), lambda n: (0, 0, 0)),       # w2 banded
                pl.BlockSpec((1, WC), lambda n: (0, 0)),              # b2
            ],
            out_specs=pl.BlockSpec((1, DH, WC), lambda n: (n, 0, 0)),
            scratch_shapes=[pltpu.VMEM((P_ROWS, WC), jnp.bfloat16)],
        ),
        compiler_params=pltpu.CompilerParams(
            dimension_semantics=("parallel",),        # v7x: 2 TCs split batches
            vmem_limit_bytes=32 * 1024 * 1024),
        cost_estimate=pl.CostEstimate(flops=flops, transcendentals=0,
                                      bytes_accessed=bytes_accessed),
    )(slab, x_l, w1b, b1t, w2b, b2t)

    # back to NCDHW (kept only for PyTorch interface parity)
    return jnp.transpose(out.reshape(N, D, H, W, C), (0, 4, 1, 2, 3))


def residual_block_nobn_3d(x, w1, b1, w2, b2):
    """Interface-parity wrapper (re-derives the banded weights every call)."""
    return residual_block_nobn_3d_apply(
        x, *prepare_weights(w1, b1, w2, b2, x.shape[4]))


def _reference(x, w1, b1, w2, b2):
    """Pure-JAX reference with lax.conv (NCDHW), mirrors the PyTorch forward."""
    def conv3d(a, w, b):
        o = jax.lax.conv_general_dilated(
            a, w, window_strides=(1, 1, 1),
            padding=((1, 1), (1, 1), (1, 1)),
            dimension_numbers=('NCDHW', 'OIDHW', 'NCDHW'))
        return o + b.reshape(1, -1, 1, 1, 1)

    h = jnp.maximum(conv3d(x, w1, b1), 0.0)
    return x + conv3d(h, w2, b2)


if __name__ == "__main__":
    # Small deterministic setup: nf=32 channels, N=2, D=4, H=W=8.
    N, C, D, H, W = 2, 32, 4, 8, 8
    key = jax.random.PRNGKey(0)
    kx, kw1, kw2 = jax.random.split(key, 3)

    x = jax.random.normal(kx, (N, C, D, H, W), dtype=jnp.float32)

    # Deterministic in-script init (kaiming-normal fan_in * 0.1 scale, zero
    # bias).  NB: PyTorch's initialize_weights() only touches Conv2d/Linear/
    # BatchNorm2d, so the init choice does not affect forward semantics.
    fan_in = C * 3 * 3 * 3
    std = (2.0 / fan_in) ** 0.5
    w1 = jax.random.normal(kw1, (C, C, 3, 3, 3), dtype=jnp.float32) * std * 0.1
    w2 = jax.random.normal(kw2, (C, C, 3, 3, 3), dtype=jnp.float32) * std * 0.1
    b1 = jnp.zeros((C,), jnp.float32)
    b2 = jnp.zeros((C,), jnp.float32)

    # Prepare banded weights once (static across calls); jit the forward.
    params = prepare_weights(w1, b1, w2, b2, W)
    fwd = jax.jit(residual_block_nobn_3d_apply)

    out = jax.block_until_ready(fwd(x, *params))
    ref = jax.block_until_ready(_reference(x, w1, b1, w2, b2))

    assert out.shape == (N, C, D, H, W)
    err = jnp.max(jnp.abs(out - ref))
    assert jnp.allclose(out, ref, atol=2e-2, rtol=2e-2), f"max abs err {err}"

    print("KERNEL_OK")
</pallas_src>

<mosaic_0001>
module attributes {stable_mosaic.version = 11 : i64} {
  func.func @_resblock_kernel(%arg0: i32, %arg1: memref<1x128x256xbf16, #tpu.memory_space<vmem>>, %arg2: memref<1x32x256xf32, #tpu.memory_space<vmem>>, %arg3: memref<9x256x256xbf16, #tpu.memory_space<vmem>>, %arg4: memref<1x256xf32, #tpu.memory_space<vmem>>, %arg5: memref<9x256x256xbf16, #tpu.memory_space<vmem>>, %arg6: memref<1x256xf32, #tpu.memory_space<vmem>>, %arg7: memref<1x32x256xf32, #tpu.memory_space<vmem>>, %arg8: memref<128x256xbf16, #tpu.memory_space<vmem>>) attributes {dimension_semantics = [#tpu.dimension_semantics<parallel>], iteration_bounds = array<i64: 2>, scalar_prefetch = 0 : i64, scratch_operands = 1 : i64, tpu.core_type = #tpu.core_type<tc>, window_params = [{transform_indices = @transform_0, window_bounds = array<i64: 1, 128, 256>}, {transform_indices = @transform_1, window_bounds = array<i64: 1, 32, 256>}, {pipeline_mode = #tpu.pipeline_mode<synchronous>, transform_indices = @transform_2, window_bounds = array<i64: 9, 256, 256>}, {pipeline_mode = #tpu.pipeline_mode<synchronous>, transform_indices = @transform_3, window_bounds = array<i64: 1, 256>}, {pipeline_mode = #tpu.pipeline_mode<synchronous>, transform_indices = @transform_4, window_bounds = array<i64: 9, 256, 256>}, {pipeline_mode = #tpu.pipeline_mode<synchronous>, transform_indices = @transform_5, window_bounds = array<i64: 1, 256>}, {transform_indices = @transform_6, window_bounds = array<i64: 1, 32, 256>}]} {
    %cst = arith.constant 0.000000e+00 : f32
    %0 = vector.broadcast %cst : f32 to vector<64x256xf32>
    %c0 = arith.constant 0 : index
    %c15 = arith.constant 15 : index
    %c0_0 = arith.constant 0 : index
    %1 = vector.load %arg1[%c0, %c15, %c0_0] : memref<1x128x256xbf16, #tpu.memory_space<vmem>>, vector<1x64x256xbf16>
    %2 = vector.shape_cast %1 : vector<1x64x256xbf16> to vector<64x256xbf16>
    %c0_1 = arith.constant 0 : index
    %c0_2 = arith.constant 0 : index
    %c0_3 = arith.constant 0 : index
    %3 = vector.load %arg3[%c0_1, %c0_2, %c0_3] : memref<9x256x256xbf16, #tpu.memory_space<vmem>>, vector<1x256x256xbf16>
    %4 = vector.shape_cast %3 : vector<1x256x256xbf16> to vector<256x256xbf16>
    %cst_4 = arith.constant dense<0.000000e+00> : vector<64x256xf32>
    %5 = tpu.matmul %2, %4, %cst_4 {dimension_numbers = #tpu.dot_dimension_numbers<[1], [0], [0], [1], [0, 0, 1, 1], [], []>} : vector<64x256xbf16>, vector<256x256xbf16>, vector<64x256xf32> -> vector<64x256xf32>
    %6 = arith.addf %0, %5 : vector<64x256xf32>
    %c0_5 = arith.constant 0 : index
    %c16 = arith.constant 16 : index
    %c0_6 = arith.constant 0 : index
    %7 = vector.load %arg1[%c0_5, %c16, %c0_6] : memref<1x128x256xbf16, #tpu.memory_space<vmem>>, vector<1x64x256xbf16>
    %8 = vector.shape_cast %7 : vector<1x64x256xbf16> to vector<64x256xbf16>
    %c1 = arith.constant 1 : index
    %c0_7 = arith.constant 0 : index
    %c0_8 = arith.constant 0 : index
    %9 = vector.load %arg3[%c1, %c0_7, %c0_8] : memref<9x256x256xbf16, #tpu.memory_space<vmem>>, vector<1x256x256xbf16>
    %10 = vector.shape_cast %9 : vector<1x256x256xbf16> to vector<256x256xbf16>
    %cst_9 = arith.constant dense<0.000000e+00> : vector<64x256xf32>
    %11 = tpu.matmul %8, %10, %cst_9 {dimension_numbers = #tpu.dot_dimension_numbers<[1], [0], [0], [1], [0, 0, 1, 1], [], []>} : vector<64x256xbf16>, vector<256x256xbf16>, vector<64x256xf32> -> vector<64x256xf32>
    %12 = arith.addf %6, %11 : vector<64x256xf32>
    %c0_10 = arith.constant 0 : index
    %c17 = arith.constant 17 : index
    %c0_11 = arith.constant 0 : index
    %13 = vector.load %arg1[%c0_10, %c17, %c0_11] : memref<1x128x256xbf16, #tpu.memory_space<vmem>>, vector<1x64x256xbf16>
    %14 = vector.shape_cast %13 : vector<1x64x256xbf16> to vector<64x256xbf16>
    %c2 = arith.constant 2 : index
    %c0_12 = arith.constant 0 : index
    %c0_13 = arith.constant 0 : index
    %15 = vector.load %arg3[%c2, %c0_12, %c0_13] : memref<9x256x256xbf16, #tpu.memory_space<vmem>>, vector<1x256x256xbf16>
    %16 = vector.shape_cast %15 : vector<1x256x256xbf16> to vector<256x256xbf16>
    %cst_14 = arith.constant dense<0.000000e+00> : vector<64x256xf32>
    %17 = tpu.matmul %14, %16, %cst_14 {dimension_numbers = #tpu.dot_dimension_numbers<[1], [0], [0], [1], [0, 0, 1, 1], [], []>} : vector<64x256xbf16>, vector<256x256xbf16>, vector<64x256xf32> -> vector<64x256xf32>
    %18 = arith.addf %12, %17 : vector<64x256xf32>
    %c0_15 = arith.constant 0 : index
    %c31 = arith.constant 31 : index
    %c0_16 = arith.constant 0 : index
    %19 = vector.load %arg1[%c0_15, %c31, %c0_16] : memref<1x128x256xbf16, #tpu.memory_space<vmem>>, vector<1x64x256xbf16>
    %20 = vector.shape_cast %19 : vector<1x64x256xbf16> to vector<64x256xbf16>
    %c3 = arith.constant 3 : index
    %c0_17 = arith.constant 0 : index
    %c0_18 = arith.constant 0 : index
    %21 = vector.load %arg3[%c3, %c0_17, %c0_18] : memref<9x256x256xbf16, #tpu.memory_space<vmem>>, vector<1x256x256xbf16>
    %22 = vector.shape_cast %21 : vector<1x256x256xbf16> to vector<256x256xbf16>
    %cst_19 = arith.constant dense<0.000000e+00> : vector<64x256xf32>
    %23 = tpu.matmul %20, %22, %cst_19 {dimension_numbers = #tpu.dot_dimension_numbers<[1], [0], [0], [1], [0, 0, 1, 1], [], []>} : vector<64x256xbf16>, vector<256x256xbf16>, vector<64x256xf32> -> vector<64x256xf32>
    %24 = arith.addf %18, %23 : vector<64x256xf32>
    %c0_20 = arith.constant 0 : index
    %c32 = arith.constant 32 : index
    %c0_21 = arith.constant 0 : index
    %25 = vector.load %arg1[%c0_20, %c32, %c0_21] : memref<1x128x256xbf16, #tpu.memory_space<vmem>>, vector<1x64x256xbf16>
    %26 = vector.shape_cast %25 : vector<1x64x256xbf16> to vector<64x256xbf16>
    %c4 = arith.constant 4 : index
    %c0_22 = arith.constant 0 : index
    %c0_23 = arith.constant 0 : index
    %27 = vector.load %arg3[%c4, %c0_22, %c0_23] : memref<9x256x256xbf16, #tpu.memory_space<vmem>>, vector<1x256x256xbf16>
    %28 = vector.shape_cast %27 : vector<1x256x256xbf16> to vector<256x256xbf16>
    %cst_24 = arith.constant dense<0.000000e+00> : vector<64x256xf32>
    %29 = tpu.matmul %26, %28, %cst_24 {dimension_numbers = #tpu.dot_dimension_numbers<[1], [0], [0], [1], [0, 0, 1, 1], [], []>} : vector<64x256xbf16>, vector<256x256xbf16>, vector<64x256xf32> -> vector<64x256xf32>
    %30 = arith.addf %24, %29 : vector<64x256xf32>
    %c0_25 = arith.constant 0 : index
    %c33 = arith.constant 33 : index
    %c0_26 = arith.constant 0 : index
    %31 = vector.load %arg1[%c0_25, %c33, %c0_26] : memref<1x128x256xbf16, #tpu.memory_space<vmem>>, vector<1x64x256xbf16>
    %32 = vector.shape_cast %31 : vector<1x64x256xbf16> to vector<64x256xbf16>
    %c5 = arith.constant 5 : index
    %c0_27 = arith.constant 0 : index
    %c0_28 = arith.constant 0 : index
    %33 = vector.load %arg3[%c5, %c0_27, %c0_28] : memref<9x256x256xbf16, #tpu.memory_space<vmem>>, vector<1x256x256xbf16>
    %34 = vector.shape_cast %33 : vector<1x256x256xbf16> to vector<256x256xbf16>
    %cst_29 = arith.constant dense<0.000000e+00> : vector<64x256xf32>
    %35 = tpu.matmul %32, %34, %cst_29 {dimension_numbers = #tpu.dot_dimension_numbers<[1], [0], [0], [1], [0, 0, 1, 1], [], []>} : vector<64x256xbf16>, vector<256x256xbf16>, vector<64x256xf32> -> vector<64x256xf32>
    %36 = arith.addf %30, %35 : vector<64x256xf32>
    %c0_30 = arith.constant 0 : index
    %c47 = arith.constant 47 : index
    %c0_31 = arith.constant 0 : index
    %37 = vector.load %arg1[%c0_30, %c47, %c0_31] : memref<1x128x256xbf16, #tpu.memory_space<vmem>>, vector<1x64x256xbf16>
    %38 = vector.shape_cast %37 : vector<1x64x256xbf16> to vector<64x256xbf16>
    %c6 = arith.constant 6 : index
    %c0_32 = arith.constant 0 : index
    %c0_33 = arith.constant 0 : index
    %39 = vector.load %arg3[%c6, %c0_32, %c0_33] : memref<9x256x256xbf16, #tpu.memory_space<vmem>>, vector<1x256x256xbf16>
    %40 = vector.shape_cast %39 : vector<1x256x256xbf16> to vector<256x256xbf16>
    %cst_34 = arith.constant dense<0.000000e+00> : vector<64x256xf32>
    %41 = tpu.matmul %38, %40, %cst_34 {dimension_numbers = #tpu.dot_dimension_numbers<[1], [0], [0], [1], [0, 0, 1, 1], [], []>} : vector<64x256xbf16>, vector<256x256xbf16>, vector<64x256xf32> -> vector<64x256xf32>
    %42 = arith.addf %36, %41 : vector<64x256xf32>
    %c0_35 = arith.constant 0 : index
    %c48 = arith.constant 48 : index
    %c0_36 = arith.constant 0 : index
    %43 = vector.load %arg1[%c0_35, %c48, %c0_36] : memref<1x128x256xbf16, #tpu.memory_space<vmem>>, vector<1x64x256xbf16>
    %44 = vector.shape_cast %43 : vector<1x64x256xbf16> to vector<64x256xbf16>
    %c7 = arith.constant 7 : index
    %c0_37 = arith.constant 0 : index
    %c0_38 = arith.constant 0 : index
    %45 = vector.load %arg3[%c7, %c0_37, %c0_38] : memref<9x256x256xbf16, #tpu.memory_space<vmem>>, vector<1x256x256xbf16>
    %46 = vector.shape_cast %45 : vector<1x256x256xbf16> to vector<256x256xbf16>
    %cst_39 = arith.constant dense<0.000000e+00> : vector<64x256xf32>
    %47 = tpu.matmul %44, %46, %cst_39 {dimension_numbers = #tpu.dot_dimension_numbers<[1], [0], [0], [1], [0, 0, 1, 1], [], []>} : vector<64x256xbf16>, vector<256x256xbf16>, vector<64x256xf32> -> vector<64x256xf32>
    %48 = arith.addf %42, %47 : vector<64x256xf32>
    %c0_40 = arith.constant 0 : index
    %c49 = arith.constant 49 : index
    %c0_41 = arith.constant 0 : index
    %49 = vector.load %arg1[%c0_40, %c49, %c0_41] : memref<1x128x256xbf16, #tpu.memory_space<vmem>>, vector<1x64x256xbf16>
    %50 = vector.shape_cast %49 : vector<1x64x256xbf16> to vector<64x256xbf16>
    %c8 = arith.constant 8 : index
    %c0_42 = arith.constant 0 : index
    %c0_43 = arith.constant 0 : index
    %51 = vector.load %arg3[%c8, %c0_42, %c0_43] : memref<9x256x256xbf16, #tpu.memory_space<vmem>>, vector<1x256x256xbf16>
    %52 = vector.shape_cast %51 : vector<1x256x256xbf16> to vector<256x256xbf16>
    %cst_44 = arith.constant dense<0.000000e+00> : vector<64x256xf32>
    %53 = tpu.matmul %50, %52, %cst_44 {dimension_numbers = #tpu.dot_dimension_numbers<[1], [0], [0], [1], [0, 0, 1, 1], [], []>} : vector<64x256xbf16>, vector<256x256xbf16>, vector<64x256xf32> -> vector<64x256xf32>
    %54 = arith.addf %48, %53 : vector<64x256xf32>
    %c0_45 = arith.constant 0 : index
    %c0_46 = arith.constant 0 : index
    %55 = vector.load %arg4[%c0_45, %c0_46] : memref<1x256xf32, #tpu.memory_space<vmem>>, vector<1x256xf32>
    %56 = vector.broadcast %55 : vector<1x256xf32> to vector<64x256xf32>
    %57 = arith.addf %54, %56 : vector<64x256xf32>
    %cst_47 = arith.constant 0.000000e+00 : f32
    %58 = vector.broadcast %cst_47 : f32 to vector<64x256xf32>
    %59 = arith.maximumf %57, %58 : vector<64x256xf32>
    %60 = tpu.iota {dimensions = array<i32: 0>} : vector<64x256xi32>
    %c16_i32 = arith.constant 16 : i32
    %c0_i32 = arith.constant 0 : i32
    %61 = arith.cmpi eq, %c16_i32, %c0_i32 : i32
    %c1_i32 = arith.constant 1 : i32
    %62 = arith.select %61, %c1_i32, %c16_i32 : i32
    %63 = vector.broadcast %62 : i32 to vector<64x256xi32>
    %64 = arith.remsi %60, %63 : vector<64x256xi32>
    %c0_i32_48 = arith.constant 0 : i32
    %65 = vector.broadcast %c0_i32_48 : i32 to vector<64x256xi32>
    %66 = arith.cmpi ne, %64, %65 : vector<64x256xi32>
    %c0_i32_49 = arith.constant 0 : i32
    %67 = vector.broadcast %c0_i32_49 : i32 to vector<64x256xi32>
    %68 = arith.cmpi slt, %64, %67 : vector<64x256xi32>
    %c0_i32_50 = arith.constant 0 : i32
    %69 = arith.cmpi slt, %62, %c0_i32_50 : i32
    %70 = vector.broadcast %69 : i1 to vector<64x256xi1>
    %71 = vector.broadcast %70 : vector<64x256xi1> to vector<64x256xi1>
    %72 = arith.xori %68, %71 : vector<64x256xi1>
    %73 = arith.andi %72, %66 : vector<64x256xi1>
    %74 = vector.broadcast %62 : i32 to vector<64x256xi32>
    %75 = arith.addi %64, %74 : vector<64x256xi32>
    %76 = arith.select %73, %75, %64 : vector<64x256xi1>, vector<64x256xi32>
    %c8_i32 = arith.constant 8 : i32
    %77 = vector.broadcast %c8_i32 : i32 to vector<64x256xi32>
    %78 = arith.cmpi slt, %76, %77 : vector<64x256xi32>
    %cst_51 = arith.constant 0.000000e+00 : f32
    %79 = vector.broadcast %cst_51 : f32 to vector<64x256xf32>
    %80 = arith.select %78, %59, %79 : vector<64x256xi1>, vector<64x256xf32>
    %81 = arith.truncf %80 : vector<64x256xf32> to vector<64x256xbf16>
    %cst_52 = arith.constant 0.000000e+00 : bf16
    %82 = vector.broadcast %cst_52 : bf16 to vector<32x256xbf16>
    %c0_53 = arith.constant 0 : index
    %c0_54 = arith.constant 0 : index
    %83 = vector.load %arg8[%c0_53, %c0_54] : memref<128x256xbf16, #tpu.memory_space<vmem>>, vector<32x256xbf16>
    tpu.vector_store %arg8[%c0_53, %c0_54], %82 {strides = array<i32>} : memref<128x256xbf16, #tpu.memory_space<vmem>>, vector<32x256xbf16>,
    %c32_55 = arith.constant 32 : index
    %c0_56 = arith.constant 0 : index
    %84 = vector.load %arg8[%c32_55, %c0_56] : memref<128x256xbf16, #tpu.memory_space<vmem>>, vector<64x256xbf16>
    tpu.vector_store %arg8[%c32_55, %c0_56], %81 {strides = array<i32>} : memref<128x256xbf16, #tpu.memory_space<vmem>>, vector<64x256xbf16>,
    %cst_57 = arith.constant 0.000000e+00 : bf16
    %85 = vector.broadcast %cst_57 : bf16 to vector<32x256xbf16>
    %c96 = arith.constant 96 : index
    %c0_58 = arith.constant 0 : index
    %86 = vector.load %arg8[%c96, %c0_58] : memref<128x256xbf16, #tpu.memory_space<vmem>>, vector<32x256xbf16>
    tpu.vector_store %arg8[%c96, %c0_58], %85 {strides = array<i32>} : memref<128x256xbf16, #tpu.memory_space<vmem>>, vector<32x256xbf16>,
    %cst_59 = arith.constant 0.000000e+00 : f32
    %87 = vector.broadcast %cst_59 : f32 to vector<64x256xf32>
    %c15_60 = arith.constant 15 : index
    %c0_61 = arith.constant 0 : index
    %88 = vector.load %arg8[%c15_60, %c0_61] : memref<128x256xbf16, #tpu.memory_space<vmem>>, vector<64x256xbf16>
    %c0_62 = arith.constant 0 : index
    %c0_63 = arith.constant 0 : index
    %c0_64 = arith.constant 0 : index
    %89 = vector.load %arg5[%c0_62, %c0_63, %c0_64] : memref<9x256x256xbf16, #tpu.memory_space<vmem>>, vector<1x256x256xbf16>
    %90 = vector.shape_cast %89 : vector<1x256x256xbf16> to vector<256x256xbf16>
    %cst_65 = arith.constant dense<0.000000e+00> : vector<64x256xf32>
    %91 = tpu.matmul %88, %90, %cst_65 {dimension_numbers = #tpu.dot_dimension_numbers<[1], [0], [0], [1], [0, 0, 1, 1], [], []>} : vector<64x256xbf16>, vector<256x256xbf16>, vector<64x256xf32> -> vector<64x256xf32>
    %92 = arith.addf %87, %91 : vector<64x256xf32>
    %c16_66 = arith.constant 16 : index
    %c0_67 = arith.constant 0 : index
    %93 = vector.load %arg8[%c16_66, %c0_67] : memref<128x256xbf16, #tpu.memory_space<vmem>>, vector<64x256xbf16>
    %c1_68 = arith.constant 1 : index
    %c0_69 = arith.constant 0 : index
    %c0_70 = arith.constant 0 : index
    %94 = vector.load %arg5[%c1_68, %c0_69, %c0_70] : memref<9x256x256xbf16, #tpu.memory_space<vmem>>, vector<1x256x256xbf16>
    %95 = vector.shape_cast %94 : vector<1x256x256xbf16> to vector<256x256xbf16>
    %cst_71 = arith.constant dense<0.000000e+00> : vector<64x256xf32>
    %96 = tpu.matmul %93, %95, %cst_71 {dimension_numbers = #tpu.dot_dimension_numbers<[1], [0], [0], [1], [0, 0, 1, 1], [], []>} : vector<64x256xbf16>, vector<256x256xbf16>, vector<64x256xf32> -> vector<64x256xf32>
    %97 = arith.addf %92, %96 : vector<64x256xf32>
    %c17_72 = arith.constant 17 : index
    %c0_73 = arith.constant 0 : index
    %98 = vector.load %arg8[%c17_72, %c0_73] : memref<128x256xbf16, #tpu.memory_space<vmem>>, vector<64x256xbf16>
    %c2_74 = arith.constant 2 : index
    %c0_75 = arith.constant 0 : index
    %c0_76 = arith.constant 0 : index
    %99 = vector.load %arg5[%c2_74, %c0_75, %c0_76] : memref<9x256x256xbf16, #tpu.memory_space<vmem>>, vector<1x256x256xbf16>
    %100 = vector.shape_cast %99 : vector<1x256x256xbf16> to vector<256x256xbf16>
    %cst_77 = arith.constant dense<0.000000e+00> : vector<64x256xf32>
    %101 = tpu.matmul %98, %100, %cst_77 {dimension_numbers = #tpu.dot_dimension_numbers<[1], [0], [0], [1], [0, 0, 1, 1], [], []>} : vector<64x256xbf16>, vector<256x256xbf16>, vector<64x256xf32> -> vector<64x256xf32>
    %102 = arith.addf %97, %101 : vector<64x256xf32>
    %c31_78 = arith.constant 31 : index
    %c0_79 = arith.constant 0 : index
    %103 = vector.load %arg8[%c31_78, %c0_79] : memref<128x256xbf16, #tpu.memory_space<vmem>>, vector<64x256xbf16>
    %c3_80 = arith.constant 3 : index
    %c0_81 = arith.constant 0 : index
    %c0_82 = arith.constant 0 : index
    %104 = vector.load %arg5[%c3_80, %c0_81, %c0_82] : memref<9x256x256xbf16, #tpu.memory_space<vmem>>, vector<1x256x256xbf16>
    %105 = vector.shape_cast %104 : vector<1x256x256xbf16> to vector<256x256xbf16>
    %cst_83 = arith.constant dense<0.000000e+00> : vector<64x256xf32>
    %106 = tpu.matmul %103, %105, %cst_83 {dimension_numbers = #tpu.dot_dimension_numbers<[1], [0], [0], [1], [0, 0, 1, 1], [], []>} : vector<64x256xbf16>, vector<256x256xbf16>, vector<64x256xf32> -> vector<64x256xf32>
    %107 = arith.addf %102, %106 : vector<64x256xf32>
    %c32_84 = arith.constant 32 : index
    %c0_85 = arith.constant 0 : index
    %108 = vector.load %arg8[%c32_84, %c0_85] : memref<128x256xbf16, #tpu.memory_space<vmem>>, vector<64x256xbf16>
    %c4_86 = arith.constant 4 : index
    %c0_87 = arith.constant 0 : index
    %c0_88 = arith.constant 0 : index
    %109 = vector.load %arg5[%c4_86, %c0_87, %c0_88] : memref<9x256x256xbf16, #tpu.memory_space<vmem>>, vector<1x256x256xbf16>
    %110 = vector.shape_cast %109 : vector<1x256x256xbf16> to vector<256x256xbf16>
    %cst_89 = arith.constant dense<0.000000e+00> : vector<64x256xf32>
    %111 = tpu.matmul %108, %110, %cst_89 {dimension_numbers = #tpu.dot_dimension_numbers<[1], [0], [0], [1], [0, 0, 1, 1], [], []>} : vector<64x256xbf16>, vector<256x256xbf16>, vector<64x256xf32> -> vector<64x256xf32>
    %112 = arith.addf %107, %111 : vector<64x256xf32>
    %c33_90 = arith.constant 33 : index
    %c0_91 = arith.constant 0 : index
    %113 = vector.load %arg8[%c33_90, %c0_91] : memref<128x256xbf16, #tpu.memory_space<vmem>>, vector<64x256xbf16>
    %c5_92 = arith.constant 5 : index
    %c0_93 = arith.constant 0 : index
    %c0_94 = arith.constant 0 : index
    %114 = vector.load %arg5[%c5_92, %c0_93, %c0_94] : memref<9x256x256xbf16, #tpu.memory_space<vmem>>, vector<1x256x256xbf16>
    %115 = vector.shape_cast %114 : vector<1x256x256xbf16> to vector<256x256xbf16>
    %cst_95 = arith.constant dense<0.000000e+00> : vector<64x256xf32>
    %116 = tpu.matmul %113, %115, %cst_95 {dimension_numbers = #tpu.dot_dimension_numbers<[1], [0], [0], [1], [0, 0, 1, 1], [], []>} : vector<64x256xbf16>, vector<256x256xbf16>, vector<64x256xf32> -> vector<64x256xf32>
    %117 = arith.addf %112, %116 : vector<64x256xf32>
    %c47_96 = arith.constant 47 : index
    %c0_97 = arith.constant 0 : index
    %118 = vector.load %arg8[%c47_96, %c0_97] : memref<128x256xbf16, #tpu.memory_space<vmem>>, vector<64x256xbf16>
    %c6_98 = arith.constant 6 : index
    %c0_99 = arith.constant 0 : index
    %c0_100 = arith.constant 0 : index
    %119 = vector.load %arg5[%c6_98, %c0_99, %c0_100] : memref<9x256x256xbf16, #tpu.memory_space<vmem>>, vector<1x256x256xbf16>
    %120 = vector.shape_cast %119 : vector<1x256x256xbf16> to vector<256x256xbf16>
    %cst_101 = arith.constant dense<0.000000e+00> : vector<64x256xf32>
    %121 = tpu.matmul %118, %120, %cst_101 {dimension_numbers = #tpu.dot_dimension_numbers<[1], [0], [0], [1], [0, 0, 1, 1], [], []>} : vector<64x256xbf16>, vector<256x256xbf16>, vector<64x256xf32> -> vector<64x256xf32>
    %122 = arith.addf %117, %121 : vector<64x256xf32>
    %c48_102 = arith.constant 48 : index
    %c0_103 = arith.constant 0 : index
    %123 = vector.load %arg8[%c48_102, %c0_103] : memref<128x256xbf16, #tpu.memory_space<vmem>>, vector<64x256xbf16>
    %c7_104 = arith.constant 7 : index
    %c0_105 = arith.constant 0 : index
    %c0_106 = arith.constant 0 : index
    %124 = vector.load %arg5[%c7_104, %c0_105, %c0_106] : memref<9x256x256xbf16, #tpu.memory_space<vmem>>, vector<1x256x256xbf16>
    %125 = vector.shape_cast %124 : vector<1x256x256xbf16> to vector<256x256xbf16>
    %cst_107 = arith.constant dense<0.000000e+00> : vector<64x256xf32>
    %126 = tpu.matmul %123, %125, %cst_107 {dimension_numbers = #tpu.dot_dimension_numbers<[1], [0], [0], [1], [0, 0, 1, 1], [], []>} : vector<64x256xbf16>, vector<256x256xbf16>, vector<64x256xf32> -> vector<64x256xf32>
    %127 = arith.addf %122, %126 : vector<64x256xf32>
    %c49_108 = arith.constant 49 : index
    %c0_109 = arith.constant 0 : index
    %128 = vector.load %arg8[%c49_108, %c0_109] : memref<128x256xbf16, #tpu.memory_space<vmem>>, vector<64x256xbf16>
    %c8_110 = arith.constant 8 : index
    %c0_111 = arith.constant 0 : index
    %c0_112 = arith.constant 0 : index
    %129 = vector.load %arg5[%c8_110, %c0_111, %c0_112] : memref<9x256x256xbf16, #tpu.memory_space<vmem>>, vector<1x256x256xbf16>
    %130 = vector.shape_cast %129 : vector<1x256x256xbf16> to vector<256x256xbf16>
    %cst_113 = arith.constant dense<0.000000e+00> : vector<64x256xf32>
    %131 = tpu.matmul %128, %130, %cst_113 {dimension_numbers = #tpu.dot_dimension_numbers<[1], [0], [0], [1], [0, 0, 1, 1], [], []>} : vector<64x256xbf16>, vector<256x256xbf16>, vector<64x256xf32> -> vector<64x256xf32>
    %132 = arith.addf %127, %131 : vector<64x256xf32>
    %c0_114 = arith.constant 0 : index
    %c0_115 = arith.constant 0 : index
    %133 = vector.load %arg6[%c0_114, %c0_115] : memref<1x256xf32, #tpu.memory_space<vmem>>, vector<1x256xf32>
    %134 = vector.broadcast %133 : vector<1x256xf32> to vector<64x256xf32>
    %135 = arith.addf %132, %134 : vector<64x256xf32>
    %c0_116 = arith.constant 0 : index
    %c0_117 = arith.constant 0 : index
    %c0_118 = arith.constant 0 : index
    %136 = vector.load %arg2[%c0_116, %c0_117, %c0_118] : memref<1x32x256xf32, #tpu.memory_space<vmem>>, vector<1x8x256xf32>
    %137 = vector.shape_cast %136 : vector<1x8x256xf32> to vector<8x256xf32>
    %138 = vector.extract_strided_slice %135 {offsets = [0, 0], sizes = [8, 256], strides = [1, 1]} : vector<64x256xf32> to vector<8x256xf32>
    %139 = arith.addf %137, %138 : vector<8x256xf32>
    %c0_119 = arith.constant 0 : index
    %c0_120 = arith.constant 0 : index
    %c0_121 = arith.constant 0 : index
    %140 = vector.load %arg7[%c0_119, %c0_120, %c0_121] : memref<1x32x256xf32, #tpu.memory_space<vmem>>, vector<1x8x256xf32>
    %141 = vector.shape_cast %140 : vector<1x8x256xf32> to vector<8x256xf32>
    %142 = vector.shape_cast %139 : vector<8x256xf32> to vector<1x8x256xf32>
    tpu.vector_store %arg7[%c0_119, %c0_120, %c0_121], %142 {strides = array<i32>} : memref<1x32x256xf32, #tpu.memory_space<vmem>>, vector<1x8x256xf32>,
    %c0_122 = arith.constant 0 : index
    %c8_123 = arith.constant 8 : index
    %c0_124 = arith.constant 0 : index
    %143 = vector.load %arg2[%c0_122, %c8_123, %c0_124] : memref<1x32x256xf32, #tpu.memory_space<vmem>>, vector<1x8x256xf32>
    %144 = vector.shape_cast %143 : vector<1x8x256xf32> to vector<8x256xf32>
    %145 = vector.extract_strided_slice %135 {offsets = [16, 0], sizes = [8, 256], strides = [1, 1]} : vector<64x256xf32> to vector<8x256xf32>
    %146 = arith.addf %144, %145 : vector<8x256xf32>
    %c0_125 = arith.constant 0 : index
    %c8_126 = arith.constant 8 : index
    %c0_127 = arith.constant 0 : index
    %147 = vector.load %arg7[%c0_125, %c8_126, %c0_127] : memref<1x32x256xf32, #tpu.memory_space<vmem>>, vector<1x8x256xf32>
    %148 = vector.shape_cast %147 : vector<1x8x256xf32> to vector<8x256xf32>
    %149 = vector.shape_cast %146 : vector<8x256xf32> to vector<1x8x256xf32>
    tpu.vector_store %arg7[%c0_125, %c8_126, %c0_127], %149 {strides = array<i32>} : memref<1x32x256xf32, #tpu.memory_space<vmem>>, vector<1x8x256xf32>,
    %c0_128 = arith.constant 0 : index
    %c16_129 = arith.constant 16 : index
    %c0_130 = arith.constant 0 : index
    %150 = vector.load %arg2[%c0_128, %c16_129, %c0_130] : memref<1x32x256xf32, #tpu.memory_space<vmem>>, vector<1x8x256xf32>
    %151 = vector.shape_cast %150 : vector<1x8x256xf32> to vector<8x256xf32>
    %152 = vector.extract_strided_slice %135 {offsets = [32, 0], sizes = [8, 256], strides = [1, 1]} : vector<64x256xf32> to vector<8x256xf32>
    %153 = arith.addf %151, %152 : vector<8x256xf32>
    %c0_131 = arith.constant 0 : index
    %c16_132 = arith.constant 16 : index
    %c0_133 = arith.constant 0 : index
    %154 = vector.load %arg7[%c0_131, %c16_132, %c0_133] : memref<1x32x256xf32, #tpu.memory_space<vmem>>, vector<1x8x256xf32>
    %155 = vector.shape_cast %154 : vector<1x8x256xf32> to vector<8x256xf32>
    %156 = vector.shape_cast %153 : vector<8x256xf32> to vector<1x8x256xf32>
    tpu.vector_store %arg7[%c0_131, %c16_132, %c0_133], %156 {strides = array<i32>} : memref<1x32x256xf32, #tpu.memory_space<vmem>>, vector<1x8x256xf32>,
    %c0_134 = arith.constant 0 : index
    %c24 = arith.constant 24 : index
    %c0_135 = arith.constant 0 : index
    %157 = vector.load %arg2[%c0_134, %c24, %c0_135] : memref<1x32x256xf32, #tpu.memory_space<vmem>>, vector<1x8x256xf32>
    %158 = vector.shape_cast %157 : vector<1x8x256xf32> to vector<8x256xf32>
    %159 = vector.extract_strided_slice %135 {offsets = [48, 0], sizes = [8, 256], strides = [1, 1]} : vector<64x256xf32> to vector<8x256xf32>
    %160 = arith.addf %158, %159 : vector<8x256xf32>
    %c0_136 = arith.constant 0 : index
    %c24_137 = arith.constant 24 : index
    %c0_138 = arith.constant 0 : index
    %161 = vector.load %arg7[%c0_136, %c24_137, %c0_138] : memref<1x32x256xf32, #tpu.memory_space<vmem>>, vector<1x8x256xf32>
    %162 = vector.shape_cast %161 : vector<1x8x256xf32> to vector<8x256xf32>
    %163 = vector.shape_cast %160 : vector<8x256xf32> to vector<1x8x256xf32>
    tpu.vector_store %arg7[%c0_136, %c24_137, %c0_138], %163 {strides = array<i32>} : memref<1x32x256xf32, #tpu.memory_space<vmem>>, vector<1x8x256xf32>,
    return
  }
  func.func @transform_0(%arg0: i32) -> (i32, i32, i32) {
    %c0_i32 = arith.constant 0 : i32
    %c0_i32_0 = arith.constant 0 : i32
    %c0_i32_1 = arith.constant 0 : i32
    return %arg0, %c0_i32, %c0_i32_0 : i32, i32, i32
  }
  func.func @transform_1(%arg0: i32) -> (i32, i32, i32) {
    %c0_i32 = arith.constant 0 : i32
    %c0_i32_0 = arith.constant 0 : i32
    %c0_i32_1 = arith.constant 0 : i32
    return %arg0, %c0_i32, %c0_i32_0 : i32, i32, i32
  }
  func.func @transform_2(%arg0: i32) -> (i32, i32, i32) {
    %c0_i32 = arith.constant 0 : i32
    %c0_i32_0 = arith.constant 0 : i32
    %c0_i32_1 = arith.constant 0 : i32
    %c0_i32_2 = arith.constant 0 : i32
    return %c0_i32, %c0_i32_0, %c0_i32_1 : i32, i32, i32
  }
  func.func @transform_3(%arg0: i32) -> (i32, i32) {
    %c0_i32 = arith.constant 0 : i32
    %c0_i32_0 = arith.constant 0 : i32
    %c0_i32_1 = arith.constant 0 : i32
    return %c0_i32, %c0_i32_0 : i32, i32
  }
  func.func @transform_4(%arg0: i32) -> (i32, i32, i32) {
    %c0_i32 = arith.constant 0 : i32
    %c0_i32_0 = arith.constant 0 : i32
    %c0_i32_1 = arith.constant 0 : i32
    %c0_i32_2 = arith.constant 0 : i32
    return %c0_i32, %c0_i32_0, %c0_i32_1 : i32, i32, i32
  }
  func.func @transform_5(%arg0: i32) -> (i32, i32) {
    %c0_i32 = arith.constant 0 : i32
    %c0_i32_0 = arith.constant 0 : i32
    %c0_i32_1 = arith.constant 0 : i32
    return %c0_i32, %c0_i32_0 : i32, i32
  }
  func.func @transform_6(%arg0: i32) -> (i32, i32, i32) {
    %c0_i32 = arith.constant 0 : i32
    %c0_i32_0 = arith.constant 0 : i32
    %c0_i32_1 = arith.constant 0 : i32
    return %arg0, %c0_i32, %c0_i32_0 : i32, i32, i32
  }
}

</mosaic_0001>

<bundles_post_ra>
// kernel: residual_block_nobn_3d_apply.1
= control target key start
LH: loop header
LB: loop body
LE: loop exit
PB: predicated region body
PF: predicated region fallthrough
CT: control target
= control target key end

     0   :  { %11 = vsyncpa [#allocation4], 0  ;;  %s8771_s21 = smov 0   ;;  %s10494_s0 = inlined_call_operand.vmem [shape: bf16[2,128,256], index: 0, kind: input, shape index: {}]   ;;  %s10495_s1 = inlined_call_operand.vmem [shape: f32[2,32,256], index: 1, kind: input, shape index: {}]   ;;  %s10496_s2 = inlined_call_operand.vmem [shape: bf16[9,256,256], index: 2, kind: input, shape index: {}]   ;;  %s10497_s3 = inlined_call_operand.vmem [shape: f32[1,256], index: 3, kind: input, shape index: {}]   ;;  %s10498_s4 = inlined_call_operand.hbm [shape: bf16[9,256,256], index: 4, kind: input, shape index: {}]   ;;  %s10499_s5 = inlined_call_operand.vmem [shape: f32[1,256], index: 5, kind: input, shape index: {}]   ;;  %s10500_s6 = inlined_call_operand.vmem [shape: f32[2,32,256], index: 6, kind: output, shape index: {}]  }
   0x1 LB: > { %s8777_s22 = sadd.s32 4294967295, %s8729_s21   ;;  %p6815_p0 = scmp.ge.s32.totalorder %s8729_s21, 1  ;;  %s8729_s21 = sphi %s8771_s21, %s17_s21  }
   0x2   : > { %p184_p1 = scmp.lt.s32.totalorder %s8729_s21, 3  ;;  %s8731_s23 = smov [#allocation3]  }
   0x3   : > { %s202_s24 = sshll.u32 %s8731_s23, 4  ;;  %p10501_p3 = scmp.eq.s32.totalorder %s8777_s22, 0  ;;  %s203_s24 = int_to_ptr.vmem [resolvable:$true] %s202_s24 }
   0x4   : > { %p8781_p2 = pnand %p6815_p0, %p184_p1  ;;  %s8691_s29 = scalar_lea.hbm %s10498_s4, 36864 }
   0x5   : > { %p8692_p6 = scmp.ne.s32.totalorder %s10498_s4, %s8691_s29  ;;  %p8698_p10 = scmp.lt.u32.totalorder %s8691_s29, %s10498_s4 }
   0x6   : > { %s10503_s25 = scalar_select %p8781_p2, 1, 0 }
   0x7   : > { %p7751_p4 = pneg %p8781_p2 }
   0x9   : > { %p8790_p5 = pnand %p10501_p3, %p7751_p4 }
   0xb   : > { %p8693_p7 = pneg %p8790_p5 }
   0xd   : > { %p8694_p8 = pnand %p8693_p7, %p8692_p6 }
   0xf   : > { %p8695_p9 = pneg %p8694_p8 }
  0x11   : > { %p8700_p11 = pnand %p8698_p10, %p8695_p9 }
  0x13   : > { %8703 = shalt.err (!%p8700_p11)
}
  0x14   : > { %s8704_s10 = scalar_lea.vmem %s203_s24, 36864  ;;  %p8712_p1 = scmp.lt.s32.totalorder %s203_s24, %s203_s24 }
  0x15   : > { %p8705_p12 = scmp.ne.s32.totalorder %s203_s24, %s8704_s10  ;;  %p8713_p4 = scmp.lt.s32.totalorder %s8704_s10, %s8704_s10 }
  0x17   : > { %p8707_p13 = pnand %p8705_p12, %p8693_p7  ;;  %p8714_p3 = por %p8713_p4, %p8712_p1 }
  0x19   : > { %p8708_p0 = pneg %p8707_p13 }
  0x1b   : > { %p8715_p2 = pnand %p8714_p3, %p8708_p0 }
  0x1d   : > { %8718 = shalt.err (!%p8715_p2)
}
  0x1e   : > { %s8732_s11 = smov 128   ;;  %s8733_s12 = smov 8  }
  0x1f   : > { %7754 = dma.hbm_to_vmem [thread:$0]  (!%p8790_p5), %s10498_s4, 36864, %s203_s24, [#allocation4], %s8732_s11, %s8732_s11, %s8733_s12  }
  0x20   : > { %p10505_p6 = scmp.ne.s32.totalorder %s10503_s25, 0 }
  0x21   : > { %p10506_p8 = scmp.eq.s32.totalorder (!%p10505_p6), %s8777_s22, 0 }
  0x22   : > { %237 = sbr.rel (%p10505_p6) target bundleno = 1046 (0x416), region = 44 }
  0x29   : > { %8724 = dma.done.wait (%p10506_p8), [#allocation4], 36864   ;;  %p10507_p7 = pmov %p10506_p8 }
  0x2a   : > { %v7770_v0 = vld [vmem:[%s10496_s2 + $0x104] ss:$8 sps:$4 sm:$0xff]   ;;  %v7774_v2 = vld [vmem:[%s10496_s2 + $0x100] ss:$8 sps:$4 sm:$0xff]   ;;  %v7776_v4 = vld [vmem:[%s10496_s2 + $0x114] ss:$8 sps:$4 sm:$0xff]  }
  0x2b   : > { %8726 = vsyncadd (%p10507_p7), [#allocation4], 4294930432  ;;  %v7772_v1 = vld [vmem:[%s10496_s2 + $0x4] ss:$8 sps:$4 sm:$0xff]   ;;  %562 = vmatprep.subr.bf16.mxu0 %v7770_v0  ;;  %v7775_v3 = vld [vmem:[%s10496_s2] ss:$8 sps:$4 sm:$0xff]  }
  0x2c   : > { %905 = vmatprep.subr.bf16.mxu1 %v7772_v1  ;;  %563 = vmatpush1.bf16.msra.mxu0 %v7774_v2  ;;  %v7778_v5 = vld [vmem:[%s10496_s2 + $0x14] ss:$8 sps:$4 sm:$0xff]   ;;  %v7780_v6 = vld [vmem:[%s10496_s2 + $0x110] ss:$8 sps:$4 sm:$0xff]   ;;  %v7782_v8 = vld [vmem:[%s10496_s2 + $0x124] ss:$8 sps:$4 sm:$0xff]  }
  0x2d   : > { %906 = vmatpush1.bf16.msra.mxu1 %v7775_v3  ;;  %564 = vmatprep.subr.bf16.mxu0 %v7776_v4  ;;  %v7781_v7 = vld [vmem:[%s10496_s2 + $0x10] ss:$8 sps:$4 sm:$0xff]   ;;  %v7784_v9 = vld [vmem:[%s10496_s2 + $0x24] ss:$8 sps:$4 sm:$0xff]   ;;  %v7786_v10 = vld [vmem:[%s10496_s2 + $0x120] ss:$8 sps:$4 sm:$0xff]  }
  0x2e   : > { %907 = vmatprep.subr.bf16.mxu1 %v7778_v5  ;;  %v7787_v11 = vld [vmem:[%s10496_s2 + $0x20] ss:$8 sps:$4 sm:$0xff]   ;;  %v7788_v12 = vld [vmem:[%s10496_s2 + $0x134] ss:$8 sps:$4 sm:$0xff]   ;;  %v7792_v14 = vld [vmem:[%s10496_s2 + $0x130] ss:$8 sps:$4 sm:$0xff]  }
  0x2f   : > { %v7790_v13 = vld [vmem:[%s10496_s2 + $0x34] ss:$8 sps:$4 sm:$0xff]   ;;  %v7793_v15 = vld [vmem:[%s10496_s2 + $0x30] ss:$8 sps:$4 sm:$0xff]   ;;  %v7794_v16 = vld [vmem:[%s10496_s2 + $0x144] ss:$8 sps:$4 sm:$0xff]  }
  0x30   : > { %565 = vmatpush1.bf16.msra.mxu0 %v7780_v6  ;;  %v7796_v17 = vld [vmem:[%s10496_s2 + $0x44] ss:$8 sps:$4 sm:$0xff]   ;;  %v7798_v18 = vld [vmem:[%s10496_s2 + $0x140] ss:$8 sps:$4 sm:$0xff]   ;;  %v7800_v20 = vld [vmem:[%s10496_s2 + $0x154] ss:$8 sps:$4 sm:$0xff]  }
  0x31   : > { %908 = vmatpush1.bf16.msra.mxu1 %v7781_v7  ;;  %566 = vmatprep.subr.bf16.mxu0 %v7782_v8  ;;  %v7799_v19 = vld [vmem:[%s10496_s2 + $0x40] ss:$8 sps:$4 sm:$0xff]   ;;  %v7802_v21 = vld [vmem:[%s10496_s2 + $0x54] ss:$8 sps:$4 sm:$0xff]   ;;  %v7804_v22 = vld [vmem:[%s10496_s2 + $0x150] ss:$8 sps:$4 sm:$0xff]  }
  0x32   : > { %909 = vmatprep.subr.bf16.mxu1 %v7784_v9  ;;  %v7805_v23 = vld [vmem:[%s10496_s2 + $0x50] ss:$8 sps:$4 sm:$0xff]   ;;  %v7806_v24 = vld [vmem:[%s10496_s2 + $0x164] ss:$8 sps:$4 sm:$0xff]   ;;  %v7810_v26 = vld [vmem:[%s10496_s2 + $0x160] ss:$8 sps:$4 sm:$0xff]  }
  0x33   : > { %v7808_v25 = vld [vmem:[%s10496_s2 + $0x64] ss:$8 sps:$4 sm:$0xff]   ;;  %v7811_v27 = vld [vmem:[%s10496_s2 + $0x60] ss:$8 sps:$4 sm:$0xff]   ;;  %v7812_v28 = vld [vmem:[%s10496_s2 + $0x174] ss:$8 sps:$4 sm:$0xff]  }
  0x34   : > { %567 = vmatpush1.bf16.msra.mxu0 %v7786_v10  ;;  %v7814_v29 = vld [vmem:[%s10496_s2 + $0x74] ss:$8 sps:$4 sm:$0xff]   ;;  %v7816_v30 = vld [vmem:[%s10496_s2 + $0x170] ss:$8 sps:$4 sm:$0xff]   ;;  %v7818_v32 = vld [vmem:[%s10496_s2 + $0x184] ss:$8 sps:$4 sm:$0xff]  }
  0x35   : > { %910 = vmatpush1.bf16.msra.mxu1 %v7787_v11  ;;  %568 = vmatprep.subr.bf16.mxu0 %v7788_v12  ;;  %v7817_v31 = vld [vmem:[%s10496_s2 + $0x70] ss:$8 sps:$4 sm:$0xff]   ;;  %p272_p2 = scmp.lt.s32.totalorder %s8777_s22, 1  ;;  %v7820_v33 = vld [vmem:[%s10496_s2 + $0x84] ss:$8 sps:$4 sm:$0xff]  }
  0x36   : > { %911 = vmatprep.subr.bf16.mxu1 %v7790_v13  ;;  %v7822_v34 = vld [vmem:[%s10496_s2 + $0x180] ss:$8 sps:$4 sm:$0xff]   ;;  %v7824_v36 = vld [vmem:[%s10496_s2 + $0x194] ss:$8 sps:$4 sm:$0xff]   ;;  %v7828_v38 = vld [vmem:[%s10496_s2 + $0x190] ss:$8 sps:$4 sm:$0xff]  }
  0x37   : > { %v7823_v35 = vld [vmem:[%s10496_s2 + $0x80] ss:$8 sps:$4 sm:$0xff]   ;;  %s10509_s22 = smov (!%p272_p2, %s8777_s22), 1  ;;  %v7826_v37 = vld [vmem:[%s10496_s2 + $0x94] ss:$8 sps:$4 sm:$0xff]  }
  0x38   : > { %569 = vmatpush1.bf16.msra.mxu0 %v7792_v14  ;;  %v7829_v39 = vld [vmem:[%s10496_s2 + $0x90] ss:$8 sps:$4 sm:$0xff]   ;;  %v7830_v40 = vld [vmem:[%s10496_s2 + $0x1a4] ss:$8 sps:$4 sm:$0xff]   ;;  %s7744_s9 = sshll.u32 %s10509_s22, 7  ;;  %s7745_s27 = sshll.u32 %s10509_s22, 6 }
  0x39   : > { %912 = vmatpush1.bf16.msra.mxu1 %v7793_v15  ;;  %570 = vmatprep.subr.bf16.mxu0 %v7794_v16  ;;  %v7832_v41 = vld [vmem:[%s10496_s2 + $0xa4] ss:$8 sps:$4 sm:$0xff]   ;;  %v7834_v42 = vld [vmem:[%s10496_s2 + $0x1a0] ss:$8 sps:$4 sm:$0xff]   ;;  %s8956_s18 = scalar_lea.vmem %s10494_s0, %s7744_s9  ;;  %v7836_v44 = vld [vmem:[%s10496_s2 + $0x1b4] ss:$8 sps:$4 sm:$0xff]   ;;  %s10464_s8 = scalar_lea.vmem %s10495_s1, %s7745_s27 }
  0x3a   : > { %913 = vmatprep.subr.bf16.mxu1 %v7796_v17  ;;  %v7835_v43 = vld [vmem:[%s10496_s2 + $0xa0] ss:$8 sps:$4 sm:$0xff]   ;;  %v7838_v45 = vld [vmem:[%s10496_s2 + $0xb4] ss:$8 sps:$4 sm:$0xff]   ;;  %v7840_v46 = vld [vmem:[%s10496_s2 + $0x1b0] ss:$8 sps:$4 sm:$0xff]   ;;  %s10475_s10 = scalar_lea.vmem %s10500_s6, %s7745_s27 }
  0x3b   : > { %v7841_v47 = vld [vmem:[%s10496_s2 + $0xb0] ss:$8 sps:$4 sm:$0xff]   ;;  %v288_v48 = vld [vmem:[%s8956_s18 + $0x8] sm:$0x88]  ;;  %v8978_v51 = vld [vmem:[%s8956_s18 + $0x20] sm:$0xff] }
  0x3c   : > { %571 = vmatpush1.bf16.msra.mxu0 %v7798_v18  ;;  %v8972_v49 = vld [vmem:[%s8956_s18 + $0x10] sm:$0xff]  ;;  %v8975_v50 = vld [vmem:[%s8956_s18 + $0x18] sm:$0xff]  ;;  %v7842_v52 = vld [vmem:[%s10496_s2 + $0x1c4] ss:$8 sps:$4 sm:$0xff]   ;;  %vm648_vm0 = vsmask.f32 4352 }
  0x3d   : > { %914 = vmatpush1.bf16.msra.mxu1 %v7799_v19  ;;  %572 = vmatprep.subr.bf16.mxu0 %v7800_v20  ;;  %v8985_v53 = vcombine.high %v8972_v49, %v8975_v50  ;;  %v6899_v54 = vcombine.high %v288_v48, %v8972_v49  ;;  %v7844_v55 = vld [vmem:[%s10496_s2 + $0xc4] ss:$8 sps:$4 sm:$0xff]   ;;  %v6901_v56 = vcombine.high %v8975_v50, %v8978_v51  ;;  %v7846_v59 = vld [vmem:[%s10496_s2 + $0x1c0] ss:$8 sps:$4 sm:$0xff]   ;;  %v7848_v3 = vld [vmem:[%s10496_s2 + $0x1d4] ss:$8 sps:$4 sm:$0xff]  }
  0x3e   : > { %915 = vmatprep.subr.bf16.mxu1 %v7802_v21  ;;  %v7847_v62 = vld [vmem:[%s10496_s2 + $0xc0] ss:$8 sps:$4 sm:$0xff]   ;;  %v6898_v63 = vcombine.low %v288_v48, %v8972_v49  ;;  %v6900_v0 = vcombine.low %v8975_v50, %v8978_v51  ;;  %v7850_v4 = vld [vmem:[%s10496_s2 + $0xd4] ss:$8 sps:$4 sm:$0xff]   ;;  %v7852_v7 = vld [vmem:[%s10496_s2 + $0x1d0] ss:$8 sps:$4 sm:$0xff]  }
  0x3f   : > { %594 = vmatprep.mubr.bf16.mxu0 %v8985_v53  ;;  %v667_v57 = vshrl.u32 %v6899_v54, 16  ;;  %v670_v58 = vshll.u32 %v6899_v54, 16  ;;  %v675_v60 = vshrl.u32 %v6901_v56, 16  ;;  %v678_v61 = vshll.u32 %v6901_v56, 16  ;;  %v7853_v9 = vld [vmem:[%s10496_s2 + $0xd0] ss:$8 sps:$4 sm:$0xff]  }
  0x40   : > { %573 = vmatpush1.bf16.msra.mxu0 %v7804_v22  ;;  %v7854_v10 = vld [vmem:[%s10496_s2 + $0x1e4] ss:$8 sps:$4 sm:$0xff]   ;;  %v650_v12 = vshrl.u32 %v6898_v63, 16  ;;  %v653_v13 = vshll.u32 %v6898_v63, 16  ;;  %v658_v14 = vshrl.u32 %v6900_v0, 16  ;;  %v661_v15 = vshll.u32 %v6900_v0, 16 }
  0x41   : > { %916 = vmatpush1.bf16.msra.mxu1 %v7805_v23  ;;  %574 = vmatprep.subr.bf16.mxu0 %v7806_v24  ;;  %v669_v1 = vrot.slane %v667_v57, 3  ;;  %v672_v2 = vrot.slane %v670_v58, 4  ;;  %v677_v5 = vrot.slane %v675_v60, 3  ;;  %v680_v6 = vrot.slane %v678_v61, 4  ;;  %v7856_v16 = vld [vmem:[%s10496_s2 + $0xe4] ss:$8 sps:$4 sm:$0xff]  }
  0x42   : > { %917 = vmatprep.subr.bf16.mxu1 %v7808_v25  ;;  %v7858_v18 = vld [vmem:[%s10496_s2 + $0x1e0] ss:$8 sps:$4 sm:$0xff]   ;;  %v7860_v20 = vld [vmem:[%s10496_s2 + $0x1f4] ss:$8 sps:$4 sm:$0xff]   ;;  %v652_v21 = vrot.slane %v650_v12, 3  ;;  %v655_v22 = vrot.slane %v653_v13, 4 }
  0x43   : > { %v673_v8 = vor.u32 %v672_v2, %v669_v1  ;;  %v9018_v11 = vor.u32 %v680_v6, %v677_v5  ;;  %v7859_v19 = vld [vmem:[%s10496_s2 + $0xe0] ss:$8 sps:$4 sm:$0xff]   ;;  %v660_v23 = vrot.slane %v658_v14, 3  ;;  %v663_v24 = vrot.slane %v661_v15, 4  ;;  %v7862_v25 = vld [vmem:[%s10496_s2 + $0xf4] ss:$8 sps:$4 sm:$0xff]  }
  0x44   : > { %575 = vmatpush1.bf16.msra.mxu0 %v7810_v26  ;;  %v7864_v26 = vld [vmem:[%s10496_s2 + $0x1f0] ss:$8 sps:$4 sm:$0xff]   ;;  %v7895_v48 = vld [vmem:[%s10496_s2 + $0x334] ss:$8 sps:$4 sm:$0xff]   ;;  %v7898_v56 = vld [vmem:[%s10496_s2 + $0x244] ss:$8 sps:$4 sm:$0xff]  }
  0x45   : > { %918 = vmatpush1.bf16.msra.mxu1 %v7811_v27  ;;  %576 = vmatprep.subr.bf16.mxu0 %v7812_v28  ;;  %v682_v17 = vsel %vm648_vm0, %v673_v8, %v9018_v11  ;;  %v7865_v27 = vld [vmem:[%s10496_s2 + $0xf0] ss:$8 sps:$4 sm:$0xff]   ;;  %v656_v28 = vor.u32 %v655_v22, %v652_v21  ;;  %v7901_v61 = vld [vmem:[%s10496_s2 + $0x344] ss:$8 sps:$4 sm:$0xff]   ;;  %v7896_v63 = vld [vmem:[%s10496_s2 + $0x240] ss:$8 sps:$4 sm:$0xff]  }
  0x46   : > { %919 = vmatprep.subr.bf16.mxu1 %v7814_v29  ;;  %937 = vmatprep.mubr.bf16.mxu1 %v682_v17  ;;  %v9043_v29 = vor.u32 %v663_v24, %v660_v23  ;;  %v7899_v5 = vld [vmem:[%s10496_s2 + $0x340] ss:$8 sps:$4 sm:$0xff]   ;;  %v7904_v6 = vld [vmem:[%s10496_s2 + $0x254] ss:$8 sps:$4 sm:$0xff]   ;;  %v7902_v17 = vld [vmem:[%s10496_s2 + $0x250] ss:$8 sps:$4 sm:$0xff]  }
  0x47   : > { %v7907_v12 = vld [vmem:[%s10496_s2 + $0x354] ss:$8 sps:$4 sm:$0xff]   ;;  %vm1057_vm1 = vsmask.f32 7424  ;;  %vm4144_vm2 = vsmask.f32 256 }
  0x48   : > { %577 = vmatpush1.bf16.msra.mxu0 %v7816_v30  ;;  %v7874_v30 = vld [vmem:[%s10496_s2 + $0x204] ss:$8 sps:$4 sm:$0xff]  }
  0x49   : > { %920 = vmatpush1.bf16.msra.mxu1 %v7817_v31  ;;  %578 = vmatprep.subr.bf16.mxu0 %v7818_v32  ;;  %v7877_v31 = vld [vmem:[%s10496_s2 + $0x304] ss:$8 sps:$4 sm:$0xff]   ;;  %v9053_v32 = vcombine.low %v8972_v49, %v8975_v50  ;;  %v293_v49 = vld [vmem:[%s8956_s18 + $0x30] sm:$0xff] }
  0x4a   : > { %921 = vmatprep.subr.bf16.mxu1 %v7820_v33  ;;  %v7872_v33 = vld [vmem:[%s10496_s2 + $0x200] ss:$8 sps:$4 sm:$0xff]   ;;  %v7890_v50 = vld [vmem:[%s10496_s2 + $0x230] ss:$8 sps:$4 sm:$0xff]  }
  0x4c   : > { %579 = vmatpush1.bf16.msra.mxu0 %v7822_v34  ;;  %v665_v34 = vsel %vm648_vm0, %v656_v28, %v9043_v29 }
  0x4d   : > { %922 = vmatpush1.bf16.msra.mxu1 %v7823_v35  ;;  %580 = vmatprep.subr.bf16.mxu0 %v7824_v36  ;;  %v7875_v35 = vld [vmem:[%s10496_s2 + $0x300] ss:$8 sps:$4 sm:$0xff]   ;;  %v7880_v36 = vld [vmem:[%s10496_s2 + $0x214] ss:$8 sps:$4 sm:$0xff]  }
  0x4e   : > { %923 = vmatprep.subr.bf16.mxu1 %v7826_v37  ;;  %v7883_v37 = vld [vmem:[%s10496_s2 + $0x314] ss:$8 sps:$4 sm:$0xff]  }
  0x50   : > { %581 = vmatpush1.bf16.msra.mxu0 %v7828_v38  ;;  %v7878_v38 = vld [vmem:[%s10496_s2 + $0x210] ss:$8 sps:$4 sm:$0xff]  }
  0x51   : > { %924 = vmatpush1.bf16.msra.mxu1 %v7829_v39  ;;  %582 = vmatprep.subr.bf16.mxu0 %v7830_v40  ;;  %v7881_v39 = vld [vmem:[%s10496_s2 + $0x310] ss:$8 sps:$4 sm:$0xff]   ;;  %v7886_v40 = vld [vmem:[%s10496_s2 + $0x224] ss:$8 sps:$4 sm:$0xff]  }
  0x52   : > { %925 = vmatprep.subr.bf16.mxu1 %v7832_v41  ;;  %v7889_v41 = vld [vmem:[%s10496_s2 + $0x324] ss:$8 sps:$4 sm:$0xff]  }
  0x54   : > { %583 = vmatpush1.bf16.msra.mxu0 %v7834_v42  ;;  %v7884_v42 = vld [vmem:[%s10496_s2 + $0x220] ss:$8 sps:$4 sm:$0xff]  }
  0x55   : > { %926 = vmatpush1.bf16.msra.mxu1 %v7835_v43  ;;  %584 = vmatprep.subr.bf16.mxu0 %v7836_v44  ;;  %v7887_v43 = vld [vmem:[%s10496_s2 + $0x320] ss:$8 sps:$4 sm:$0xff]  }
  0x56   : > { %927 = vmatprep.subr.bf16.mxu1 %v7838_v45  ;;  %v9089_v44 = vld [vmem:[%s8956_s18 + $0x28] sm:$0xff]  ;;  %v7892_v45 = vld [vmem:[%s10496_s2 + $0x234] ss:$8 sps:$4 sm:$0xff]  }
  0x57   : > { %v6902_v54 = vcombine.low %v9089_v44, %v293_v49 }
  0x58   : > { %585 = vmatpush1.bf16.msra.mxu0 %v7840_v46  ;;  %v9096_v46 = vcombine.high %v8978_v51, %v9089_v44 }
  0x59   : > { %928 = vmatpush1.bf16.msra.mxu1 %v7841_v47  ;;  %586 = vmatprep.subr.bf16.mxu0 %v7842_v52  ;;  %v9100_v47 = vcombine.low %v8978_v51, %v9089_v44  ;;  %v6903_v52 = vcombine.high %v9089_v44, %v293_v49  ;;  %v687_v60 = vshll.u32 %v6902_v54, 16 }
  0x5a   : > { %929 = vmatprep.subr.bf16.mxu1 %v7844_v55  ;;  %v7893_v55 = vld [vmem:[%s10496_s2 + $0x330] ss:$8 sps:$4 sm:$0xff]   ;;  %v1078_v21 = vshll.u32 %v9096_v46, 16 }
  0x5b   : > { %v693_v57 = vshrl.u32 %v6903_v52, 16  ;;  %v696_v58 = vshll.u32 %v6903_v52, 16 }
  0x5c   : > { %587 = vmatpush1.bf16.msra.mxu0 %v7846_v59  ;;  %v684_v59 = vshrl.u32 %v6902_v54, 16 }
  0x5d   : > { %930 = vmatpush1.bf16.msra.mxu1 %v7847_v62  ;;  %588 = vmatprep.subr.bf16.mxu0 %v7848_v3  ;;  %v1073_v62 = vshll.u32 %v8985_v53, 16  ;;  %v695_v0 = vrot.slane %v693_v57, 3  ;;  %v698_v1 = vrot.slane %v696_v58, 4  ;;  %v689_v3 = vrot.slane %v687_v60, 4 }
  0x5e   : > { %931 = vmatprep.subr.bf16.mxu1 %v7850_v4  ;;  %v686_v2 = vrot.slane %v684_v59, 3  ;;  %v294_v4 = vld [vmem:[%s8956_s18 + $0x38] sm:$0xff]  ;;  %v7922_v59 = vld [vmem:[%s10496_s2 + $0x284] ss:$8 sps:$4 sm:$0xff]  }
  0x5f   : > { %v9143_v13 = vcombine.low %v293_v49, %v294_v4 }
  0x60   : > { %589 = vmatpush1.bf16.msra.mxu0 %v7852_v7  ;;  %v9133_v7 = vor.u32 %v698_v1, %v695_v0  ;;  %v9135_v8 = vor.u32 %v689_v3, %v686_v2  ;;  %v7925_v0 = vld [vmem:[%s10496_s2 + $0x384] ss:$8 sps:$4 sm:$0xff]   ;;  %v7920_v2 = vld [vmem:[%s10496_s2 + $0x280] ss:$8 sps:$4 sm:$0xff]  }
  0x61   : > { %932 = vmatpush1.bf16.msra.mxu1 %v7853_v9  ;;  %590 = vmatprep.subr.bf16.mxu0 %v7854_v10  ;;  %v9137_v9 = vcombine.high %v293_v49, %v294_v4  ;;  %v295_v10 = vld [vmem:[%s8956_s18 + $0x40] sm:$0xff]  ;;  %v7914_v49 = vld [vmem:[%s10496_s2 + $0x270] ss:$8 sps:$4 sm:$0xff]  }
  0x62   : > { %933 = vmatprep.subr.bf16.mxu1 %v7856_v16  ;;  %v6905_v14 = vcombine.high %v294_v4, %v295_v10  ;;  %v6904_v15 = vcombine.low %v294_v4, %v295_v10  ;;  %v1071_v16 = vshrl.u32 %v8985_v53, 16  ;;  %v7905_v53 = vld [vmem:[%s10496_s2 + $0x350] ss:$8 sps:$4 sm:$0xff]   ;;  %v7923_v3 = vld [vmem:[%s10496_s2 + $0x380] ss:$8 sps:$4 sm:$0xff]  }
  0x64   : > { %591 = vmatpush1.bf16.msra.mxu0 %v7858_v18  ;;  %v700_v18 = vsel %vm648_vm0, %v9018_v11, %v9133_v7  ;;  %v711_v22 = vshrl.u32 %v6905_v14, 16  ;;  %v714_v23 = vshll.u32 %v6905_v14, 16  ;;  %v702_v11 = vshrl.u32 %v6904_v15, 16 }
  0x65   : > { %934 = vmatpush1.bf16.msra.mxu1 %v7859_v19  ;;  %592 = vmatprep.subr.bf16.mxu0 %v7860_v20  ;;  %v691_v19 = vsel %vm648_vm0, %v9043_v29, %v9135_v8  ;;  %v1075_v20 = vrot.slane %v1073_v62, 1  ;;  %v705_v24 = vshll.u32 %v6904_v15, 16  ;;  %v7926_v15 = vld [vmem:[%s10496_s2 + $0x290] ss:$8 sps:$4 sm:$0xff]  }
  0x66   : > { %935 = vmatprep.subr.bf16.mxu1 %v7862_v25  ;;  %v7910_v25 = vld [vmem:[%s10496_s2 + $0x264] ss:$8 sps:$4 sm:$0xff]   ;;  %v716_v28 = vrot.slane %v714_v23, 4  ;;  %v704_v29 = vrot.slane %v702_v11, 3  ;;  %v7936_v23 = vld [vmem:[%s10496_s2 + $0x2a0] ss:$8 sps:$4 sm:$0xff]  }
  0x68   : > { %593 = vmatpush1.bf16.msra.mxu0 %v7864_v26  ;;  %v7913_v26 = vld [vmem:[%s10496_s2 + $0x364] ss:$8 sps:$4 sm:$0xff]  }
  0x69   : > { %936 = vmatpush1.bf16.msra.mxu1 %v7865_v27  ;;  %1298 = vmatprep.subr.bf16.mxu0 %v7874_v30  ;;  %v713_v27 = vrot.slane %v711_v22, 3  ;;  %v707_v30 = vrot.slane %v705_v24, 4  ;;  %v7939_v24 = vld [vmem:[%s10496_s2 + $0x3a0] ss:$8 sps:$4 sm:$0xff]  }
  0x6a   : > { %1722 = vmatprep.subr.bf16.mxu1 %v7877_v31  ;;  %v9168_v31 = vld [vmem:[%s8956_s18 + $0x48] sm:$0xff] }
  0x6b   : > { %595 = vmatmul.mubr.bf16.vlgmr.msra.gmra.mrb[0].mxu0 %v9053_v32 }
  0x6c   : > { %938 = vmatmul.mubr.bf16.vlgmr.msra.gmra.mrb[0].mxu1 %v665_v34  ;;  %1299 = vmatpush1.bf16.msra.mxu0 %v7872_v33  ;;  %v1076_v33 = vor.u32 %v1075_v20, %v1071_v16  ;;  %v9170_v34 = vrot.slane %v1078_v21, 1  ;;  %v7938_v20 = vld [vmem:[%s10496_s2 + $0x2a4] ss:$8 sps:$4 sm:$0xff]  }
  0x6d   : > { %1723 = vmatpush1.bf16.msra.mxu1 %v7875_v35  ;;  %1300 = vmatprep.subr.bf16.mxu0 %v7880_v36  ;;  %v7908_v35 = vld [vmem:[%s10496_s2 + $0x260] ss:$8 sps:$4 sm:$0xff]   ;;  %v7941_v21 = vld [vmem:[%s10496_s2 + $0x3a4] ss:$8 sps:$4 sm:$0xff]  }
  0x6e   : > { %1724 = vmatprep.subr.bf16.mxu1 %v7883_v37  ;;  %604 = vmatprep.mubr.bf16.mxu0 %v9096_v46  ;;  %v7911_v36 = vld [vmem:[%s10496_s2 + $0x360] ss:$8 sps:$4 sm:$0xff]   ;;  %v9178_v37 = vor.u32 %v716_v28, %v713_v27  ;;  %v1081_v58 = vsel %vm1057_vm1, %v1076_v33, %v9170_v34  ;;  %v7942_v28 = vld [vmem:[%s10496_s2 + $0x2b0] ss:$8 sps:$4 sm:$0xff]  }
  0x6f   : > { %947 = vmatprep.mubr.bf16.mxu1 %v700_v18  ;;  %v7952_v33 = vld [vmem:[%s10496_s2 + $0x2c0] ss:$8 sps:$4 sm:$0xff]  }
  0x70   : > { %1301 = vmatpush1.bf16.msra.mxu0 %v7878_v38  ;;  %v9180_v38 = vor.u32 %v707_v30, %v704_v29  ;;  %v7947_v29 = vld [vmem:[%s10496_s2 + $0x3b0] ss:$8 sps:$4 sm:$0xff]   ;;  %v7954_v30 = vld [vmem:[%s10496_s2 + $0x2c4] ss:$8 sps:$4 sm:$0xff]  }
  0x71   : > { %1725 = vmatpush1.bf16.msra.mxu1 %v7881_v39  ;;  %1302 = vmatprep.subr.bf16.mxu0 %v7886_v40  ;;  %v9183_v39 = vcombine.high %v295_v10, %v9168_v31  ;;  %v9186_v40 = vcombine.low %v295_v10, %v9168_v31  ;;  %v7928_v10 = vld [vmem:[%s10496_s2 + $0x294] ss:$8 sps:$4 sm:$0xff]  }
  0x72   : > { %1726 = vmatprep.subr.bf16.mxu1 %v7889_v41  ;;  %v7916_v41 = vld [vmem:[%s10496_s2 + $0x274] ss:$8 sps:$4 sm:$0xff]   ;;  %v9214_v57 = vsel %vm648_vm0, %v9135_v8, %v9180_v38 }
  0x73   : > { %605 = vmatmul.mubr.bf16.gmra.mrb[4].mxu0 %v9100_v47 }
  0x74   : > { %1303 = vmatpush1.bf16.msra.mxu0 %v7884_v42  ;;  %614 = vmatprep.mubr.bf16.mxu0 %v9137_v9  ;;  %v6907_v42 = vcombine.high %v9168_v31, %v9168_v31 }
  0x75   : > { %1727 = vmatpush1.bf16.msra.mxu1 %v7887_v43  ;;  %1304 = vmatprep.subr.bf16.mxu0 %v7892_v45  ;;  %v6906_v43 = vcombine.low %v9168_v31, %v9168_v31  ;;  %v7919_v45 = vld [vmem:[%s10496_s2 + $0x374] ss:$8 sps:$4 sm:$0xff]  }
  0x76   : > { %1728 = vmatprep.subr.bf16.mxu1 %v7895_v48  ;;  %948 = vmatmul.mubr.bf16.gmra.mrb[4].mxu1 %v691_v19  ;;  %v9201_v48 = vsel %vm648_vm0, %v9133_v7, %v9178_v37  ;;  %v732_v52 = vshll.u32 %v6907_v42, 16  ;;  %v7931_v19 = vld [vmem:[%s10496_s2 + $0x390] ss:$8 sps:$4 sm:$0xff]  }
  0x77   : > { %957 = vmatprep.mubr.bf16.mxu1 %v9201_v48  ;;  %v720_v54 = vshrl.u32 %v6906_v43, 16 }
  0x78   : > { %1305 = vmatpush1.bf16.msra.mxu0 %v7890_v50  ;;  %v729_v50 = vshrl.u32 %v6907_v42, 16  ;;  %v7965_v42 = vld [vmem:[%s10496_s2 + $0x3d4] ss:$8 sps:$4 sm:$0xff]  }
  0x79   : > { %1729 = vmatpush1.bf16.msra.mxu1 %v7893_v55  ;;  %1306 = vmatprep.subr.bf16.mxu0 %v7898_v56  ;;  %v723_v55 = vshll.u32 %v6906_v43, 16  ;;  %v7917_v56 = vld [vmem:[%s10496_s2 + $0x370] ss:$8 sps:$4 sm:$0xff]   ;;  %v722_v62 = vrot.slane %v720_v54, 3  ;;  %v7973_v54 = vld [vmem:[%s10496_s2 + $0x3e4] ss:$8 sps:$4 sm:$0xff]  }
  0x7a   : > { %1730 = vmatprep.subr.bf16.mxu1 %v7901_v61  ;;  %v731_v60 = vrot.slane %v729_v50, 3  ;;  %v734_v61 = vrot.slane %v732_v52, 4  ;;  %v7958_v43 = vld [vmem:[%s10496_s2 + $0x2d0] ss:$8 sps:$4 sm:$0xff]  }
  0x7b   : > { %615 = vmatmul.mubr.bf16.gmra.mrb[8].mxu0 %v9143_v13 }
  0x7c   : > { %1307 = vmatpush1.bf16.msra.mxu0 %v7896_v63  ;;  %624 = vmatprep.mubr.bf16.mxu0 %v9183_v39  ;;  %v725_v63 = vrot.slane %v723_v55, 4  ;;  %v735_v1 = vor.u32 %v734_v61, %v731_v60  ;;  %v7968_v55 = vld [vmem:[%s10496_s2 + $0x2e0] ss:$8 sps:$4 sm:$0xff]   ;;  %v1066_v60 = vshll.u32 %v9100_v47, 16 }
  0x7d   : > { %1731 = vmatpush1.bf16.msra.mxu1 %v7899_v5  ;;  %1308 = vmatprep.subr.bf16.mxu0 %v7904_v6  ;;  %v1387_v6 = vld [vmem:[%s8956_s18 + $0x18] sm:$0x88] }
  0x7e   : > { %1732 = vmatprep.subr.bf16.mxu1 %v7907_v12  ;;  %958 = vmatmul.mubr.bf16.gmra.mrb[8].mxu1 %v9214_v57  ;;  %v726_v4 = vor.u32 %v725_v63, %v722_v62  ;;  %v736_v5 = vsel %vm648_vm0, %v9178_v37, %v735_v1  ;;  %v7933_v12 = vld [vmem:[%s10496_s2 + $0x394] ss:$8 sps:$4 sm:$0xff]   ;;  %v7047_v14 = vcombine.high %v1387_v6, %v8978_v51 }
  0x7f   : > { %967 = vmatprep.mubr.bf16.mxu1 %v736_v5  ;;  %v9317_v63 = vld [vmem:[%s8956_s18 + $0x50] sm:$0xff] }
  0x80   : > { %1309 = vmatpush1.bf16.msra.mxu0 %v7902_v17  ;;  %v727_v16 = vsel %vm648_vm0, %v9180_v38, %v726_v4  ;;  %v1484_v17 = vshrl.u32 %v7047_v14, 16  ;;  %v1487_v18 = vshll.u32 %v7047_v14, 16  ;;  %v7979_v1 = vld [vmem:[%s10496_s2 + $0x3f4] ss:$8 sps:$4 sm:$0xff]   ;;  %v7053_v4 = vcombine.high %v9168_v31, %v9317_v63  ;;  %v7977_v5 = vld [vmem:[%s10496_s2 + $0x3f0] ss:$8 sps:$4 sm:$0xff]  }
  0x81   : > { %1733 = vmatpush1.bf16.msra.mxu1 %v7905_v53  ;;  %1310 = vmatprep.subr.bf16.mxu0 %v7910_v25  ;;  %v7944_v25 = vld [vmem:[%s10496_s2 + $0x2b4] ss:$8 sps:$4 sm:$0xff]  }
  0x82   : > { %1734 = vmatprep.subr.bf16.mxu1 %v7913_v26  ;;  %v1486_v53 = vrot.slane %v1484_v17, 3  ;;  %v1489_v22 = vrot.slane %v1487_v18, 4  ;;  %v7949_v26 = vld [vmem:[%s10496_s2 + $0x3b4] ss:$8 sps:$4 sm:$0xff]   ;;  %v7052_v17 = vcombine.low %v9168_v31, %v9317_v63  ;;  %v7985_v18 = vld [vmem:[%s10496_s2 + $0x500] ss:$8 sps:$4 sm:$0xff]  }
  0x83   : > { %625 = vmatmul.mubr.bf16.gmra.mrb[12].mxu0 %v9186_v40  ;;  %v7990_v31 = vld [vmem:[%s10496_s2 + $0x414] ss:$8 sps:$4 sm:$0xff]  }
  0x84   : > { %1311 = vmatpush1.bf16.msra.mxu0 %v7908_v35  ;;  %1330 = vmatprep.mubr.bf16.mxu0 %v1081_v58  ;;  %v1490_v11 = vor.u32 %v1489_v22, %v1486_v53  ;;  %v7955_v35 = vld [vmem:[%s10496_s2 + $0x3c0] ss:$8 sps:$4 sm:$0xff]   ;;  %v1059_v58 = vshrl.u32 %v9053_v32, 16  ;;  %v1531_v53 = vshll.u32 %v7053_v4, 16 }
  0x85   : > { %1735 = vmatpush1.bf16.msra.mxu1 %v7911_v36  ;;  %1312 = vmatprep.subr.bf16.mxu0 %v7916_v41  ;;  %v7046_v36 = vcombine.low %v1387_v6, %v8978_v51  ;;  %v7960_v41 = vld [vmem:[%s10496_s2 + $0x2d4] ss:$8 sps:$4 sm:$0xff]   ;;  %v7963_v51 = vld [vmem:[%s10496_s2 + $0x3d0] ss:$8 sps:$4 sm:$0xff]  }
  0x86   : > { %1736 = vmatprep.subr.bf16.mxu1 %v7919_v45  ;;  %968 = vmatmul.mubr.bf16.gmra.mrb[12].mxu1 %v727_v16  ;;  %v1499_v27 = vsel %vm648_vm0, %v1490_v11, %v9133_v7  ;;  %v7957_v7 = vld [vmem:[%s10496_s2 + $0x3c4] ss:$8 sps:$4 sm:$0xff]   ;;  %v1061_v45 = vshll.u32 %v9053_v32, 16  ;;  %v7974_v32 = vld [vmem:[%s10496_s2 + $0x2f0] ss:$8 sps:$4 sm:$0xff]   ;;  %v1082_v11 = vshrl.u32 %v9100_v47, 16 }
  0x87   : > { %1754 = vmatprep.mubr.bf16.mxu1 %v1499_v27  ;;  %v1467_v50 = vshrl.u32 %v7046_v36, 16  ;;  %v1470_v52 = vshll.u32 %v7046_v36, 16  ;;  %v7980_v16 = vld [vmem:[%s10496_s2 + $0x400] ss:$8 sps:$4 sm:$0xff]   ;;  %v7988_v27 = vld [vmem:[%s10496_s2 + $0x410] ss:$8 sps:$4 sm:$0xff]  }
  0x88   : > { %1313 = vmatpush1.bf16.msra.mxu0 %v7914_v49  ;;  %v7970_v49 = vld [vmem:[%s10496_s2 + $0x2e4] ss:$8 sps:$4 sm:$0xff]  }
  0x89   : > { %1737 = vmatpush1.bf16.msra.mxu1 %v7917_v56  ;;  %1314 = vmatprep.subr.bf16.mxu0 %v7922_v59  ;;  %v7971_v56 = vld [vmem:[%s10496_s2 + $0x3e0] ss:$8 sps:$4 sm:$0xff]   ;;  %v1063_v59 = vrot.slane %v1061_v45, 1  ;;  %v1469_v61 = vrot.slane %v1467_v50, 3  ;;  %v1472_v62 = vrot.slane %v1470_v52, 4  ;;  %v1098_v50 = vshrl.u32 %v9143_v13, 16 }
  0x8a   : > { %1738 = vmatprep.subr.bf16.mxu1 %v7925_v0  ;;  %v7976_v0 = vld [vmem:[%s10496_s2 + $0x2f4] ss:$8 sps:$4 sm:$0xff]  }
  0x8b   : > { %v1064_v6 = vor.u32 %v1063_v59, %v1059_v58  ;;  %v1473_v14 = vor.u32 %v1472_v62, %v1469_v61  ;;  %v986_v45 = vld [vmem:[%s8956_s18 + $0x50] sm:$0x11]  ;;  %v7994_v58 = vld [vmem:[%s10496_s2 + $0x420] ss:$8 sps:$4 sm:$0xff]  }
  0x8c   : > { %1315 = vmatpush1.bf16.msra.mxu0 %v7920_v2  ;;  %v1090_v2 = vshrl.u32 %v9096_v46, 16 }
  0x8d   : > { %1739 = vmatpush1.bf16.msra.mxu1 %v7923_v3  ;;  %1316 = vmatprep.subr.bf16.mxu0 %v7928_v10  ;;  %v1094_v3 = vshll.u32 %v9137_v9, 16  ;;  %v1068_v10 = vrot.slane %v1066_v60, 1  ;;  %v6981_v60 = vcombine.high %v986_v45, %v986_v45 }
  0x8e   : > { %1740 = vmatprep.subr.bf16.mxu1 %v7933_v12  ;;  %v7982_v12 = vld [vmem:[%s10496_s2 + $0x404] ss:$8 sps:$4 sm:$0xff]  }
  0x8f   : > { %v1069_v22 = vsel %vm1057_vm1, %v1064_v6, %v1068_v10 }
  0x90   : > { %1317 = vmatpush1.bf16.msra.mxu0 %v7926_v15  ;;  %v7987_v15 = vld [vmem:[%s10496_s2 + $0x504] ss:$8 sps:$4 sm:$0xff]  }
  0x91   : > { %1741 = vmatpush1.bf16.msra.mxu1 %v7931_v19  ;;  %1318 = vmatprep.subr.bf16.mxu0 %v7938_v20  ;;  %v1092_v19 = vor.u32 %v1090_v2, %v9170_v34  ;;  %v9350_v20 = vrot.slane %v1094_v3, 1  ;;  %v9361_v34 = vld [vmem:[%s8956_s18 + $0x58] sm:$0xff] }
  0x92   : > { %1742 = vmatprep.subr.bf16.mxu1 %v7941_v21  ;;  %v1528_v21 = vshrl.u32 %v7053_v4, 16  ;;  %v7055_v36 = vcombine.high %v9361_v34, %v9361_v34  ;;  %v8005_v2 = vld [vmem:[%s10496_s2 + $0x534] ss:$8 sps:$4 sm:$0xff]   ;;  %v8000_v4 = vld [vmem:[%s10496_s2 + $0x430] ss:$8 sps:$4 sm:$0xff]  }
  0x94   : > { %1319 = vmatpush1.bf16.msra.mxu0 %v7936_v23  ;;  %v1482_v23 = vsel %vm648_vm0, %v1473_v14, %v9135_v8  ;;  %v1110_v8 = vshll.u32 %v9183_v39, 16  ;;  %v1546_v61 = vshrl.u32 %v7055_v36, 16  ;;  %v1549_v62 = vshll.u32 %v7055_v36, 16  ;;  %v8003_v14 = vld [vmem:[%s10496_s2 + $0x530] ss:$8 sps:$4 sm:$0xff]  }
  0x95   : > { %1743 = vmatpush1.bf16.msra.mxu1 %v7939_v24  ;;  %1320 = vmatprep.subr.bf16.mxu0 %v7944_v25  ;;  %v1086_v24 = vshll.u32 %v9143_v13, 16  ;;  %v7993_v25 = vld [vmem:[%s10496_s2 + $0x514] ss:$8 sps:$4 sm:$0xff]   ;;  %v8014_v36 = vld [vmem:[%s10496_s2 + $0x450] ss:$8 sps:$4 sm:$0xff]  }
  0x96   : > { %1744 = vmatprep.subr.bf16.mxu1 %v7949_v26  ;;  %v1106_v26 = vshrl.u32 %v9137_v9, 16  ;;  %v1112_v52 = vrot.slane %v1110_v8, 1 }
  0x98   : > { %1321 = vmatpush1.bf16.msra.mxu0 %v7942_v28  ;;  %v1519_v28 = vshrl.u32 %v7052_v17, 16 }
  0x99   : > { %1745 = vmatpush1.bf16.msra.mxu1 %v7947_v29  ;;  %1322 = vmatprep.subr.bf16.mxu0 %v7954_v30  ;;  %v1522_v29 = vshll.u32 %v7052_v17, 16  ;;  %v7991_v30 = vld [vmem:[%s10496_s2 + $0x510] ss:$8 sps:$4 sm:$0xff]   ;;  %v1548_v17 = vrot.slane %v1546_v61, 3  ;;  %v8027_v61 = vld [vmem:[%s10496_s2 + $0x560] ss:$8 sps:$4 sm:$0xff]  }
  0x9a   : > { %1746 = vmatprep.subr.bf16.mxu1 %v7957_v7  ;;  %v1097_v7 = vsel %vm1057_vm1, %v1092_v19, %v9350_v20  ;;  %v8008_v19 = vld [vmem:[%s10496_s2 + $0x444] ss:$8 sps:$4 sm:$0xff]  }
  0x9c   : > { %1323 = vmatpush1.bf16.msra.mxu0 %v7952_v33  ;;  %v1530_v33 = vrot.slane %v1528_v21, 3  ;;  %v6980_v21 = vcombine.low %v986_v45, %v986_v45  ;;  %v8017_v45 = vld [vmem:[%s10496_s2 + $0x550] ss:$8 sps:$4 sm:$0xff]  }
  0x9d   : > { %1747 = vmatpush1.bf16.msra.mxu1 %v7955_v35  ;;  %1324 = vmatprep.subr.bf16.mxu0 %v7960_v41  ;;  %v1533_v35 = vrot.slane %v1531_v53, 4  ;;  %v1084_v41 = vor.u32 %v1082_v11, %v1068_v10 }
  0x9e   : > { %1748 = vmatprep.subr.bf16.mxu1 %v7965_v42  ;;  %v9378_v42 = vrot.slane %v1086_v24, 1  ;;  %v8011_v24 = vld [vmem:[%s10496_s2 + $0x540] ss:$8 sps:$4 sm:$0xff]  }
  0x9f   : > { %v1534_v59 = vor.u32 %v1533_v35, %v1530_v33  ;;  %v8019_v33 = vld [vmem:[%s10496_s2 + $0x554] ss:$8 sps:$4 sm:$0xff]  }
  0xa0   : > { %1325 = vmatpush1.bf16.msra.mxu0 %v7958_v43  ;;  %v7996_v43 = vld [vmem:[%s10496_s2 + $0x424] ss:$8 sps:$4 sm:$0xff]   ;;  %v1100_v3 = vor.u32 %v1098_v50, %v9378_v42 }
  0xa1   : > { %1749 = vmatpush1.bf16.msra.mxu1 %v7963_v51  ;;  %1326 = vmatprep.subr.bf16.mxu0 %v7970_v49  ;;  %v7999_v51 = vld [vmem:[%s10496_s2 + $0x524] ss:$8 sps:$4 sm:$0xff]   ;;  %v1108_v49 = vor.u32 %v1106_v26, %v9350_v20 }
  0xa2   : > { %1750 = vmatprep.subr.bf16.mxu1 %v7973_v54  ;;  %v1102_v54 = vshll.u32 %v9186_v40, 16  ;;  %v8024_v50 = vld [vmem:[%s10496_s2 + $0x464] ss:$8 sps:$4 sm:$0xff]  }
  0xa4   : > { %1327 = vmatpush1.bf16.msra.mxu0 %v7968_v55  ;;  %v1521_v55 = vrot.slane %v1519_v28, 3  ;;  %v1104_v6 = vrot.slane %v1102_v54, 1  ;;  %v9449_v28 = vld [vmem:[%s8956_s18 + $0x20] sm:$0xff] }
  0xa5   : > { %1751 = vmatpush1.bf16.msra.mxu1 %v7971_v56  ;;  %1328 = vmatprep.subr.bf16.mxu0 %v7976_v0  ;;  %v1524_v56 = vrot.slane %v1522_v29, 4  ;;  %v1089_v0 = vsel %vm1057_vm1, %v1084_v41, %v9378_v42  ;;  %v1118_v29 = vshll.u32 %v6980_v21, 16  ;;  %v8054_v21 = vld [vmem:[%s10496_s2 + $0x4b0] ss:$8 sps:$4 sm:$0xff]  }
  0xa6   : > { %1752 = vmatprep.subr.bf16.mxu1 %v7979_v1  ;;  %v8002_v1 = vld [vmem:[%s10496_s2 + $0x434] ss:$8 sps:$4 sm:$0xff]  }
  0xa7   : > { %v9414_v10 = vor.u32 %v1524_v56, %v1521_v55  ;;  %v8029_v55 = vld [vmem:[%s10496_s2 + $0x564] ss:$8 sps:$4 sm:$0xff]   ;;  %v8022_v56 = vld [vmem:[%s10496_s2 + $0x460] ss:$8 sps:$4 sm:$0xff]  }
  0xa8   : > { %1329 = vmatpush1.bf16.msra.mxu0 %v7974_v32  ;;  %v7054_v32 = vcombine.low %v9361_v34, %v9361_v34 }
  0xa9   : > { %1753 = vmatpush1.bf16.msra.mxu1 %v7977_v5  ;;  %2020 = vmatprep.subr.bf16.mxu0 %v7982_v12  ;;  %v9412_v5 = vsel %vm1057_vm1, %v1108_v49, %v1112_v52  ;;  %v1122_v12 = vshrl.u32 %v9183_v39, 16  ;;  %v1526_v11 = vsel %vm648_vm0, %v9180_v38, %v9414_v10  ;;  %v7193_v38 = vcombine.high %v9449_v28, %v9089_v44 }
  0xaa   : > { %2428 = vmatprep.subr.bf16.mxu1 %v7987_v15  ;;  %v1535_v15 = vsel %vm648_vm0, %v9178_v37, %v1534_v59  ;;  %v1537_v53 = vshrl.u32 %v7054_v32, 16  ;;  %v9431_v37 = vsel %vm1057_vm1, %v1100_v3, %v1104_v6  ;;  %v1120_v49 = vrot.slane %v1118_v29, 1  ;;  %v8041_v3 = vld [vmem:[%s10496_s2 + $0x584] ss:$8 sps:$4 sm:$0xff]  }
  0xab   : > { %1331 = vmatmul.mubr.bf16.vlgmr.msra.gmra.mrb[16].mxu0 %v1069_v22  ;;  %v8013_v22 = vld [vmem:[%s10496_s2 + $0x544] ss:$8 sps:$4 sm:$0xff]   ;;  %v9446_v26 = vor.u32 %v1122_v12, %v1112_v52  ;;  %v2203_v35 = vshll.u32 %v7193_v38, 16  ;;  %v2201_v44 = vshrl.u32 %v7193_v38, 16  ;;  %v8045_v12 = vld [vmem:[%s10496_s2 + $0x590] ss:$8 sps:$4 sm:$0xff]  }
  0xac   : > { %1755 = vmatmul.mubr.bf16.vlgmr.msra.gmra.mrb[16].mxu1 %v1482_v23  ;;  %2021 = vmatpush1.bf16.msra.mxu0 %v7980_v16  ;;  %v1126_v16 = vshll.u32 %v6981_v60, 16  ;;  %v8006_v23 = vld [vmem:[%s10496_s2 + $0x440] ss:$8 sps:$4 sm:$0xff]  }
  0xad   : > { %2429 = vmatpush1.bf16.msra.mxu1 %v7985_v18  ;;  %2022 = vmatprep.subr.bf16.mxu0 %v7990_v31  ;;  %v1551_v18 = vrot.slane %v1549_v62, 4  ;;  %v1114_v31 = vshrl.u32 %v9186_v40, 16  ;;  %v2205_v54 = vrot.slane %v2203_v35, 1  ;;  %v8032_v62 = vld [vmem:[%s10496_s2 + $0x474] ss:$8 sps:$4 sm:$0xff]  }
  0xae   : > { %2430 = vmatprep.subr.bf16.mxu1 %v7993_v25  ;;  %1340 = vmatprep.mubr.bf16.mxu0 %v1097_v7  ;;  %v8016_v25 = vld [vmem:[%s10496_s2 + $0x454] ss:$8 sps:$4 sm:$0xff]   ;;  %v1128_v8 = vrot.slane %v1126_v16, 1  ;;  %v8048_v16 = vld [vmem:[%s10496_s2 + $0x4a0] ss:$8 sps:$4 sm:$0xff]  }
  0xaf   : > { %1764 = vmatprep.mubr.bf16.mxu1 %v9201_v48  ;;  %v7997_v48 = vld [vmem:[%s10496_s2 + $0x520] ss:$8 sps:$4 sm:$0xff]  }
  0xb0   : > { %2023 = vmatpush1.bf16.msra.mxu0 %v7988_v27  ;;  %v1552_v27 = vor.u32 %v1551_v18, %v1548_v17  ;;  %v1129_v41 = vsel %vm1057_vm1, %v9446_v26, %v1128_v8  ;;  %v8051_v17 = vld [vmem:[%s10496_s2 + $0x5a0] ss:$8 sps:$4 sm:$0xff]   ;;  %v8056_v18 = vld [vmem:[%s10496_s2 + $0x4b4] ss:$8 sps:$4 sm:$0xff]  }
  0xb1   : > { %2431 = vmatpush1.bf16.msra.mxu1 %v7991_v30  ;;  %2024 = vmatprep.subr.bf16.mxu0 %v7996_v43  ;;  %v1539_v30 = vrot.slane %v1537_v53, 3  ;;  %v8057_v53 = vld [vmem:[%s10496_s2 + $0x5b0] ss:$8 sps:$4 sm:$0xff]   ;;  %v8071_v8 = vld [vmem:[%s10496_s2 + $0x5d4] ss:$8 sps:$4 sm:$0xff]  }
  0xb2   : > { %2432 = vmatprep.subr.bf16.mxu1 %v7999_v51  ;;  %v1553_v43 = vsel %vm648_vm0, %v1534_v59, %v1552_v27  ;;  %v9466_v51 = vor.u32 %v1114_v31, %v1104_v6  ;;  %v8044_v6 = vld [vmem:[%s10496_s2 + $0x494] ss:$8 sps:$4 sm:$0xff]   ;;  %v8063_v31 = vld [vmem:[%s10496_s2 + $0x5c0] ss:$8 sps:$4 sm:$0xff]   ;;  %v8066_v27 = vld [vmem:[%s10496_s2 + $0x4d0] ss:$8 sps:$4 sm:$0xff]  }
  0xb3   : > { %1341 = vmatmul.mubr.bf16.gmra.mrb[20].mxu0 %v1089_v0  ;;  %v8035_v0 = vld [vmem:[%s10496_s2 + $0x574] ss:$8 sps:$4 sm:$0xff]   ;;  %v8072_v38 = vld [vmem:[%s10496_s2 + $0x4e0] ss:$8 sps:$4 sm:$0xff]  }
  0xb4   : > { %1765 = vmatmul.mubr.bf16.gmra.mrb[20].mxu1 %v9214_v57  ;;  %2025 = vmatpush1.bf16.msra.mxu0 %v7994_v58  ;;  %v1540_v57 = vshll.u32 %v7054_v32, 16  ;;  %v2206_v58 = vor.u32 %v2205_v54, %v2201_v44  ;;  %v1121_v59 = vsel %vm1057_vm1, %v9466_v51, %v1120_v49  ;;  %v8033_v32 = vld [vmem:[%s10496_s2 + $0x570] ss:$8 sps:$4 sm:$0xff]   ;;  %v9605_v54 = vcombine.high %v9317_v63, %v9361_v34 }
  0xb5   : > { %2433 = vmatpush1.bf16.msra.mxu1 %v7997_v48  ;;  %2026 = vmatprep.subr.bf16.mxu0 %v8002_v1  ;;  %v8030_v48 = vld [vmem:[%s10496_s2 + $0x470] ss:$8 sps:$4 sm:$0xff]  }
  0xb6   : > { %2434 = vmatprep.subr.bf16.mxu1 %v8005_v2  ;;  %1350 = vmatprep.mubr.bf16.mxu0 %v9412_v5  ;;  %v1542_v7 = vrot.slane %v1540_v57, 4  ;;  %v2211_v1 = vsel %vm1057_vm1, %v2206_v58, %v9350_v20  ;;  %v8038_v2 = vld [vmem:[%s10496_s2 + $0x484] ss:$8 sps:$4 sm:$0xff]   ;;  %v8036_v20 = vld [vmem:[%s10496_s2 + $0x480] ss:$8 sps:$4 sm:$0xff]  }
  0xb7   : > { %1774 = vmatprep.mubr.bf16.mxu1 %v1535_v15  ;;  %v8053_v15 = vld [vmem:[%s10496_s2 + $0x5a4] ss:$8 sps:$4 sm:$0xff]   ;;  %v8078_v44 = vld [vmem:[%s10496_s2 + $0x4f0] ss:$8 sps:$4 sm:$0xff]   ;;  %v8089_v58 = vld [vmem:[%s10496_s2 + $0x700] ss:$8 sps:$4 sm:$0xff]  }
  0xb8   : > { %2027 = vmatpush1.bf16.msra.mxu0 %v8000_v4  ;;  %v1543_v52 = vor.u32 %v1542_v7, %v1539_v30  ;;  %v8039_v4 = vld [vmem:[%s10496_s2 + $0x580] ss:$8 sps:$4 sm:$0xff]   ;;  %v8062_v57 = vld [vmem:[%s10496_s2 + $0x4c4] ss:$8 sps:$4 sm:$0xff]  }
  0xb9   : > { %2435 = vmatpush1.bf16.msra.mxu1 %v8003_v14  ;;  %2028 = vmatprep.subr.bf16.mxu0 %v8008_v19  ;;  %v8050_v14 = vld [vmem:[%s10496_s2 + $0x4a4] ss:$8 sps:$4 sm:$0xff]   ;;  %v8059_v19 = vld [vmem:[%s10496_s2 + $0x5b4] ss:$8 sps:$4 sm:$0xff]  }
  0xba   : > { %2436 = vmatprep.subr.bf16.mxu1 %v8013_v22  ;;  %v1544_v60 = vsel %vm648_vm0, %v9414_v10, %v1543_v52  ;;  %v8042_v10 = vld [vmem:[%s10496_s2 + $0x490] ss:$8 sps:$4 sm:$0xff]   ;;  %v8065_v22 = vld [vmem:[%s10496_s2 + $0x5c4] ss:$8 sps:$4 sm:$0xff]  }
  0xbb   : > { %1351 = vmatmul.mubr.bf16.gmra.mrb[24].mxu0 %v9431_v37  ;;  %v8074_v30 = vld [vmem:[%s10496_s2 + $0x4e4] ss:$8 sps:$4 sm:$0xff]  }
  0xbc   : > { %1775 = vmatmul.mubr.bf16.gmra.mrb[24].mxu1 %v1526_v11  ;;  %2029 = vmatpush1.bf16.msra.mxu0 %v8006_v23  ;;  %v8060_v23 = vld [vmem:[%s10496_s2 + $0x4c0] ss:$8 sps:$4 sm:$0xff]   ;;  %v8077_v7 = vld [vmem:[%s10496_s2 + $0x5e4] ss:$8 sps:$4 sm:$0xff]  }
  0xbd   : > { %2437 = vmatpush1.bf16.msra.mxu1 %v8011_v24  ;;  %2030 = vmatprep.subr.bf16.mxu0 %v8016_v25  ;;  %v8688_v11 = vld [vmem:[%s8956_s18 + $0x28] sm:$0xff]  ;;  %v8068_v25 = vld [vmem:[%s10496_s2 + $0x4d4] ss:$8 sps:$4 sm:$0xff]  }
  0xbe   : > { %2438 = vmatprep.subr.bf16.mxu1 %v8019_v33  ;;  %1360 = vmatprep.mubr.bf16.mxu0 %v1129_v41  ;;  %v7192_v24 = vcombine.low %v9449_v28, %v8688_v11  ;;  %v8069_v28 = vld [vmem:[%s10496_s2 + $0x5d0] ss:$8 sps:$4 sm:$0xff]   ;;  %v8075_v33 = vld [vmem:[%s10496_s2 + $0x5e0] ss:$8 sps:$4 sm:$0xff]   ;;  %v8080_v41 = vld [vmem:[%s10496_s2 + $0x4f4] ss:$8 sps:$4 sm:$0xff]  }
  0xbf   : > { %1784 = vmatprep.mubr.bf16.mxu1 %v1553_v43  ;;  %v8083_v43 = vld [vmem:[%s10496_s2 + $0x5f4] ss:$8 sps:$4 sm:$0xff]   ;;  %v8091_v52 = vld [vmem:[%s10496_s2 + $0x704] ss:$8 sps:$4 sm:$0xff]  }
  0xc0   : > { %2031 = vmatpush1.bf16.msra.mxu0 %v8014_v36  ;;  %v2191_v29 = vshll.u32 %v7192_v24, 16  ;;  %v2189_v35 = vshrl.u32 %v7192_v24, 16 }
  0xc1   : > { %2439 = vmatpush1.bf16.msra.mxu1 %v8017_v45  ;;  %2032 = vmatprep.subr.bf16.mxu0 %v8024_v50  ;;  %v8081_v45 = vld [vmem:[%s10496_s2 + $0x5f0] ss:$8 sps:$4 sm:$0xff]   ;;  %v8086_v50 = vld [vmem:[%s10496_s2 + $0x604] ss:$8 sps:$4 sm:$0xff]  }
  0xc2   : > { %2440 = vmatprep.subr.bf16.mxu1 %v8029_v55  ;;  %v2193_v36 = vrot.slane %v2191_v29, 1  ;;  %v8084_v55 = vld [vmem:[%s10496_s2 + $0x600] ss:$8 sps:$4 sm:$0xff]  }
  0xc3   : > { %1361 = vmatmul.mubr.bf16.gmra.mrb[28].mxu0 %v1121_v59  ;;  %v8094_v59 = vld [vmem:[%s10496_s2 + $0x614] ss:$8 sps:$4 sm:$0xff]  }
  0xc4   : > { %1785 = vmatmul.mubr.bf16.gmra.mrb[28].mxu1 %v1544_v60  ;;  %2033 = vmatpush1.bf16.msra.mxu0 %v8022_v56  ;;  %v2194_v49 = vor.u32 %v2193_v36, %v2189_v35  ;;  %v8097_v60 = vld [vmem:[%s10496_s2 + $0x714] ss:$8 sps:$4 sm:$0xff]   ;;  %v8121_v35 = vld [vmem:[%s10496_s2 + $0x750] ss:$8 sps:$4 sm:$0xff]  }
  0xc5   : > { %2441 = vmatpush1.bf16.msra.mxu1 %v8027_v61  ;;  %2034 = vmatprep.subr.bf16.mxu0 %v8032_v62  ;;  %v2240_v61 = vshll.u32 %v9605_v54, 16  ;;  %v8092_v62 = vld [vmem:[%s10496_s2 + $0x610] ss:$8 sps:$4 sm:$0xff]  }
  0xc6   : > { %2442 = vmatprep.subr.bf16.mxu1 %v8035_v0  ;;  %2052 = vmatprep.mubr.bf16.mxu0 %v9096_v46  ;;  %v8047_v46 = vld [vmem:[%s10496_s2 + $0x594] ss:$8 sps:$4 sm:$0xff]   ;;  %v2199_v56 = vsel %vm1057_vm1, %v2194_v49, %v9378_v42  ;;  %v2117_v42 = vld [vmem:[%s8956_s18 + $0x60] sm:$0x11]  ;;  %v8095_v0 = vld [vmem:[%s10496_s2 + $0x710] ss:$8 sps:$4 sm:$0xff]  }
  0xc7   : > { %2460 = vmatprep.mubr.bf16.mxu1 %v2211_v1  ;;  %v8103_v1 = vld [vmem:[%s10496_s2 + $0x724] ss:$8 sps:$4 sm:$0xff]  }
  0xc8   : > { %2035 = vmatpush1.bf16.msra.mxu0 %v8030_v48  ;;  %v8100_v48 = vld [vmem:[%s10496_s2 + $0x624] ss:$8 sps:$4 sm:$0xff]  }
  0xc9   : > { %2443 = vmatpush1.bf16.msra.mxu1 %v8033_v32  ;;  %2036 = vmatprep.subr.bf16.mxu0 %v8038_v2  ;;  %v8098_v32 = vld [vmem:[%s10496_s2 + $0x620] ss:$8 sps:$4 sm:$0xff]   ;;  %v8106_v2 = vld [vmem:[%s10496_s2 + $0x634] ss:$8 sps:$4 sm:$0xff]  }
  0xca   : > { %2444 = vmatprep.subr.bf16.mxu1 %v8041_v3  ;;  %v2242_v3 = vrot.slane %v2240_v61, 1  ;;  %v8143_v61 = vld [vmem:[%s10496_s2 + $0x784] ss:$8 sps:$4 sm:$0xff]  }
  0xcc   : > { %2037 = vmatpush1.bf16.msra.mxu0 %v8036_v20  ;;  %v9652_v20 = vld [vmem:[%s8956_s18 + $0x28] sm:$0x88] }
  0xcd   : > { %2445 = vmatpush1.bf16.msra.mxu1 %v8039_v4  ;;  %2038 = vmatprep.subr.bf16.mxu0 %v8044_v6  ;;  %v9656_v4 = vld [vmem:[%s8956_s18 + $0x30] sm:$0xff]  ;;  %v9659_v6 = vld [vmem:[%s8956_s18 + $0x38] sm:$0xff] }
  0xce   : > { %2446 = vmatprep.subr.bf16.mxu1 %v8047_v46  ;;  %v8109_v46 = vld [vmem:[%s10496_s2 + $0x734] ss:$8 sps:$4 sm:$0xff]  }
  0xd0   : > { %2039 = vmatpush1.bf16.msra.mxu0 %v8042_v10  ;;  %v2252_v10 = vshrl.u32 %v9605_v54, 16 }
  0xd1   : > { %2447 = vmatpush1.bf16.msra.mxu1 %v8045_v12  ;;  %2040 = vmatprep.subr.bf16.mxu0 %v8050_v14  ;;  %v2243_v14 = vsel %vm1057_vm1, %v9446_v26, %v2242_v3  ;;  %v8112_v26 = vld [vmem:[%s10496_s2 + $0x644] ss:$8 sps:$4 sm:$0xff]  }
  0xd2   : > { %2448 = vmatprep.subr.bf16.mxu1 %v8053_v15  ;;  %v7267_v15 = vcombine.high %v9652_v20, %v9656_v4 }
  0xd4   : > { %2041 = vmatpush1.bf16.msra.mxu0 %v8048_v16 }
  0xd5   : > { %2449 = vmatpush1.bf16.msra.mxu1 %v8051_v17  ;;  %2042 = vmatprep.subr.bf16.mxu0 %v8056_v18  ;;  %v8104_v17 = vld [vmem:[%s10496_s2 + $0x630] ss:$8 sps:$4 sm:$0xff]   ;;  %v7200_v18 = vcombine.low %v2117_v42, %v2117_v42 }
  0xd6   : > { %2450 = vmatprep.subr.bf16.mxu1 %v8059_v19  ;;  %v8117_v19 = vld [vmem:[%s10496_s2 + $0x744] ss:$8 sps:$4 sm:$0xff]  }
  0xd8   : > { %2043 = vmatpush1.bf16.msra.mxu0 %v8054_v21  ;;  %v8110_v21 = vld [vmem:[%s10496_s2 + $0x640] ss:$8 sps:$4 sm:$0xff]  }
  0xd9   : > { %2451 = vmatpush1.bf16.msra.mxu1 %v8057_v53  ;;  %2044 = vmatprep.subr.bf16.mxu0 %v8062_v57  ;;  %v2254_v53 = vor.u32 %v2252_v10, %v2242_v3  ;;  %v8153_v3 = vld [vmem:[%s10496_s2 + $0x7a0] ss:$8 sps:$4 sm:$0xff]   ;;  %v8156_v10 = vld [vmem:[%s10496_s2 + $0x6b0] ss:$8 sps:$4 sm:$0xff]  }
  0xda   : > { %2452 = vmatprep.subr.bf16.mxu1 %v8065_v22  ;;  %v2614_v22 = vshrl.u32 %v7267_v15, 16 }
  0xdc   : > { %2045 = vmatpush1.bf16.msra.mxu0 %v8060_v23  ;;  %v2617_v23 = vshll.u32 %v7267_v15, 16  ;;  %v8167_v15 = vld [vmem:[%s10496_s2 + $0x7c4] ss:$8 sps:$4 sm:$0xff]  }
  0xdd   : > { %2453 = vmatpush1.bf16.msra.mxu1 %v8063_v31  ;;  %2046 = vmatprep.subr.bf16.mxu0 %v8068_v25 }
  0xde   : > { %2454 = vmatprep.subr.bf16.mxu1 %v8071_v8  ;;  %v2248_v8 = vshll.u32 %v7200_v18, 16  ;;  %v8170_v18 = vld [vmem:[%s10496_s2 + $0x6d4] ss:$8 sps:$4 sm:$0xff]  }
  0xe0   : > { %2047 = vmatpush1.bf16.msra.mxu0 %v8066_v27  ;;  %v8120_v27 = vld [vmem:[%s10496_s2 + $0x654] ss:$8 sps:$4 sm:$0xff]  }
  0xe1   : > { %2455 = vmatpush1.bf16.msra.mxu1 %v8069_v28  ;;  %2048 = vmatprep.subr.bf16.mxu0 %v8074_v30  ;;  %v8123_v28 = vld [vmem:[%s10496_s2 + $0x754] ss:$8 sps:$4 sm:$0xff]   ;;  %v2616_v30 = vrot.slane %v2614_v22, 3  ;;  %v8171_v22 = vld [vmem:[%s10496_s2 + $0x7d0] ss:$8 sps:$4 sm:$0xff]  }
  0xe2   : > { %2456 = vmatprep.subr.bf16.mxu1 %v8077_v7  ;;  %v2619_v7 = vrot.slane %v2617_v23, 4  ;;  %v8179_v23 = vld [vmem:[%s10496_s2 + $0x7e4] ss:$8 sps:$4 sm:$0xff]  }
  0xe4   : > { %2049 = vmatpush1.bf16.msra.mxu0 %v8072_v38 }
  0xe5   : > { %2457 = vmatpush1.bf16.msra.mxu1 %v8075_v33  ;;  %2050 = vmatprep.subr.bf16.mxu0 %v8080_v41  ;;  %v2250_v41 = vrot.slane %v2248_v8, 1 }
  0xe6   : > { %2458 = vmatprep.subr.bf16.mxu1 %v8083_v43  ;;  %v8126_v43 = vld [vmem:[%s10496_s2 + $0x664] ss:$8 sps:$4 sm:$0xff]  }
  0xe8   : > { %2051 = vmatpush1.bf16.msra.mxu0 %v8078_v44  ;;  %v8124_v44 = vld [vmem:[%s10496_s2 + $0x660] ss:$8 sps:$4 sm:$0xff]  }
  0xe9   : > { %2459 = vmatpush1.bf16.msra.mxu1 %v8081_v45  ;;  %2852 = vmatprep.subr.bf16.mxu0 %v8086_v50  ;;  %v2620_v45 = vor.u32 %v2619_v7, %v2616_v30  ;;  %v8185_v30 = vld [vmem:[%s10496_s2 + $0x7f4] ss:$8 sps:$4 sm:$0xff]  }
  0xea   : > { %3150 = vmatprep.subr.bf16.mxu1 %v8091_v52  ;;  %v8129_v52 = vld [vmem:[%s10496_s2 + $0x760] ss:$8 sps:$4 sm:$0xff]  }
  0xeb   : > { %2053 = vmatmul.mubr.bf16.vlgmr.msra.gmra.mrb[32].mxu0 %v9100_v47  ;;  %v9635_v47 = vcombine.low %v9317_v63, %v9361_v34  ;;  %v8101_v63 = vld [vmem:[%s10496_s2 + $0x720] ss:$8 sps:$4 sm:$0xff]   ;;  %v7201_v34 = vcombine.high %v2117_v42, %v2117_v42 }
  0xec   : > { %2461 = vmatmul.mubr.bf16.vlgmr.msra.gmra.mrb[32].mxu1 %v2199_v56  ;;  %2853 = vmatpush1.bf16.msra.mxu0 %v8084_v55  ;;  %v8137_v55 = vld [vmem:[%s10496_s2 + $0x774] ss:$8 sps:$4 sm:$0xff]   ;;  %v8132_v56 = vld [vmem:[%s10496_s2 + $0x670] ss:$8 sps:$4 sm:$0xff]  }
  0xed   : > { %3151 = vmatpush1.bf16.msra.mxu1 %v8089_v58  ;;  %2854 = vmatprep.subr.bf16.mxu0 %v8094_v59  ;;  %v2256_v12 = vshll.u32 %v7201_v34, 16  ;;  %v2244_v25 = vshrl.u32 %v9635_v47, 16  ;;  %v8135_v58 = vld [vmem:[%s10496_s2 + $0x770] ss:$8 sps:$4 sm:$0xff]   ;;  %v9742_v59 = vcombine.high %v9656_v4, %v9659_v6  ;;  %v8155_v34 = vld [vmem:[%s10496_s2 + $0x7a4] ss:$8 sps:$4 sm:$0xff]  }
  0xee   : > { %3152 = vmatprep.subr.bf16.mxu1 %v8097_v60  ;;  %2062 = vmatprep.mubr.bf16.mxu0 %v9137_v9  ;;  %v2232_v9 = vshll.u32 %v9635_v47, 16  ;;  %v8140_v60 = vld [vmem:[%s10496_s2 + $0x684] ss:$8 sps:$4 sm:$0xff]  }
  0xef   : > { %2470 = vmatprep.mubr.bf16.mxu1 %v9412_v5  ;;  %v9662_v5 = vld [vmem:[%s8956_s18 + $0x40] sm:$0xff]  ;;  %v2258_v57 = vrot.slane %v2256_v12, 1  ;;  %v8159_v12 = vld [vmem:[%s10496_s2 + $0x7b0] ss:$8 sps:$4 sm:$0xff]  }
  0xf0   : > { %2855 = vmatpush1.bf16.msra.mxu0 %v8092_v62  ;;  %v7269_v16 = vcombine.high %v9659_v6, %v9662_v5  ;;  %v8138_v62 = vld [vmem:[%s10496_s2 + $0x680] ss:$8 sps:$4 sm:$0xff]  }
  0xf1   : > { %3153 = vmatpush1.bf16.msra.mxu1 %v8095_v0  ;;  %2856 = vmatprep.subr.bf16.mxu0 %v8100_v48  ;;  %v2259_v29 = vsel %vm1057_vm1, %v2254_v53, %v2258_v57  ;;  %v8141_v0 = vld [vmem:[%s10496_s2 + $0x780] ss:$8 sps:$4 sm:$0xff]   ;;  %v8146_v48 = vld [vmem:[%s10496_s2 + $0x694] ss:$8 sps:$4 sm:$0xff]   ;;  %v8168_v57 = vld [vmem:[%s10496_s2 + $0x6d0] ss:$8 sps:$4 sm:$0xff]  }
  0xf2   : > { %3154 = vmatprep.subr.bf16.mxu1 %v8103_v1  ;;  %v2622_v31 = vshrl.u32 %v7269_v16, 16  ;;  %v2625_v11 = vshll.u32 %v7269_v16, 16  ;;  %v8144_v1 = vld [vmem:[%s10496_s2 + $0x690] ss:$8 sps:$4 sm:$0xff]   ;;  %v9803_v16 = vld [vmem:[%s8956_s18 + $0x48] sm:$0xff] }
  0xf3   : > { %2063 = vmatmul.mubr.bf16.gmra.mrb[36].mxu0 %v9143_v13  ;;  %v8107_v13 = vld [vmem:[%s10496_s2 + $0x730] ss:$8 sps:$4 sm:$0xff]  }
  0xf4   : > { %2471 = vmatmul.mubr.bf16.gmra.mrb[36].mxu1 %v9431_v37  ;;  %2857 = vmatpush1.bf16.msra.mxu0 %v8098_v32  ;;  %v2234_v37 = vrot.slane %v2232_v9, 1  ;;  %v2624_v38 = vrot.slane %v2622_v31, 3  ;;  %v2627_v33 = vrot.slane %v2625_v11, 4  ;;  %v8147_v32 = vld [vmem:[%s10496_s2 + $0x790] ss:$8 sps:$4 sm:$0xff]  }
  0xf5   : > { %3155 = vmatpush1.bf16.msra.mxu1 %v8101_v63  ;;  %2858 = vmatprep.subr.bf16.mxu0 %v8106_v2  ;;  %v8152_v63 = vld [vmem:[%s10496_s2 + $0x6a4] ss:$8 sps:$4 sm:$0xff]   ;;  %v8150_v2 = vld [vmem:[%s10496_s2 + $0x6a0] ss:$8 sps:$4 sm:$0xff]   ;;  %v8158_v9 = vld [vmem:[%s10496_s2 + $0x6b4] ss:$8 sps:$4 sm:$0xff]  }
  0xf6   : > { %3156 = vmatprep.subr.bf16.mxu1 %v8109_v46  ;;  %2072 = vmatprep.mubr.bf16.mxu0 %v9183_v39  ;;  %v2235_v24 = vsel %vm1057_vm1, %v9466_v51, %v2234_v37  ;;  %v8115_v39 = vld [vmem:[%s10496_s2 + $0x740] ss:$8 sps:$4 sm:$0xff]   ;;  %v8118_v51 = vld [vmem:[%s10496_s2 + $0x650] ss:$8 sps:$4 sm:$0xff]   ;;  %v2246_v36 = vor.u32 %v2244_v25, %v2234_v37  ;;  %v9722_v49 = vor.u32 %v2627_v33, %v2624_v38  ;;  %v8161_v46 = vld [vmem:[%s10496_s2 + $0x7b4] ss:$8 sps:$4 sm:$0xff]  }
  0xf7   : > { %2480 = vmatprep.mubr.bf16.mxu1 %v2243_v14  ;;  %v8164_v14 = vld [vmem:[%s10496_s2 + $0x6c4] ss:$8 sps:$4 sm:$0xff]   ;;  %v8165_v37 = vld [vmem:[%s10496_s2 + $0x7c0] ss:$8 sps:$4 sm:$0xff]  }
  0xf8   : > { %2859 = vmatpush1.bf16.msra.mxu0 %v8104_v17  ;;  %v2251_v50 = vsel %vm1057_vm1, %v2246_v36, %v2250_v41  ;;  %v2629_v42 = vsel %vm648_vm0, %v2620_v45, %v9722_v49  ;;  %v9806_v17 = vld [vmem:[%s8956_s18 + $0x50] sm:$0xff]  ;;  %v9839_v25 = vld [vmem:[%s8956_s18 + $0x60] sm:$0xff] }
  0xf9   : > { %3157 = vmatpush1.bf16.msra.mxu1 %v8107_v13  ;;  %2860 = vmatprep.subr.bf16.mxu0 %v8112_v26  ;;  %v8162_v13 = vld [vmem:[%s10496_s2 + $0x6c0] ss:$8 sps:$4 sm:$0xff]   ;;  %v8173_v26 = vld [vmem:[%s10496_s2 + $0x7d4] ss:$8 sps:$4 sm:$0xff]   ;;  %v7271_v53 = vcombine.high %v9803_v16, %v9806_v17  ;;  %v7270_v36 = vcombine.low %v9803_v16, %v9806_v17  ;;  %v8180_v45 = vld [vmem:[%s10496_s2 + $0x6f0] ss:$8 sps:$4 sm:$0xff]  }
  0xfa   : > { %3158 = vmatprep.subr.bf16.mxu1 %v8117_v19  ;;  %v7266_v19 = vcombine.low %v9652_v20, %v9656_v4  ;;  %v8176_v20 = vld [vmem:[%s10496_s2 + $0x6e4] ss:$8 sps:$4 sm:$0xff]  }
  0xfb   : > { %2073 = vmatmul.mubr.bf16.gmra.mrb[40].mxu0 %v9186_v40  ;;  %v8131_v40 = vld [vmem:[%s10496_s2 + $0x764] ss:$8 sps:$4 sm:$0xff]   ;;  %v2640_v8 = vshrl.u32 %v7271_v53, 16 }
  0xfc   : > { %2481 = vmatmul.mubr.bf16.gmra.mrb[40].mxu1 %v2235_v24  ;;  %2861 = vmatpush1.bf16.msra.mxu0 %v8110_v21  ;;  %v7268_v21 = vcombine.low %v9659_v6, %v9662_v5  ;;  %v2597_v31 = vshrl.u32 %v7266_v19, 16  ;;  %v2600_v11 = vshll.u32 %v7266_v19, 16  ;;  %v8207_v19 = vld [vmem:[%s10496_s2 + $0x834] ss:$8 sps:$4 sm:$0xff]  }
  0xfd   : > { %3159 = vmatpush1.bf16.msra.mxu1 %v8115_v39  ;;  %2862 = vmatprep.subr.bf16.mxu0 %v8120_v27  ;;  %v2643_v27 = vshll.u32 %v7271_v53, 16  ;;  %v2642_v41 = vrot.slane %v2640_v8, 3 }
  0xfe   : > { %3160 = vmatprep.subr.bf16.mxu1 %v8123_v28  ;;  %2082 = vmatprep.mubr.bf16.mxu0 %v9605_v54  ;;  %v8134_v54 = vld [vmem:[%s10496_s2 + $0x674] ss:$8 sps:$4 sm:$0xff]   ;;  %v2605_v24 = vshrl.u32 %v7268_v21, 16  ;;  %v2608_v39 = vshll.u32 %v7268_v21, 16  ;;  %v8174_v28 = vld [vmem:[%s10496_s2 + $0x6e0] ss:$8 sps:$4 sm:$0xff]  }
  0xff   : > { %2490 = vmatprep.mubr.bf16.mxu1 %v2259_v29  ;;  %v8182_v29 = vld [vmem:[%s10496_s2 + $0x6f4] ss:$8 sps:$4 sm:$0xff]   ;;  %v2599_v7 = vrot.slane %v2597_v31, 3  ;;  %v2602_v38 = vrot.slane %v2600_v11, 4  ;;  %v8205_v31 = vld [vmem:[%s10496_s2 + $0x830] ss:$8 sps:$4 sm:$0xff]  }
 0x100   : > { %2863 = vmatpush1.bf16.msra.mxu0 %v8118_v51  ;;  %v8177_v51 = vld [vmem:[%s10496_s2 + $0x7e0] ss:$8 sps:$4 sm:$0xff]   ;;  %v2607_v33 = vrot.slane %v2605_v24, 3  ;;  %v8212_v11 = vld [vmem:[%s10496_s2 + $0x844] ss:$8 sps:$4 sm:$0xff]  }
 0x101   : > { %3161 = vmatpush1.bf16.msra.mxu1 %v8121_v35  ;;  %2864 = vmatprep.subr.bf16.mxu0 %v8126_v43  ;;  %v2610_v35 = vrot.slane %v2608_v39, 4  ;;  %v2645_v43 = vrot.slane %v2643_v27, 4 }
 0x102   : > { %3162 = vmatprep.subr.bf16.mxu1 %v8131_v40  ;;  %v9856_v40 = vld [vmem:[%s8956_s18 + $0x58] sm:$0xff] }
 0x103   : > { %2083 = vmatmul.mubr.bf16.gmra.mrb[44].mxu0 %v9635_v47  ;;  %v8149_v47 = vld [vmem:[%s10496_s2 + $0x794] ss:$8 sps:$4 sm:$0xff]  }
 0x104   : > { %2491 = vmatmul.mubr.bf16.gmra.mrb[44].mxu1 %v2251_v50  ;;  %2865 = vmatpush1.bf16.msra.mxu0 %v8124_v44  ;;  %v7273_v44 = vcombine.high %v9856_v40, %v9839_v25  ;;  %v8183_v50 = vld [vmem:[%s10496_s2 + $0x7f0] ss:$8 sps:$4 sm:$0xff]  }
 0x105   : > { %3163 = vmatpush1.bf16.msra.mxu1 %v8129_v52  ;;  %2866 = vmatprep.subr.bf16.mxu0 %v8134_v54  ;;  %v8192_v52 = vld [vmem:[%s10496_s2 + $0x804] ss:$8 sps:$4 sm:$0xff]   ;;  %v2603_v54 = vor.u32 %v2602_v38, %v2599_v7 }
 0x106   : > { %3164 = vmatprep.subr.bf16.mxu1 %v8137_v55  ;;  %2884 = vmatprep.mubr.bf16.mxu0 %v2629_v42  ;;  %v2611_v55 = vor.u32 %v2610_v35, %v2607_v33  ;;  %v2658_v42 = vshrl.u32 %v7273_v44, 16  ;;  %v3331_v35 = vshrl.u32 %v9742_v59, 16 }
 0x107   : > { %3182 = vmatprep.mubr.bf16.mxu1 %v9742_v59 }
 0x108   : > { %2867 = vmatpush1.bf16.msra.mxu0 %v8132_v56  ;;  %v2631_v56 = vshrl.u32 %v7270_v36, 16 }
 0x109   : > { %3165 = vmatpush1.bf16.msra.mxu1 %v8135_v58  ;;  %2868 = vmatprep.subr.bf16.mxu0 %v8140_v60  ;;  %v2634_v58 = vshll.u32 %v7270_v36, 16  ;;  %v9870_v60 = vld [vmem:[%s8956_s18 + $0x68] sm:$0xff] }
 0x10a   : > { %3166 = vmatprep.subr.bf16.mxu1 %v8143_v61  ;;  %v2646_v61 = vor.u32 %v2645_v43, %v2642_v41  ;;  %v9938_v41 = vcombine.high %v9839_v25, %v9870_v60 }
 0x10c   : > { %2869 = vmatpush1.bf16.msra.mxu0 %v8138_v62  ;;  %v2661_v62 = vshll.u32 %v7273_v44, 16  ;;  %v8215_v44 = vld [vmem:[%s10496_s2 + $0x850] ss:$8 sps:$4 sm:$0xff]  }
 0x10d   : > { %3167 = vmatpush1.bf16.msra.mxu1 %v8141_v0  ;;  %2870 = vmatprep.subr.bf16.mxu0 %v8146_v48  ;;  %v8190_v0 = vld [vmem:[%s10496_s2 + $0x800] ss:$8 sps:$4 sm:$0xff]   ;;  %v9877_v48 = vcombine.low %v9656_v4, %v9659_v6  ;;  %v2647_v4 = vsel %vm648_vm0, %v9722_v49, %v2646_v61  ;;  %v2660_v6 = vrot.slane %v2658_v42, 3 }
 0x10e   : > { %3168 = vmatprep.subr.bf16.mxu1 %v8149_v47  ;;  %v8197_v47 = vld [vmem:[%s10496_s2 + $0x814] ss:$8 sps:$4 sm:$0xff]  }
 0x110   : > { %2871 = vmatpush1.bf16.msra.mxu0 %v8144_v1  ;;  %v9884_v1 = vcombine.high %v9662_v5, %v9803_v16 }
 0x111   : > { %3169 = vmatpush1.bf16.msra.mxu1 %v8147_v32  ;;  %2872 = vmatprep.subr.bf16.mxu0 %v8152_v63  ;;  %v2612_v32 = vsel %vm648_vm0, %v2603_v54, %v2611_v55  ;;  %v2633_v63 = vrot.slane %v2631_v56, 3  ;;  %v8220_v56 = vld [vmem:[%s10496_s2 + $0x860] ss:$8 sps:$4 sm:$0xff]  }
 0x112   : > { %3170 = vmatprep.subr.bf16.mxu1 %v8155_v34  ;;  %v2636_v34 = vrot.slane %v2634_v58, 4 }
 0x114   : > { %2873 = vmatpush1.bf16.msra.mxu0 %v8150_v2  ;;  %v7272_v2 = vcombine.low %v9856_v40, %v9839_v25 }
 0x115   : > { %3171 = vmatpush1.bf16.msra.mxu1 %v8153_v3  ;;  %2874 = vmatprep.subr.bf16.mxu0 %v8158_v9  ;;  %v2663_v3 = vrot.slane %v2661_v62, 4  ;;  %v7275_v9 = vcombine.high %v9870_v60, %v9870_v60  ;;  %v9957_v62 = vcombine.low %v9839_v25, %v9870_v60  ;;  %v8225_v25 = vld [vmem:[%s10496_s2 + $0x870] ss:$8 sps:$4 sm:$0xff]  }
 0x116   : > { %3172 = vmatprep.subr.bf16.mxu1 %v8161_v46  ;;  %v8195_v46 = vld [vmem:[%s10496_s2 + $0x810] ss:$8 sps:$4 sm:$0xff]   ;;  %v2649_v49 = vshrl.u32 %v7272_v2, 16 }
 0x118   : > { %2875 = vmatpush1.bf16.msra.mxu0 %v8156_v10  ;;  %v8202_v10 = vld [vmem:[%s10496_s2 + $0x824] ss:$8 sps:$4 sm:$0xff]   ;;  %v2651_v53 = vrot.slane %v2649_v49, 3 }
 0x119   : > { %3173 = vmatpush1.bf16.msra.mxu1 %v8159_v12  ;;  %2876 = vmatprep.subr.bf16.mxu0 %v8164_v14  ;;  %v2637_v12 = vor.u32 %v2636_v34, %v2633_v63  ;;  %v2652_v14 = vshll.u32 %v7272_v2, 16 }
 0x11a   : > { %3174 = vmatprep.subr.bf16.mxu1 %v8167_v15  ;;  %v2664_v15 = vor.u32 %v2663_v3, %v2660_v6  ;;  %v8228_v3 = vld [vmem:[%s10496_s2 + $0x880] ss:$8 sps:$4 sm:$0xff]  }
 0x11b   : > { %v2638_v21 = vsel %vm648_vm0, %v2611_v55, %v2637_v12 }
 0x11c   : > { %2877 = vmatpush1.bf16.msra.mxu0 %v8162_v13  ;;  %v2676_v13 = vshrl.u32 %v7275_v9, 16 }
 0x11d   : > { %3175 = vmatpush1.bf16.msra.mxu1 %v8165_v37  ;;  %2878 = vmatprep.subr.bf16.mxu0 %v8170_v18  ;;  %v2679_v37 = vshll.u32 %v7275_v9, 16  ;;  %v8200_v18 = vld [vmem:[%s10496_s2 + $0x820] ss:$8 sps:$4 sm:$0xff]  }
 0x11e   : > { %3176 = vmatprep.subr.bf16.mxu1 %v8173_v26  ;;  %v9906_v26 = vcombine.low %v9662_v5, %v9803_v16  ;;  %v2678_v5 = vrot.slane %v2676_v13, 3  ;;  %v8234_v13 = vld [vmem:[%s10496_s2 + $0x8a0] ss:$8 sps:$4 sm:$0xff]  }
 0x11f   : > { %v2681_v16 = vrot.slane %v2679_v37, 4 }
 0x120   : > { %2879 = vmatpush1.bf16.msra.mxu0 %v8168_v57  ;;  %v2654_v57 = vrot.slane %v2652_v14, 4  ;;  %v8231_v14 = vld [vmem:[%s10496_s2 + $0x890] ss:$8 sps:$4 sm:$0xff]  }
 0x121   : > { %3177 = vmatpush1.bf16.msra.mxu1 %v8171_v22  ;;  %2880 = vmatprep.subr.bf16.mxu0 %v8176_v20  ;;  %v7274_v22 = vcombine.low %v9870_v60, %v9870_v60  ;;  %v2665_v20 = vsel %vm648_vm0, %v2646_v61, %v2664_v15  ;;  %v2682_v27 = vor.u32 %v2681_v16, %v2678_v5  ;;  %v8230_v60 = vld [vmem:[%s10496_s2 + $0x884] ss:$8 sps:$4 sm:$0xff]  }
 0x122   : > { %3178 = vmatprep.subr.bf16.mxu1 %v8179_v23  ;;  %v7345_v23 = vcombine.high %v9806_v17, %v9856_v40  ;;  %v2655_v24 = vor.u32 %v2654_v57, %v2651_v53  ;;  %v8242_v5 = vld [vmem:[%s10496_s2 + $0x8c4] ss:$8 sps:$4 sm:$0xff]  }
 0x123   : > { %v2667_v39 = vshrl.u32 %v7274_v22, 16  ;;  %v2670_v8 = vshll.u32 %v7274_v22, 16  ;;  %v2683_v36 = vsel %vm648_vm0, %v2664_v15, %v2682_v27  ;;  %v8236_v15 = vld [vmem:[%s10496_s2 + $0x8a4] ss:$8 sps:$4 sm:$0xff]   ;;  %v8237_v22 = vld [vmem:[%s10496_s2 + $0x8b0] ss:$8 sps:$4 sm:$0xff]  }
 0x124   : > { %2881 = vmatpush1.bf16.msra.mxu0 %v8174_v28  ;;  %v3333_v28 = vshll.u32 %v9742_v59, 16  ;;  %v2656_v7 = vsel %vm648_vm0, %v2637_v12, %v2655_v24  ;;  %v8222_v59 = vld [vmem:[%s10496_s2 + $0x864] ss:$8 sps:$4 sm:$0xff]  }
 0x125   : > { %3179 = vmatpush1.bf16.msra.mxu1 %v8177_v51  ;;  %2882 = vmatprep.subr.bf16.mxu0 %v8182_v29  ;;  %v8210_v51 = vld [vmem:[%s10496_s2 + $0x840] ss:$8 sps:$4 sm:$0xff]   ;;  %v7344_v29 = vcombine.low %v9806_v17, %v9856_v40  ;;  %v2669_v38 = vrot.slane %v2667_v39, 3  ;;  %v2672_v33 = vrot.slane %v2670_v8, 4  ;;  %v3338_v40 = vshll.u32 %v9884_v1, 16 }
 0x126   : > { %3180 = vmatprep.subr.bf16.mxu1 %v8185_v30  ;;  %v8217_v30 = vld [vmem:[%s10496_s2 + $0x854] ss:$8 sps:$4 sm:$0xff]   ;;  %v3335_v43 = vrot.slane %v3333_v28, 1 }
 0x127   : > { %v8245_v8 = vld [vmem:[%s10496_s2 + $0x8d4] ss:$8 sps:$4 sm:$0xff]  }
 0x128   : > { %2883 = vmatpush1.bf16.msra.mxu0 %v8180_v45  ;;  %v2673_v45 = vor.u32 %v2672_v33, %v2669_v38  ;;  %v3244_v28 = vld [vmem:[%s8956_s18 + $0x58] sm:$0xff]  ;;  %v8256_v33 = vld [vmem:[#allocation3 + $0x100] ss:$8 sps:$4 sm:$0xff]  }
 0x129   : > { %3181 = vmatpush1.bf16.msra.mxu1 %v8183_v50  ;;  %3558 = vmatprep.subr.bf16.mxu0 %v8192_v52  ;;  %v3336_v50 = vor.u32 %v3335_v43, %v3331_v35  ;;  %v9948_v52 = vrot.slane %v3338_v40, 1  ;;  %v8258_v35 = vld [vmem:[#allocation3 + $0x104] ss:$8 sps:$4 sm:$0xff]  }
 0x12a   : > { %v2674_v63 = vsel %vm648_vm0, %v2655_v24, %v2673_v45  ;;  %v8240_v24 = vld [vmem:[%s10496_s2 + $0x8c0] ss:$8 sps:$4 sm:$0xff]   ;;  %4079 = vmatprep.subr.bf16.mxu1 %v8258_v35  ;;  %v8264_v45 = vld [vmem:[#allocation3 + $0x114] ss:$8 sps:$4 sm:$0xff]  }
 0x12b   : > { %2885 = vmatmul.mubr.bf16.vlgmr.msra.gmra.mrb[48].mxu0 %v2612_v32  ;;  %v3341_v6 = vsel %vm1057_vm1, %v3336_v50, %v9948_v52  ;;  %v8248_v50 = vld [vmem:[%s10496_s2 + $0x8e4] ss:$8 sps:$4 sm:$0xff]   ;;  %v8271_v35 = vld [vmem:[#allocation3 + $0x20] ss:$8 sps:$4 sm:$0xff]  }
 0x12c   : > { %3183 = vmatmul.mubr.bf16.vlgmr.msra.gmra.mrb[48].mxu1 %v9877_v48  ;;  %3559 = vmatpush1.bf16.msra.mxu0 %v8190_v0  ;;  %v8227_v0 = vld [vmem:[%s10496_s2 + $0x874] ss:$8 sps:$4 sm:$0xff]  }
 0x12d   : > { %2894 = vmatprep.mubr.bf16.mxu0 %v2647_v4  ;;  %3560 = vmatprep.subr.bf16.mxu0 %v8197_v47 }
 0x12e   : > { %3192 = vmatprep.mubr.bf16.mxu1 %v9884_v1  ;;  %4080 = vmatpush1.bf16.msra.mxu1 %v8256_v33  ;;  %v3362_v33 = vshll.u32 %v9957_v62, 16 }
 0x12f   : > { %4081 = vmatprep.subr.bf16.mxu1 %v8264_v45 }
 0x130   : > { %3561 = vmatpush1.bf16.msra.mxu0 %v8195_v46  ;;  %v8233_v46 = vld [vmem:[%s10496_s2 + $0x894] ss:$8 sps:$4 sm:$0xff]  }
 0x131   : > { %3562 = vmatprep.subr.bf16.mxu0 %v8202_v10 }
 0x133   : > { %2895 = vmatmul.mubr.bf16.gmra.mrb[52].mxu0 %v2638_v21 }
 0x134   : > { %3193 = vmatmul.mubr.bf16.gmra.mrb[52].mxu1 %v9906_v26  ;;  %3563 = vmatpush1.bf16.msra.mxu0 %v8200_v18  ;;  %v8239_v18 = vld [vmem:[%s10496_s2 + $0x8b4] ss:$8 sps:$4 sm:$0xff]  }
 0x135   : > { %2904 = vmatprep.mubr.bf16.mxu0 %v2665_v20  ;;  %3564 = vmatprep.subr.bf16.mxu0 %v8207_v19 }
 0x136   : > { %3202 = vmatprep.mubr.bf16.mxu1 %v7345_v23 }
 0x138   : > { %3565 = vmatpush1.bf16.msra.mxu0 %v8205_v31 }
 0x139   : > { %3566 = vmatprep.subr.bf16.mxu0 %v8212_v11 }
 0x13b   : > { %2905 = vmatmul.mubr.bf16.gmra.mrb[56].mxu0 %v2656_v7 }
 0x13c   : > { %3203 = vmatmul.mubr.bf16.gmra.mrb[56].mxu1 %v7344_v29  ;;  %3567 = vmatpush1.bf16.msra.mxu0 %v8210_v51 }
 0x13d   : > { %2914 = vmatprep.mubr.bf16.mxu0 %v2683_v36  ;;  %3568 = vmatprep.subr.bf16.mxu0 %v8217_v30  ;;  %v3321_v36 = vshll.u32 %v9877_v48, 16 }
 0x13e   : > { %3212 = vmatprep.mubr.bf16.mxu1 %v9938_v41  ;;  %v596_v54 = vpop.f32.mrb[0].mxu0 }
 0x13f   : > { %v939_v55 = vpop.f32.mrb[0].mxu1  ;;  %v598_v61 = vpop.f32.mrb[1].mxu0 }
 0x140   : > { %v9953_v58 = vadd.f32 %v939_v55, %v596_v54  ;;  %v941_v42 = vpop.f32.mrb[1].mxu1  ;;  %v600_v32 = vpop.f32.mrb[2].mxu0  ;;  %3569 = vmatpush1.bf16.msra.mxu0 %v8215_v44  ;;  %v8243_v44 = vld [vmem:[%s10496_s2 + $0x8d0] ss:$8 sps:$4 sm:$0xff]   ;;  %v7417_v54 = vcombine.high %v9806_v17, %v3244_v28 }
 0x141   : > { %v9962_v47 = vadd.f32 %v941_v42, %v598_v61  ;;  %v943_v34 = vpop.f32.mrb[2].mxu1  ;;  %v602_v2 = vpop.f32.mrb[3].mxu0  ;;  %3570 = vmatprep.subr.bf16.mxu0 %v8222_v59  ;;  %v8262_v55 = vld [vmem:[#allocation3 + $0x110] ss:$8 sps:$4 sm:$0xff]   ;;  %v3319_v61 = vshrl.u32 %v9877_v48, 16  ;;  %v3323_v32 = vrot.slane %v3321_v36, 1 }
 0x142   : > { %v945_v4 = vpop.f32.mrb[3].mxu1  ;;  %v8246_v42 = vld [vmem:[%s10496_s2 + $0x8e0] ss:$8 sps:$4 sm:$0xff]   ;;  %v3350_v34 = vshrl.u32 %v9884_v1, 16  ;;  %v3354_v2 = vshll.u32 %v7417_v54, 16  ;;  %4082 = vmatpush1.bf16.msra.mxu1 %v8262_v55 }
 0x143   : > { %2915 = vmatmul.mubr.bf16.gmra.mrb[60].mxu0 %v2674_v63  ;;  %v3326_v63 = vshll.u32 %v9906_v26, 16  ;;  %v8249_v48 = vld [vmem:[%s10496_s2 + $0x8f0] ss:$8 sps:$4 sm:$0xff]   ;;  %v3324_v1 = vor.u32 %v3323_v32, %v3319_v61  ;;  %v8292_v32 = vld [vmem:[#allocation3 + $0x160] ss:$8 sps:$4 sm:$0xff]  }
 0x144   : > { %3213 = vmatmul.mubr.bf16.gmra.mrb[60].mxu1 %v9957_v62  ;;  %3571 = vmatpush1.bf16.msra.mxu0 %v8220_v56  ;;  %v8270_v56 = vld [vmem:[#allocation3 + $0x124] ss:$8 sps:$4 sm:$0xff]   ;;  %v8277_v55 = vld [vmem:[#allocation3 + $0x30] ss:$8 sps:$4 sm:$0xff]  }
 0x145   : > { %3590 = vmatprep.mubr.bf16.mxu0 %v3341_v6  ;;  %3572 = vmatprep.subr.bf16.mxu0 %v8227_v0  ;;  %v8251_v0 = vld [vmem:[%s10496_s2 + $0x8f4] ss:$8 sps:$4 sm:$0xff]   ;;  %v8268_v6 = vld [vmem:[#allocation3 + $0x120] ss:$8 sps:$4 sm:$0xff]  }
 0x146   : > { %v606_v9 = vpop.f32.mrb[4].mxu0  ;;  %4083 = vmatprep.subr.bf16.mxu1 %v8270_v56  ;;  %v8294_v56 = vld [vmem:[#allocation3 + $0x164] ss:$8 sps:$4 sm:$0xff]  }
 0x147   : > { %v608_v10 = vpop.f32.mrb[5].mxu0  ;;  %4084 = vmatpush1.bf16.msra.mxu1 %v8268_v6 }
 0x148   : > { %3573 = vmatpush1.bf16.msra.mxu0 %v8225_v25  ;;  %v610_v12 = vpop.f32.mrb[6].mxu0 }
 0x149   : > { %3574 = vmatprep.subr.bf16.mxu0 %v8230_v60  ;;  %v612_v49 = vpop.f32.mrb[7].mxu0  ;;  %v949_v53 = vpop.f32.mrb[4].mxu1  ;;  %v8274_v12 = vld [vmem:[#allocation3 + $0x130] ss:$8 sps:$4 sm:$0xff]  }
 0x14a   : > { %v9995_v20 = vadd.f32 %v949_v53, %v606_v9  ;;  %v951_v23 = vpop.f32.mrb[5].mxu1  ;;  %v3328_v49 = vrot.slane %v3326_v63, 1  ;;  %v3342_v53 = vshrl.u32 %v9906_v26, 16  ;;  %v3374_v63 = vshrl.u32 %v9957_v62, 16  ;;  %v8297_v62 = vld [vmem:[#allocation3 + $0x64] ss:$8 sps:$4 sm:$0xff]  }
 0x14b   : > { %v10000_v16 = vadd.f32 %v951_v23, %v608_v10  ;;  %v953_v31 = vpop.f32.mrb[6].mxu1  ;;  %v8261_v10 = vld [vmem:[#allocation3 + $0x4] ss:$8 sps:$4 sm:$0xff]   ;;  %v3366_v23 = vshrl.u32 %v7417_v54, 16 }
 0x14c   : > { %3575 = vmatpush1.bf16.msra.mxu0 %v8228_v3  ;;  %v955_v11 = vpop.f32.mrb[7].mxu1  ;;  %v8276_v3 = vld [vmem:[#allocation3 + $0x134] ss:$8 sps:$4 sm:$0xff]  }
 0x14d   : > { %3576 = vmatprep.subr.bf16.mxu0 %v8233_v46  ;;  %4085 = vmatprep.subr.bf16.mxu1 %v8276_v3  ;;  %v3247_v31 = vld [vmem:[%s8956_s18 + $0x70] sm:$0x11] }
 0x14e   : > { %v616_v37 = vpop.f32.mrb[8].mxu0  ;;  %4086 = vmatpush1.bf16.msra.mxu1 %v8274_v12  ;;  %v8288_v11 = vld [vmem:[#allocation3 + $0x154] ss:$8 sps:$4 sm:$0xff]   ;;  %v7420_v54 = vcombine.low %v3247_v31, %v3247_v31  ;;  %v8306_v12 = vld [vmem:[#allocation3 + $0x184] ss:$8 sps:$4 sm:$0xff]  }
 0x14f   : > { %v618_v19 = vpop.f32.mrb[9].mxu0 }
 0x150   : > { %3577 = vmatpush1.bf16.msra.mxu0 %v8231_v14  ;;  %v620_v21 = vpop.f32.mrb[10].mxu0  ;;  %v7416_v14 = vcombine.low %v9806_v17, %v3244_v28  ;;  %v7421_v28 = vcombine.high %v3247_v31, %v3247_v31  ;;  %v8310_v31 = vld [vmem:[#allocation3 + $0x190] ss:$8 sps:$4 sm:$0xff]  }
 0x151   : > { %3578 = vmatprep.subr.bf16.mxu0 %v8236_v15  ;;  %v622_v57 = vpop.f32.mrb[11].mxu0  ;;  %v959_v29 = vpop.f32.mrb[8].mxu1  ;;  %v3329_v21 = vsel %vm1057_vm1, %v3324_v1, %v3328_v49  ;;  %v8304_v1 = vld [vmem:[#allocation3 + $0x180] ss:$8 sps:$4 sm:$0xff]  }
 0x152   : > { %v10009_v7 = vadd.f32 %v959_v29, %v616_v37  ;;  %v961_v38 = vpop.f32.mrb[9].mxu1  ;;  %v3352_v37 = vor.u32 %v3350_v34, %v9948_v52  ;;  %v3346_v57 = vshll.u32 %v7416_v14, 16  ;;  %v8280_v52 = vld [vmem:[#allocation3 + $0x140] ss:$8 sps:$4 sm:$0xff]   ;;  %v8286_v29 = vld [vmem:[#allocation3 + $0x150] ss:$8 sps:$4 sm:$0xff]  }
 0x153   : > { %v10012_v43 = vadd.f32 %v961_v38, %v618_v19  ;;  %v963_v40 = vpop.f32.mrb[10].mxu1  ;;  %v8259_v19 = vld [vmem:[#allocation3] ss:$8 sps:$4 sm:$0xff]   ;;  %v3358_v38 = vshrl.u32 %v7416_v14, 16  ;;  %v3378_v34 = vshll.u32 %v7420_v54, 16 }
 0x154   : > { %3579 = vmatpush1.bf16.msra.mxu0 %v8234_v13  ;;  %v965_v59 = vpop.f32.mrb[11].mxu1  ;;  %v8282_v13 = vld [vmem:[#allocation3 + $0x144] ss:$8 sps:$4 sm:$0xff]   ;;  %v3382_v40 = vshrl.u32 %v9938_v41, 16 }
 0x155   : > { %3580 = vmatprep.subr.bf16.mxu0 %v8239_v18  ;;  %v3356_v18 = vrot.slane %v3354_v2, 1  ;;  %4087 = vmatprep.subr.bf16.mxu1 %v8282_v13  ;;  %v8279_v59 = vld [vmem:[#allocation3 + $0x34] ss:$8 sps:$4 sm:$0xff]   ;;  %v8283_v2 = vld [vmem:[#allocation3 + $0x40] ss:$8 sps:$4 sm:$0xff]  }
 0x156   : > { %v626_v39 = vpop.f32.mrb[12].mxu0  ;;  %4088 = vmatpush1.bf16.msra.mxu1 %v8280_v52  ;;  %v8303_v52 = vld [vmem:[#allocation3 + $0x74] ss:$8 sps:$4 sm:$0xff]   ;;  %v8330_v54 = vld [vmem:[#allocation3 + $0x1c4] ss:$8 sps:$4 sm:$0xff]  }
 0x157   : > { %v628_v27 = vpop.f32.mrb[13].mxu0  ;;  %v3357_v17 = vsel %vm1057_vm1, %v3352_v37, %v3356_v18  ;;  %v3368_v26 = vor.u32 %v3366_v23, %v3356_v18  ;;  %4089 = vmatprep.subr.bf16.mxu1 %v8288_v11  ;;  %v8318_v11 = vld [vmem:[#allocation3 + $0x1a4] ss:$8 sps:$4 sm:$0xff]  }
 0x158   : > { %3581 = vmatpush1.bf16.msra.mxu0 %v8237_v22  ;;  %v630_v51 = vpop.f32.mrb[14].mxu0  ;;  %v3370_v22 = vshll.u32 %v9938_v41, 16 }
 0x159   : > { %3582 = vmatprep.subr.bf16.mxu0 %v8242_v5  ;;  %v632_v30 = vpop.f32.mrb[15].mxu0  ;;  %v969_v4 = vpop.f32.mrb[12].mxu1  ;;  %v8267_v5 = vld [vmem:[#allocation3 + $0x14] ss:$8 sps:$4 sm:$0xff]   ;;  %v8273_v51 = vld [vmem:[#allocation3 + $0x24] ss:$8 sps:$4 sm:$0xff]  }
 0x15a   : > { %v10033_v25 = vadd.f32 %v969_v4, %v626_v39  ;;  %v971_v60 = vpop.f32.mrb[13].mxu1  ;;  %v3348_v39 = vrot.slane %v3346_v57, 1  ;;  %4090 = vmatpush1.bf16.msra.mxu1 %v8286_v29  ;;  %v8300_v4 = vld [vmem:[#allocation3 + $0x174] ss:$8 sps:$4 sm:$0xff]   ;;  %v8295_v57 = vld [vmem:[#allocation3 + $0x60] ss:$8 sps:$4 sm:$0xff]  }
 0x15b   : > { %v10035_v9 = vadd.f32 %v971_v60, %v628_v27  ;;  %v973_v46 = vpop.f32.mrb[14].mxu1  ;;  %v3372_v27 = vrot.slane %v3370_v22, 1  ;;  %4091 = vmatprep.subr.bf16.mxu1 %v8294_v56  ;;  %v8298_v60 = vld [vmem:[#allocation3 + $0x170] ss:$8 sps:$4 sm:$0xff]   ;;  %v8312_v22 = vld [vmem:[#allocation3 + $0x194] ss:$8 sps:$4 sm:$0xff]  }
 0x15c   : > { %3583 = vmatpush1.bf16.msra.mxu0 %v8240_v24  ;;  %v975_v15 = vpop.f32.mrb[15].mxu1  ;;  %v3344_v24 = vor.u32 %v3342_v53, %v3328_v49  ;;  %v3360_v45 = vor.u32 %v3358_v38, %v3348_v39  ;;  %v3380_v46 = vrot.slane %v3378_v34, 1 }
 0x15d   : > { %3584 = vmatprep.subr.bf16.mxu0 %v8245_v8  ;;  %v8265_v8 = vld [vmem:[#allocation3 + $0x10] ss:$8 sps:$4 sm:$0xff]   ;;  %v3373_v36 = vsel %vm1057_vm1, %v3368_v26, %v3372_v27  ;;  %v3384_v61 = vor.u32 %v3382_v40, %v3372_v27 }
 0x15e   : > { %v3349_v30 = vsel %vm1057_vm1, %v3344_v24, %v3348_v39  ;;  %4092 = vmatpush1.bf16.msra.mxu1 %v8292_v32  ;;  %v8309_v24 = vld [vmem:[#allocation3 + $0x84] ss:$8 sps:$4 sm:$0xff]   ;;  %v8316_v39 = vld [vmem:[#allocation3 + $0x1a0] ss:$8 sps:$4 sm:$0xff]  }
 0x15f   : > { %4093 = vmatprep.subr.bf16.mxu1 %v8300_v4  ;;  %v8327_v4 = vld [vmem:[#allocation3 + $0xb4] ss:$8 sps:$4 sm:$0xff]  }
 0x160   : > { %3585 = vmatpush1.bf16.msra.mxu0 %v8243_v44  ;;  %v3386_v44 = vshll.u32 %v7421_v28, 16 }
 0x161   : > { %3586 = vmatprep.subr.bf16.mxu0 %v8248_v50  ;;  %v3364_v50 = vrot.slane %v3362_v33, 1  ;;  %v8307_v33 = vld [vmem:[#allocation3 + $0x80] ss:$8 sps:$4 sm:$0xff]  }
 0x162   : > { %4094 = vmatpush1.bf16.msra.mxu1 %v8298_v60 }
 0x163   : > { %v3365_v41 = vsel %vm1057_vm1, %v3360_v45, %v3364_v50  ;;  %v3376_v3 = vor.u32 %v3374_v63, %v3364_v50  ;;  %4095 = vmatprep.subr.bf16.mxu1 %v8306_v12  ;;  %v8322_v45 = vld [vmem:[#allocation3 + $0x1b0] ss:$8 sps:$4 sm:$0xff]   ;;  %v8342_v12 = vld [vmem:[#allocation3 + $0x1e4] ss:$8 sps:$4 sm:$0xff]  }
 0x164   : > { %3587 = vmatpush1.bf16.msra.mxu0 %v8246_v42  ;;  %v3388_v42 = vrot.slane %v3386_v44, 1 }
 0x165   : > { %3588 = vmatprep.subr.bf16.mxu0 %v8251_v0  ;;  %v8285_v0 = vld [vmem:[#allocation3 + $0x44] ss:$8 sps:$4 sm:$0xff]  }
 0x166   : > { %v3389_v6 = vsel %vm1057_vm1, %v3384_v61, %v3388_v42  ;;  %4096 = vmatpush1.bf16.msra.mxu1 %v8304_v1  ;;  %v8340_v1 = vld [vmem:[#allocation3 + $0x1e0] ss:$8 sps:$4 sm:$0xff]  }
 0x167   : > { %4097 = vmatprep.subr.bf16.mxu1 %v8312_v22  ;;  %v8348_v22 = vld [vmem:[#allocation3 + $0x1f4] ss:$8 sps:$4 sm:$0xff]  }
 0x168   : > { %3589 = vmatpush1.bf16.msra.mxu0 %v8249_v48  ;;  %v8291_v48 = vld [vmem:[#allocation3 + $0x54] ss:$8 sps:$4 sm:$0xff]  }
 0x169   : > { %4385 = vmatprep.subr.bf16.mxu0 %v8261_v10  ;;  %v8289_v10 = vld [vmem:[#allocation3 + $0x50] ss:$8 sps:$4 sm:$0xff]  }
 0x16a   : > { %4098 = vmatpush1.bf16.msra.mxu1 %v8310_v31  ;;  %v8346_v31 = vld [vmem:[#allocation3 + $0x1f0] ss:$8 sps:$4 sm:$0xff]  }
 0x16b   : > { %3591 = vmatmul.mubr.bf16.vlgmr.msra.gmra.mrb[64].mxu0 %v3329_v21  ;;  %v3381_v21 = vsel %vm1057_vm1, %v3376_v3, %v3380_v46  ;;  %4099 = vmatprep.subr.bf16.mxu1 %v8318_v11  ;;  %v8334_v46 = vld [vmem:[#allocation3 + $0x1d0] ss:$8 sps:$4 sm:$0xff]  }
 0x16c   : > { %3600 = vmatprep.mubr.bf16.mxu0 %v3357_v17  ;;  %4386 = vmatpush1.bf16.msra.mxu0 %v8259_v19 }
 0x16d   : > { %4387 = vmatprep.subr.bf16.mxu0 %v8267_v5 }
 0x16e   : > { %4100 = vmatpush1.bf16.msra.mxu1 %v8316_v39  ;;  %v8345_v39 = vld [vmem:[#allocation3 + $0xe4] ss:$8 sps:$4 sm:$0xff]  }
 0x170   : > { %4388 = vmatpush1.bf16.msra.mxu0 %v8265_v8 }
 0x171   : > { %4389 = vmatprep.subr.bf16.mxu0 %v8273_v51 }
 0x173   : > { %3601 = vmatmul.mubr.bf16.gmra.mrb[68].mxu0 %v3349_v30 }
 0x174   : > { %3610 = vmatprep.mubr.bf16.mxu0 %v3373_v36  ;;  %4390 = vmatpush1.bf16.msra.mxu0 %v8271_v35  ;;  %v8324_v35 = vld [vmem:[#allocation3 + $0x1b4] ss:$8 sps:$4 sm:$0xff]  }
 0x175   : > { %4391 = vmatprep.subr.bf16.mxu0 %v8279_v59  ;;  %v8315_v59 = vld [vmem:[#allocation3 + $0x94] ss:$8 sps:$4 sm:$0xff]   ;;  %4101 = vmatprep.subr.bf16.mxu1 %v8324_v35  ;;  %v8363_v35 = vld [vmem:[#allocation3 + $0x224] ss:$8 sps:$4 sm:$0xff]  }
 0x176   : > { %4102 = vmatpush1.bf16.msra.mxu1 %v8322_v45 }
 0x177   : > { %4103 = vmatprep.subr.bf16.mxu1 %v8330_v54  ;;  %v8360_v54 = vld [vmem:[#allocation3 + $0x304] ss:$8 sps:$4 sm:$0xff]  }
 0x178   : > { %4392 = vmatpush1.bf16.msra.mxu0 %v8277_v55  ;;  %v8328_v55 = vld [vmem:[#allocation3 + $0x1c0] ss:$8 sps:$4 sm:$0xff]  }
 0x179   : > { %4393 = vmatprep.subr.bf16.mxu0 %v8285_v0 }
 0x17a   : > { %4104 = vmatpush1.bf16.msra.mxu1 %v8328_v55 }
 0x17b   : > { %3611 = vmatmul.mubr.bf16.gmra.mrb[72].mxu0 %v3365_v41  ;;  %v8319_v41 = vld [vmem:[#allocation3 + $0xa0] ss:$8 sps:$4 sm:$0xff]  }
 0x17c   : > { %3620 = vmatprep.mubr.bf16.mxu0 %v3389_v6  ;;  %4394 = vmatpush1.bf16.msra.mxu0 %v8283_v2  ;;  %v8336_v6 = vld [vmem:[#allocation3 + $0x1d4] ss:$8 sps:$4 sm:$0xff]  }
 0x17d   : > { %4395 = vmatprep.subr.bf16.mxu0 %v8291_v48  ;;  %4105 = vmatprep.subr.bf16.mxu1 %v8336_v6  ;;  %v8376_v6 = vld [vmem:[#allocation3 + $0x330] ss:$8 sps:$4 sm:$0xff]  }
 0x17e   : > { %v1332_v49 = vpop.f32.mrb[16].mxu0  ;;  %4106 = vmatpush1.bf16.msra.mxu1 %v8334_v46  ;;  %v8385_v46 = vld [vmem:[#allocation3 + $0x260] ss:$8 sps:$4 sm:$0xff]  }
 0x17f   : > { %v1756_v14 = vpop.f32.mrb[16].mxu1  ;;  %v1371_v15 = vadd.f32 %v1332_v49, %v9953_v58  ;;  %v1334_v13 = vpop.f32.mrb[17].mxu0  ;;  %4107 = vmatprep.subr.bf16.mxu1 %v8342_v12  ;;  %v8390_v12 = vld [vmem:[#allocation3 + $0x354] ss:$8 sps:$4 sm:$0xff]  }
 0x180   : > { %v1758_v37 = vpop.f32.mrb[17].mxu1  ;;  %v1372_v18 = vadd.f32 %v1334_v13, %v9962_v47  ;;  %v1336_v19 = vpop.f32.mrb[18].mxu0  ;;  %4396 = vmatpush1.bf16.msra.mxu0 %v8289_v10  ;;  %v8301_v47 = vld [vmem:[#allocation3 + $0x70] ss:$8 sps:$4 sm:$0xff]  }
 0x181   : > { %v1760_v53 = vpop.f32.mrb[18].mxu1  ;;  %v10054_v17 = vadd.f32 %v1756_v14, %v1371_v15  ;;  %v1338_v23 = vpop.f32.mrb[19].mxu0  ;;  %4397 = vmatprep.subr.bf16.mxu0 %v8297_v62  ;;  %v8333_v62 = vld [vmem:[#allocation3 + $0xc4] ss:$8 sps:$4 sm:$0xff]   ;;  %v8339_v19 = vld [vmem:[#allocation3 + $0xd4] ss:$8 sps:$4 sm:$0xff]  }
 0x182   : > { %v1762_v5 = vpop.f32.mrb[19].mxu1  ;;  %v10056_v58 = vadd.f32 %v1758_v37, %v1372_v18  ;;  %v8331_v18 = vld [vmem:[#allocation3 + $0xc0] ss:$8 sps:$4 sm:$0xff]   ;;  %4108 = vmatpush1.bf16.msra.mxu1 %v8340_v1  ;;  %v8391_v1 = vld [vmem:[#allocation3 + $0x270] ss:$8 sps:$4 sm:$0xff]  }
 0x183   : > { %3621 = vmatmul.mubr.bf16.gmra.mrb[76].mxu0 %v3381_v21  ;;  %4109 = vmatprep.subr.bf16.mxu1 %v8348_v22 }
 0x184   : > { %4398 = vmatpush1.bf16.msra.mxu0 %v8295_v57 }
 0x185   : > { %4399 = vmatprep.subr.bf16.mxu0 %v8303_v52 }
 0x186   : > { %v1342_v8 = vpop.f32.mrb[20].mxu0  ;;  %4110 = vmatpush1.bf16.msra.mxu1 %v8346_v31 }
 0x187   : > { %v1766_v26 = vpop.f32.mrb[20].mxu1  ;;  %v1375_v27 = vadd.f32 %v1342_v8, %v9995_v20  ;;  %v1344_v28 = vpop.f32.mrb[21].mxu0  ;;  %v8313_v20 = vld [vmem:[#allocation3 + $0x90] ss:$8 sps:$4 sm:$0xff]   ;;  %v8352_v8 = vld [vmem:[#allocation3 + $0x200] ss:$8 sps:$4 sm:$0xff]  }
 0x188   : > { %v1768_v51 = vpop.f32.mrb[21].mxu1  ;;  %v1376_v29 = vadd.f32 %v1344_v28, %v10000_v16  ;;  %v1346_v30 = vpop.f32.mrb[22].mxu0  ;;  %4400 = vmatpush1.bf16.msra.mxu0 %v8301_v47  ;;  %v8321_v16 = vld [vmem:[#allocation3 + $0xa4] ss:$8 sps:$4 sm:$0xff]  }
 0x189   : > { %v1770_v38 = vpop.f32.mrb[22].mxu1  ;;  %v10060_v36 = vadd.f32 %v1766_v26, %v1375_v27  ;;  %v1348_v40 = vpop.f32.mrb[23].mxu0  ;;  %4401 = vmatprep.subr.bf16.mxu0 %v8309_v24  ;;  %v8337_v24 = vld [vmem:[#allocation3 + $0xd0] ss:$8 sps:$4 sm:$0xff]   ;;  %v8354_v26 = vld [vmem:[#allocation3 + $0x204] ss:$8 sps:$4 sm:$0xff]  }
 0x18a   : > { %v1772_v44 = vpop.f32.mrb[23].mxu1  ;;  %v10062_v50 = vadd.f32 %v1768_v51, %v1376_v29  ;;  %v8357_v51 = vld [vmem:[#allocation3 + $0x214] ss:$8 sps:$4 sm:$0xff]   ;;  %4733 = vmatprep.subr.bf16.mxu1 %v8354_v26  ;;  %v8355_v30 = vld [vmem:[#allocation3 + $0x210] ss:$8 sps:$4 sm:$0xff]  }
 0x18b   : > { %v8343_v38 = vld [vmem:[#allocation3 + $0xe0] ss:$8 sps:$4 sm:$0xff]   ;;  %v8351_v40 = vld [vmem:[#allocation3 + $0xf4] ss:$8 sps:$4 sm:$0xff]   ;;  %v8400_v26 = vld [vmem:[#allocation3 + $0x370] ss:$8 sps:$4 sm:$0xff]  }
 0x18c   : > { %4402 = vmatpush1.bf16.msra.mxu0 %v8307_v33  ;;  %v8361_v44 = vld [vmem:[#allocation3 + $0x220] ss:$8 sps:$4 sm:$0xff]  }
 0x18d   : > { %4403 = vmatprep.subr.bf16.mxu0 %v8315_v59  ;;  %v8349_v59 = vld [vmem:[#allocation3 + $0xf0] ss:$8 sps:$4 sm:$0xff]  }
 0x18e   : > { %v1352_v56 = vpop.f32.mrb[24].mxu0 }
 0x18f   : > { %v1776_v61 = vpop.f32.mrb[24].mxu1  ;;  %v1379_v42 = vadd.f32 %v1352_v56, %v10009_v7  ;;  %v1354_v0 = vpop.f32.mrb[25].mxu0  ;;  %v8734_v7 = vmov 0   ;;  %v8358_v56 = vld [vmem:[#allocation3 + $0x300] ss:$8 sps:$4 sm:$0xff]  }
 0x190   : > { %v1778_v32 = vpop.f32.mrb[25].mxu1  ;;  %v1380_v63 = vadd.f32 %v1354_v0, %v10012_v43  ;;  %v1356_v34 = vpop.f32.mrb[26].mxu0  ;;  %4404 = vmatpush1.bf16.msra.mxu0 %v8313_v20  ;;  %3831 = vst [vmem:[#allocation2 + $0x18] sm:$0xff] %v8734_v7  ;;  %4111 = vmatprep.mubr.bf16.mxu1 %v8734_v7  ;;  %3828 = vst [vmem:[#allocation2] sm:$0xff] %v8734_v7  ;;  %v8325_v43 = vld [vmem:[#allocation3 + $0xb0] ss:$8 sps:$4 sm:$0xff]  }
 0x191   : > { %v1780_v2 = vpop.f32.mrb[26].mxu1  ;;  %v10066_v48 = vadd.f32 %v1776_v61, %v1379_v42  ;;  %v1358_v60 = vpop.f32.mrb[27].mxu0  ;;  %4405 = vmatprep.subr.bf16.mxu0 %v8321_v16  ;;  %3829 = vst [vmem:[#allocation2 + $0x8] sm:$0xff] %v8734_v7  ;;  %3830 = vst [vmem:[#allocation2 + $0x10] sm:$0xff] %v8734_v7  ;;  %4112 = vmatmul.mubr.bf16.vlgmr.msra.gmra.mrb[64].mxu1 %v8734_v7  ;;  %v8369_v20 = vld [vmem:[#allocation3 + $0x234] ss:$8 sps:$4 sm:$0xff]  }
 0x192   : > { %v1782_v3 = vpop.f32.mrb[27].mxu1  ;;  %v10068_v10 = vadd.f32 %v1778_v32, %v1380_v63  ;;  %3840 = vst [vmem:[#allocation2 + $0x60] sm:$0xff] %v8734_v7  ;;  %3841 = vst [vmem:[#allocation2 + $0x68] sm:$0xff] %v8734_v7  ;;  %4734 = vmatpush1.bf16.msra.mxu1 %v8352_v8  ;;  %v8367_v16 = vld [vmem:[#allocation3 + $0x230] ss:$8 sps:$4 sm:$0xff]  }
 0x193   : > { %3842 = vst [vmem:[#allocation2 + $0x70] sm:$0xff] %v8734_v7  ;;  %3843 = vst [vmem:[#allocation2 + $0x78] sm:$0xff] %v8734_v7  ;;  %4735 = vmatprep.subr.bf16.mxu1 %v8357_v51  ;;  %v8375_v61 = vld [vmem:[#allocation3 + $0x244] ss:$8 sps:$4 sm:$0xff]   ;;  %v8366_v42 = vld [vmem:[#allocation3 + $0x314] ss:$8 sps:$4 sm:$0xff]  }
 0x194   : > { %4406 = vmatpush1.bf16.msra.mxu0 %v8319_v41  ;;  %v8373_v0 = vld [vmem:[#allocation3 + $0x240] ss:$8 sps:$4 sm:$0xff]   ;;  %v8364_v32 = vld [vmem:[#allocation3 + $0x310] ss:$8 sps:$4 sm:$0xff]   ;;  %v8381_v41 = vld [vmem:[#allocation3 + $0x254] ss:$8 sps:$4 sm:$0xff]  }
 0x195   : > { %4407 = vmatprep.subr.bf16.mxu0 %v8327_v4  ;;  %v8372_v63 = vld [vmem:[#allocation3 + $0x324] ss:$8 sps:$4 sm:$0xff]   ;;  %v8379_v34 = vld [vmem:[#allocation3 + $0x250] ss:$8 sps:$4 sm:$0xff]   ;;  %v8370_v2 = vld [vmem:[#allocation3 + $0x320] ss:$8 sps:$4 sm:$0xff]  }
 0x196   : > { %v1362_v49 = vpop.f32.mrb[28].mxu0  ;;  %4736 = vmatpush1.bf16.msra.mxu1 %v8355_v30  ;;  %v8378_v4 = vld [vmem:[#allocation3 + $0x334] ss:$8 sps:$4 sm:$0xff]   ;;  %v8384_v60 = vld [vmem:[#allocation3 + $0x344] ss:$8 sps:$4 sm:$0xff]  }
 0x197   : > { %v1786_v14 = vpop.f32.mrb[28].mxu1  ;;  %v1383_v15 = vadd.f32 %v1362_v49, %v10033_v25  ;;  %v1364_v13 = vpop.f32.mrb[29].mxu0  ;;  %v10086_v25 = vrot.slane %v8734_v7, 7  ;;  %v3844_v28 = vld [vmem:[#allocation2] sm:$0x80]  ;;  %4737 = vmatprep.subr.bf16.mxu1 %v8363_v35  ;;  %v10101_v35 = vrot.slane %v8734_v7, 1 }
 0x198   : > { %v1788_v37 = vpop.f32.mrb[29].mxu1  ;;  %v1384_v21 = vadd.f32 %v1364_v13, %v10035_v9  ;;  %v1366_v53 = vpop.f32.mrb[30].mxu0  ;;  %4408 = vmatpush1.bf16.msra.mxu0 %v8325_v43  ;;  %v3845_v47 = vld [vmem:[#allocation2 + $0x8] sm:$0x80]  ;;  %v4146_v33 = vshrl.u32 %v3844_v28, 16 }
 0x199   : > { %v1790_v57 = vpop.f32.mrb[30].mxu1  ;;  %v10081_v23 = vadd.f32 %v1786_v14, %v1383_v15  ;;  %v1368_v5 = vpop.f32.mrb[31].mxu0  ;;  %4409 = vmatprep.subr.bf16.mxu0 %v8333_v62  ;;  %v4158_v9 = vshrl.u32 %v3845_v47, 16  ;;  %v8387_v3 = vld [vmem:[#allocation3 + $0x264] ss:$8 sps:$4 sm:$0xff]  }
 0x19a   : > { %v1792_v52 = vpop.f32.mrb[31].mxu1  ;;  %v10083_v11 = vadd.f32 %v1788_v37, %v1384_v21  ;;  %v4148_v45 = vrot.slane %v4146_v33, 7  ;;  %4738 = vmatpush1.bf16.msra.mxu1 %v8361_v44  ;;  %v8382_v43 = vld [vmem:[#allocation3 + $0x340] ss:$8 sps:$4 sm:$0xff]   ;;  %v8393_v62 = vld [vmem:[#allocation3 + $0x274] ss:$8 sps:$4 sm:$0xff]  }
 0x19b   : > { %v4160_v27 = vrot.slane %v4158_v9, 7  ;;  %4739 = vmatprep.subr.bf16.mxu1 %v8369_v20  ;;  %v8388_v49 = vld [vmem:[#allocation3 + $0x350] ss:$8 sps:$4 sm:$0xff]   ;;  %v8396_v14 = vld [vmem:[#allocation3 + $0x364] ss:$8 sps:$4 sm:$0xff]  }
 0x19c   : > { %4410 = vmatpush1.bf16.msra.mxu0 %v8331_v18  ;;  %v4156_v55 = vsel %vm4144_vm2, %v4148_v45, %v10086_v25  ;;  %v8397_v21 = vld [vmem:[#allocation3 + $0x280] ss:$8 sps:$4 sm:$0xff]   ;;  %v8399_v52 = vld [vmem:[#allocation3 + $0x284] ss:$8 sps:$4 sm:$0xff]   ;;  %v8403_v8 = vld [vmem:[#allocation3 + $0x290] ss:$8 sps:$4 sm:$0xff]  }
 0x19d   : > { %4411 = vmatprep.subr.bf16.mxu0 %v8339_v19  ;;  %v4168_v29 = vsel %vm4144_vm2, %v4160_v27, %v10086_v25  ;;  %v8394_v5 = vld [vmem:[#allocation3 + $0x360] ss:$8 sps:$4 sm:$0xff]   ;;  %v8411_v51 = vld [vmem:[#allocation3 + $0x2a4] ss:$8 sps:$4 sm:$0xff]   ;;  %v8412_v7 = vld [vmem:[#allocation3 + $0x390] ss:$8 sps:$4 sm:$0xff]  }
 0x19e   : > { %4417 = vmatprep.mubr.bf16.mxu0 %v4168_v29  ;;  %4740 = vmatpush1.bf16.msra.mxu1 %v8367_v16  ;;  %v8409_v33 = vld [vmem:[#allocation3 + $0x2a0] ss:$8 sps:$4 sm:$0xff]  }
 0x19f   : > { %4741 = vmatprep.subr.bf16.mxu1 %v8375_v61  ;;  %v8406_v45 = vld [vmem:[#allocation3 + $0x380] ss:$8 sps:$4 sm:$0xff]   ;;  %v8415_v61 = vld [vmem:[#allocation3 + $0x2b0] ss:$8 sps:$4 sm:$0xff]  }
 0x1a0   : > { %4412 = vmatpush1.bf16.msra.mxu0 %v8337_v24 }
 0x1a1   : > { %4413 = vmatprep.subr.bf16.mxu0 %v8345_v39  ;;  %v8402_v39 = vld [vmem:[#allocation3 + $0x374] ss:$8 sps:$4 sm:$0xff]  }
 0x1a2   : > { %4742 = vmatpush1.bf16.msra.mxu1 %v8373_v0 }
 0x1a3   : > { %4743 = vmatprep.subr.bf16.mxu1 %v8381_v41 }
 0x1a4   : > { %4414 = vmatpush1.bf16.msra.mxu0 %v8343_v38 }
 0x1a5   : > { %4415 = vmatprep.subr.bf16.mxu0 %v8351_v40 }
 0x1a6   : > { %4744 = vmatpush1.bf16.msra.mxu1 %v8379_v34 }
 0x1a7   : > { %4745 = vmatprep.subr.bf16.mxu1 %v8387_v3  ;;  %v8418_v3 = vld [vmem:[#allocation3 + $0x3a0] ss:$8 sps:$4 sm:$0xff]  }
 0x1a8   : > { %4416 = vmatpush1.bf16.msra.mxu0 %v8349_v59 }
 0x1a9   : > { %5053 = vmatprep.subr.bf16.mxu0 %v8360_v54 }
 0x1aa   : > { %4746 = vmatpush1.bf16.msra.mxu1 %v8385_v46 }
 0x1ab   : > { %4418 = vmatmul.mubr.bf16.vlgmr.msra.gmra.mrb[80].mxu0 %v4156_v55  ;;  %4747 = vmatprep.subr.bf16.mxu1 %v8393_v62  ;;  %v8426_v62 = vld [vmem:[#allocation3 + $0x3b4] ss:$8 sps:$4 sm:$0xff]  }
 0x1ac   : > { %5054 = vmatpush1.bf16.msra.mxu0 %v8358_v56  ;;  %v8417_v56 = vld [vmem:[#allocation3 + $0x2b4] ss:$8 sps:$4 sm:$0xff]  }
 0x1ad   : > { %5055 = vmatprep.subr.bf16.mxu0 %v8366_v42 }
 0x1ae   : > { %4748 = vmatpush1.bf16.msra.mxu1 %v8391_v1 }
 0x1af   : > { %4749 = vmatprep.subr.bf16.mxu1 %v8399_v52  ;;  %v8430_v52 = vld [vmem:[#allocation3 + $0x3c0] ss:$8 sps:$4 sm:$0xff]  }
 0x1b0   : > { %5056 = vmatpush1.bf16.msra.mxu0 %v8364_v32  ;;  %v8423_v32 = vld [vmem:[#allocation3 + $0x2c4] ss:$8 sps:$4 sm:$0xff]  }
 0x1b1   : > { %5057 = vmatprep.subr.bf16.mxu0 %v8372_v63 }
 0x1b2   : > { %4750 = vmatpush1.bf16.msra.mxu1 %v8397_v21 }
 0x1b4   : > { %5058 = vmatpush1.bf16.msra.mxu0 %v8370_v2  ;;  %v8421_v2 = vld [vmem:[#allocation3 + $0x2c0] ss:$8 sps:$4 sm:$0xff]  }
 0x1b5   : > { %5059 = vmatprep.subr.bf16.mxu0 %v8378_v4 }
 0x1b8   : > { %5060 = vmatpush1.bf16.msra.mxu0 %v8376_v6 }
 0x1b9   : > { %5061 = vmatprep.subr.bf16.mxu0 %v8384_v60 }
 0x1bc   : > { %5062 = vmatpush1.bf16.msra.mxu0 %v8382_v43 }
 0x1bd   : > { %5063 = vmatprep.subr.bf16.mxu0 %v8390_v12 }
 0x1be   : > { %v2054_v15 = vpop.f32.mrb[32].mxu0 }
 0x1bf   : > { %v2462_v13 = vpop.f32.mrb[32].mxu1  ;;  %v2093_v37 = vadd.f32 %v2054_v15, %v10054_v17  ;;  %v2056_v18 = vpop.f32.mrb[33].mxu0  ;;  %v8405_v17 = vld [vmem:[#allocation3 + $0x294] ss:$8 sps:$4 sm:$0xff]  }
 0x1c0   : > { %v2464_v19 = vpop.f32.mrb[33].mxu1  ;;  %v2094_v53 = vadd.f32 %v2056_v18, %v10056_v58  ;;  %v2058_v57 = vpop.f32.mrb[34].mxu0  ;;  %5064 = vmatpush1.bf16.msra.mxu0 %v8388_v49  ;;  %4751 = vmatprep.subr.bf16.mxu1 %v8405_v17  ;;  %v8408_v58 = vld [vmem:[#allocation3 + $0x384] ss:$8 sps:$4 sm:$0xff]   ;;  %v8427_v49 = vld [vmem:[#allocation3 + $0x2d0] ss:$8 sps:$4 sm:$0xff]  }
 0x1c1   : > { %v2466_v22 = vpop.f32.mrb[34].mxu1  ;;  %v10095_v31 = vadd.f32 %v2462_v13, %v2093_v37  ;;  %v2060_v47 = vpop.f32.mrb[35].mxu0  ;;  %5065 = vmatprep.subr.bf16.mxu0 %v8396_v14  ;;  %4752 = vmatpush1.bf16.msra.mxu1 %v8403_v8  ;;  %v8424_v14 = vld [vmem:[#allocation3 + $0x3b0] ss:$8 sps:$4 sm:$0xff]   ;;  %v8435_v37 = vld [vmem:[#allocation3 + $0x2e4] ss:$8 sps:$4 sm:$0xff]  }
 0x1c2   : > { %v2468_v24 = vpop.f32.mrb[35].mxu1  ;;  %v10097_v9 = vadd.f32 %v2464_v19, %v2094_v53  ;;  %4753 = vmatprep.subr.bf16.mxu1 %v8411_v51  ;;  %v8433_v53 = vld [vmem:[#allocation3 + $0x2e0] ss:$8 sps:$4 sm:$0xff]   ;;  %v8438_v17 = vld [vmem:[#allocation3 + $0x3d4] ss:$8 sps:$4 sm:$0xff]  }
 0x1c3   : > { %v8450_v51 = vld [vmem:[#allocation3 + $0x3f4] ss:$8 sps:$4 sm:$0xff]  }
 0x1c4   : > { %5066 = vmatpush1.bf16.msra.mxu0 %v8394_v5 }
 0x1c5   : > { %5067 = vmatprep.subr.bf16.mxu0 %v8402_v39  ;;  %4754 = vmatpush1.bf16.msra.mxu1 %v8409_v33 }
 0x1c6   : > { %v2064_v27 = vpop.f32.mrb[36].mxu0  ;;  %4755 = vmatprep.subr.bf16.mxu1 %v8417_v56 }
 0x1c7   : > { %v2472_v28 = vpop.f32.mrb[36].mxu1  ;;  %v2097_v29 = vadd.f32 %v2064_v27, %v10060_v36  ;;  %v2066_v30 = vpop.f32.mrb[37].mxu0  ;;  %v8414_v36 = vld [vmem:[#allocation3 + $0x394] ss:$8 sps:$4 sm:$0xff]   ;;  %v8447_v27 = vld [vmem:[#allocation3 + $0x404] ss:$8 sps:$4 sm:$0xff]  }
 0x1c8   : > { %v2474_v38 = vpop.f32.mrb[37].mxu1  ;;  %v2098_v40 = vadd.f32 %v2066_v30, %v10062_v50  ;;  %v2068_v44 = vpop.f32.mrb[38].mxu0  ;;  %5068 = vmatpush1.bf16.msra.mxu0 %v8400_v26  ;;  %v8420_v50 = vld [vmem:[#allocation3 + $0x3a4] ss:$8 sps:$4 sm:$0xff]   ;;  %v8439_v26 = vld [vmem:[#allocation3 + $0x2f0] ss:$8 sps:$4 sm:$0xff]  }
 0x1c9   : > { %v2476_v59 = vpop.f32.mrb[38].mxu1  ;;  %v10104_v20 = vadd.f32 %v2472_v28, %v2097_v29  ;;  %v2070_v54 = vpop.f32.mrb[39].mxu0  ;;  %5069 = vmatprep.subr.bf16.mxu0 %v8408_v58  ;;  %4756 = vmatpush1.bf16.msra.mxu1 %v8415_v61  ;;  %v8436_v58 = vld [vmem:[#allocation3 + $0x3d0] ss:$8 sps:$4 sm:$0xff]   ;;  %v8442_v28 = vld [vmem:[#allocation3 + $0x3e0] ss:$8 sps:$4 sm:$0xff]  }
 0x1ca   : > { %v2478_v16 = vpop.f32.mrb[39].mxu1  ;;  %v10106_v55 = vadd.f32 %v2474_v38, %v2098_v40  ;;  %4757 = vmatprep.subr.bf16.mxu1 %v8423_v32  ;;  %v8448_v29 = vld [vmem:[#allocation3 + $0x3f0] ss:$8 sps:$4 sm:$0xff]   ;;  %v8456_v30 = vld [vmem:[#allocation3 + $0x504] ss:$8 sps:$4 sm:$0xff]  }
 0x1cc   : > { %5070 = vmatpush1.bf16.msra.mxu0 %v8406_v45 }
 0x1cd   : > { %5071 = vmatprep.subr.bf16.mxu0 %v8414_v36  ;;  %4758 = vmatpush1.bf16.msra.mxu1 %v8421_v2 }
 0x1ce   : > { %v2074_v42 = vpop.f32.mrb[40].mxu0 }
 0x1cf   : > { %v2482_v0 = vpop.f32.mrb[40].mxu1  ;;  %v2101_v41 = vadd.f32 %v2074_v42, %v10066_v48  ;;  %v2076_v63 = vpop.f32.mrb[41].mxu0  ;;  %v8429_v48 = vld [vmem:[#allocation3 + $0x2d4] ss:$8 sps:$4 sm:$0xff]  }
 0x1d0   : > { %v2484_v34 = vpop.f32.mrb[41].mxu1  ;;  %v2102_v4 = vadd.f32 %v2076_v63, %v10068_v10  ;;  %v2078_v6 = vpop.f32.mrb[42].mxu0  ;;  %5072 = vmatpush1.bf16.msra.mxu0 %v8412_v7  ;;  %4759 = vmatprep.subr.bf16.mxu1 %v8429_v48  ;;  %v8432_v10 = vld [vmem:[#allocation3 + $0x3c4] ss:$8 sps:$4 sm:$0xff]  }
 0x1d1   : > { %v2486_v60 = vpop.f32.mrb[42].mxu1  ;;  %v10110_v46 = vadd.f32 %v2482_v0, %v2101_v41  ;;  %v2080_v43 = vpop.f32.mrb[43].mxu0  ;;  %5073 = vmatprep.subr.bf16.mxu0 %v8420_v50  ;;  %4760 = vmatpush1.bf16.msra.mxu1 %v8427_v49 }
 0x1d2   : > { %v2488_v12 = vpop.f32.mrb[43].mxu1  ;;  %v10112_v1 = vadd.f32 %v2484_v34, %v2102_v4  ;;  %4761 = vmatprep.subr.bf16.mxu1 %v8435_v37 }
 0x1d4   : > { %5074 = vmatpush1.bf16.msra.mxu0 %v8418_v3 }
 0x1d5   : > { %5075 = vmatprep.subr.bf16.mxu0 %v8426_v62  ;;  %4762 = vmatpush1.bf16.msra.mxu1 %v8433_v53 }
 0x1d6   : > { %v2084_v15 = vpop.f32.mrb[44].mxu0 }
 0x1d7   : > { %v2492_v13 = vpop.f32.mrb[44].mxu1  ;;  %v2105_v18 = vadd.f32 %v2084_v15, %v10081_v23  ;;  %v2086_v19 = vpop.f32.mrb[45].mxu0  ;;  %v8441_v23 = vld [vmem:[#allocation3 + $0x2f4] ss:$8 sps:$4 sm:$0xff]  }
 0x1d8   : > { %v2494_v21 = vpop.f32.mrb[45].mxu1  ;;  %v2106_v57 = vadd.f32 %v2086_v19, %v10083_v11  ;;  %v2088_v22 = vpop.f32.mrb[46].mxu0  ;;  %5076 = vmatpush1.bf16.msra.mxu0 %v8424_v14  ;;  %4763 = vmatprep.subr.bf16.mxu1 %v8441_v23  ;;  %v8444_v11 = vld [vmem:[#allocation3 + $0x3e4] ss:$8 sps:$4 sm:$0xff]  }
 0x1d9   : > { %v2496_v5 = vpop.f32.mrb[46].mxu1  ;;  %v10116_v47 = vadd.f32 %v2492_v13, %v2105_v18  ;;  %v2090_v24 = vpop.f32.mrb[47].mxu0  ;;  %5077 = vmatprep.subr.bf16.mxu0 %v8432_v10  ;;  %4764 = vmatpush1.bf16.msra.mxu1 %v8439_v26 }
 0x1da   : > { %v2498_v39 = vpop.f32.mrb[47].mxu1  ;;  %v10118_v8 = vadd.f32 %v2494_v21, %v2106_v57  ;;  %5319 = vmatprep.subr.bf16.mxu1 %v8447_v27  ;;  %v3649_v24 = vlaneseq }
 0x1dc   : > { %5078 = vmatpush1.bf16.msra.mxu0 %v8430_v52  ;;  %v10136_v39 = vshrl.u32 %v3649_v24, 7 }
 0x1dd   : > { %5079 = vmatprep.subr.bf16.mxu0 %v8438_v17 }
 0x1de   : > { %v3651_v17 = vsub.s32 0, %v10136_v39  ;;  %v3655_v23 = vsub.s32 1, %v10136_v39 }
 0x1e0   : > { %5080 = vmatpush1.bf16.msra.mxu0 %v8436_v58 }
 0x1e1   : > { %5081 = vmatprep.subr.bf16.mxu0 %v8444_v11 }
 0x1e4   : > { %5082 = vmatpush1.bf16.msra.mxu0 %v8442_v28 }
 0x1e5   : > { %5083 = vmatprep.subr.bf16.mxu0 %v8450_v51 }
 0x1e8   : > { %5084 = vmatpush1.bf16.msra.mxu0 %v8448_v29 }
 0x1e9   : > { %5675 = vmatprep.subr.bf16.mxu0 %v8456_v30 }
 0x1fe   : > { %v2886_v38 = vpop.f32.mrb[48].mxu0 }
 0x1ff   : > { %v3184_v33 = vpop.f32.mrb[48].mxu1  ;;  %v2925_v40 = vadd.f32 %v2886_v38, %v10095_v31  ;;  %v2888_v44 = vpop.f32.mrb[49].mxu0 }
 0x200   : > { %v3186_v59 = vpop.f32.mrb[49].mxu1  ;;  %v2926_v45 = vadd.f32 %v2888_v44, %v10097_v9  ;;  %v2890_v54 = vpop.f32.mrb[50].mxu0  ;;  %v8735_v44 = vmov 0.0  }
 0x201   : > { %v3188_v16 = vpop.f32.mrb[50].mxu1  ;;  %v3223_v36 = vadd.f32 %v3184_v33, %v2925_v40  ;;  %v2892_v56 = vpop.f32.mrb[51].mxu0 }
 0x202   : > { %v3190_v61 = vpop.f32.mrb[51].mxu1  ;;  %v3224_v7 = vadd.f32 %v3186_v59, %v2926_v45 }
 0x206   : > { %v2896_v50 = vpop.f32.mrb[52].mxu0 }
 0x207   : > { %v3194_v42 = vpop.f32.mrb[52].mxu1  ;;  %v2929_v0 = vadd.f32 %v2896_v50, %v10104_v20  ;;  %v2898_v32 = vpop.f32.mrb[53].mxu0 }
 0x208   : > { %v3196_v41 = vpop.f32.mrb[53].mxu1  ;;  %v2930_v63 = vadd.f32 %v2898_v32, %v10106_v55  ;;  %v2900_v34 = vpop.f32.mrb[54].mxu0 }
 0x209   : > { %v3198_v31 = vpop.f32.mrb[54].mxu1  ;;  %v3227_v2 = vadd.f32 %v3194_v42, %v2929_v0  ;;  %v2902_v4 = vpop.f32.mrb[55].mxu0 }
 0x20a   : > { %v3200_v6 = vpop.f32.mrb[55].mxu1  ;;  %v3228_v9 = vadd.f32 %v3196_v41, %v2930_v63 }
 0x20e   : > { %v2906_v60 = vpop.f32.mrb[56].mxu0 }
 0x20f   : > { %v3204_v3 = vpop.f32.mrb[56].mxu1  ;;  %v2933_v43 = vadd.f32 %v2906_v60, %v10110_v46  ;;  %v2908_v12 = vpop.f32.mrb[57].mxu0 }
 0x210   : > { %v3206_v62 = vpop.f32.mrb[57].mxu1  ;;  %v2934_v48 = vadd.f32 %v2908_v12, %v10112_v1  ;;  %v2910_v49 = vpop.f32.mrb[58].mxu0 }
 0x211   : > { %v3208_v20 = vpop.f32.mrb[58].mxu1  ;;  %v10126_v14 = vadd.f32 %v3204_v3, %v2933_v43  ;;  %v2912_v10 = vpop.f32.mrb[59].mxu0 }
 0x212   : > { %v3210_v55 = vpop.f32.mrb[59].mxu1  ;;  %v10128_v15 = vadd.f32 %v3206_v62, %v2934_v48 }
 0x216   : > { %v2916_v13 = vpop.f32.mrb[60].mxu0 }
 0x217   : > { %v3214_v37 = vpop.f32.mrb[60].mxu1  ;;  %v2937_v18 = vadd.f32 %v2916_v13, %v10116_v47  ;;  %v2918_v19 = vpop.f32.mrb[61].mxu0  ;;  %v3647_v47 = vld [vmem:[%s10497_s3] sm:$0x3] }
 0x218   : > { %v3216_v21 = vpop.f32.mrb[61].mxu1  ;;  %v2938_v46 = vadd.f32 %v2918_v19, %v10118_v8  ;;  %v2920_v53 = vpop.f32.mrb[62].mxu0  ;;  %v10145_v8 = vrot.slane %v3647_v47, %v3651_v17  ;;  %v10149_v58 = vrot.slane %v3647_v47, %v3655_v23  ;;  %v4807_v47 = vld [vmem:[#allocation2 + $0x18] sm:$0x80] }
 0x219   : > { %v3218_v57 = vpop.f32.mrb[62].mxu1  ;;  %v10132_v22 = vadd.f32 %v3214_v37, %v2937_v18  ;;  %v2922_v1 = vpop.f32.mrb[63].mxu0 }
 0x21a   : > { %v3220_v5 = vpop.f32.mrb[63].mxu1  ;;  %v10134_v52 = vadd.f32 %v3216_v21, %v2938_v46 }
 0x23e   : > { %v3592_v26 = vpop.f32.mrb[64].mxu0 }
 0x23f   : > { %v3631_v11 = vadd.f32 %v3592_v26, %v3223_v36  ;;  %v3594_v27 = vpop.f32.mrb[65].mxu0 }
 0x240   : > { %v3632_v28 = vadd.f32 %v3594_v27, %v3224_v7  ;;  %v3596_v51 = vpop.f32.mrb[66].mxu0 }
 0x241   : > { %v3659_v29 = vadd.f32 %v10145_v8, %v3631_v11  ;;  %v3598_v30 = vpop.f32.mrb[67].mxu0 }
 0x242   : > { %v3660_v38 = vadd.f32 %v10149_v58, %v3632_v28 }
 0x243   : > { %v3675_v33 = vmax.f32 %v3659_v29, 0.0 }
 0x244   : > { %v3676_v40 = vmax.f32 %v3660_v38, 0.0 }
 0x245   : > { %v10154_v59 = vpack.c.bf16 %v8735_v44, %v3675_v33  ;;  %v4851_v33 = vshrl.u32 %v4807_v47, 16 }
 0x246   : > { %v10157_v45 = vpack.c.bf16 %v8735_v44, %v3676_v40  ;;  %v3602_v54 = vpop.f32.mrb[68].mxu0 }
 0x247   : > { %3832 = vst [vmem:[#allocation2 + $0x20] sm:$0xff] %v10154_v59  ;;  %v3635_v16 = vadd.f32 %v3602_v54, %v3227_v2  ;;  %v3604_v36 = vpop.f32.mrb[69].mxu0  ;;  %v4170_v56 = vshrl.u32 %v10154_v59, 16  ;;  %v4173_v63 = vshll.u32 %v10154_v59, 16 }
 0x248   : > { %3833 = vst [vmem:[#allocation2 + $0x28] sm:$0xff] %v10157_v45  ;;  %v3636_v61 = vadd.f32 %v3604_v36, %v3228_v9  ;;  %v3606_v7 = vpop.f32.mrb[70].mxu0  ;;  %4119 = vmatprep.mubr.bf16.mxu1 %v10157_v45  ;;  %v4178_v50 = vshrl.u32 %v10157_v45, 16  ;;  %v4181_v42 = vshll.u32 %v10157_v45, 16 }
 0x249   : > { %v3663_v0 = vadd.f32 %v10145_v8, %v3635_v16  ;;  %v3608_v32 = vpop.f32.mrb[71].mxu0  ;;  %4120 = vmatmul.mubr.bf16.gmra.mrb[68].mxu1 %v10154_v59  ;;  %v4172_v41 = vrot.slane %v4170_v56, 7 }
 0x24a   : > { %v3664_v34 = vadd.f32 %v10149_v58, %v3636_v61  ;;  %v4180_v31 = vrot.slane %v4178_v50, 7  ;;  %v10173_v2 = vrot.slane %v4181_v42, 1 }
 0x24b   : > { %v3679_v4 = vmax.f32 %v3663_v0, 0.0  ;;  %v10177_v6 = vor.u32 %v4173_v63, %v4172_v41 }
 0x24c   : > { %v3680_v9 = vmax.f32 %v3664_v34, 0.0  ;;  %v10179_v60 = vor.u32 %v4181_v42, %v4180_v31  ;;  %v4516_v3 = vsel %vm1057_vm1, %v10101_v35, %v10173_v2  ;;  %v4853_v34 = vrot.slane %v4851_v33, 7 }
 0x24d   : > { %v10185_v43 = vpack.c.bf16 %v8735_v44, %v3679_v4  ;;  %v4176_v10 = vsel %vm4144_vm2, %v10086_v25, %v10177_v6 }
 0x24e   : > { %v10188_v12 = vpack.c.bf16 %v8735_v44, %v3680_v9  ;;  %v3612_v62 = vpop.f32.mrb[72].mxu0  ;;  %v4184_v48 = vsel %vm4144_vm2, %v10086_v25, %v10179_v60  ;;  %v4806_v9 = vld [vmem:[#allocation2 + $0x10] sm:$0x80] }
 0x24f   : > { %3834 = vst [vmem:[#allocation2 + $0x30] sm:$0xff] %v10185_v43  ;;  %v3639_v49 = vadd.f32 %v3612_v62, %v10126_v14  ;;  %v3614_v20 = vpop.f32.mrb[73].mxu0  ;;  %4425 = vmatprep.mubr.bf16.mxu0 %v4184_v48  ;;  %v4186_v55 = vshrl.u32 %v10185_v43, 16  ;;  %v4189_v21 = vshll.u32 %v10185_v43, 16 }
 0x250   : > { %3835 = vst [vmem:[#allocation2 + $0x38] sm:$0xff] %v10188_v12  ;;  %v3640_v13 = vadd.f32 %v3614_v20, %v10128_v15  ;;  %v3616_v37 = vpop.f32.mrb[74].mxu0  ;;  %4127 = vmatprep.mubr.bf16.mxu1 %v10188_v12  ;;  %v4194_v18 = vshrl.u32 %v10188_v12, 16  ;;  %4426 = vmatmul.mubr.bf16.gmra.mrb[84].mxu0 %v4176_v10  ;;  %v4197_v53 = vshll.u32 %v10188_v12, 16  ;;  %v4527_v20 = vor.u32 %v10173_v2, %v4178_v50  ;;  %v8453_v10 = vld [vmem:[#allocation3 + $0x414] ss:$8 sps:$4 sm:$0xff]  }
 0x251   : > { %v3667_v14 = vadd.f32 %v10145_v8, %v3639_v49  ;;  %v3618_v19 = vpop.f32.mrb[75].mxu0  ;;  %4128 = vmatmul.mubr.bf16.gmra.mrb[72].mxu1 %v10185_v43  ;;  %v4188_v25 = vrot.slane %v4186_v55, 7  ;;  %v8445_v49 = vld [vmem:[#allocation3 + $0x400] ss:$8 sps:$4 sm:$0xff]   ;;  %v4856_v37 = vsel %vm4144_vm2, %v4853_v34, %v10179_v60  ;;  %v8451_v2 = vld [vmem:[#allocation3 + $0x410] ss:$8 sps:$4 sm:$0xff]  }
 0x252   : > { %v3668_v46 = vadd.f32 %v10149_v58, %v3640_v13  ;;  %v4196_v15 = vrot.slane %v4194_v18, 7  ;;  %v5457_v62 = vrot.slane %v4197_v53, 1  ;;  %v4844_v13 = vshrl.u32 %v4806_v9, 16 }
 0x253   : > { %v3683_v57 = vmax.f32 %v3667_v14, 0.0  ;;  %v4191_v1 = vor.u32 %v4189_v21, %v4188_v25 }
 0x254   : > { %v3684_v5 = vmax.f32 %v3668_v46, 0.0  ;;  %v10214_v24 = vor.u32 %v4197_v53, %v4196_v15  ;;  %v5469_v14 = vor.u32 %v5457_v62, %v4194_v18  ;;  %v10281_v50 = vsel %vm1057_vm1, %v4527_v20, %v5457_v62  ;;  %v8466_v20 = vld [vmem:[#allocation3 + $0x520] ss:$8 sps:$4 sm:$0xff]  }
 0x255   : > { %v10217_v26 = vpack.c.bf16 %v8735_v44, %v3683_v57  ;;  %v10230_v30 = vsel %vm4144_vm2, %v4172_v41, %v4191_v1  ;;  %v4503_v41 = vrot.slane %v4173_v63, 1  ;;  %v4846_v60 = vrot.slane %v4844_v13, 7  ;;  %v8454_v1 = vld [vmem:[#allocation3 + $0x500] ss:$8 sps:$4 sm:$0xff]  }
 0x256   : > { %v10220_v11 = vpack.c.bf16 %v8735_v44, %v3684_v5  ;;  %v3622_v27 = vpop.f32.mrb[76].mxu0  ;;  %v10224_v28 = vsel %vm4144_vm2, %v4180_v31, %v10214_v24  ;;  %v4523_v18 = vrot.slane %v4189_v21, 1  ;;  %v10292_v57 = vld [vmem:[#allocation2 + $0x30] sm:$0xff]  ;;  %v8457_v5 = vld [vmem:[#allocation3 + $0x420] ss:$8 sps:$4 sm:$0xff]  }
 0x257   : > { %3836 = vst [vmem:[#allocation2 + $0x40] sm:$0xff] %v10217_v26  ;;  %v3643_v51 = vadd.f32 %v3622_v27, %v10132_v22  ;;  %v3624_v29 = vpop.f32.mrb[77].mxu0  ;;  %4433 = vmatprep.mubr.bf16.mxu0 %v10224_v28  ;;  %v4202_v38 = vshrl.u32 %v10217_v26, 16  ;;  %v4205_v61 = vshll.u32 %v10217_v26, 16  ;;  %v4519_v47 = vor.u32 %v4503_v41, %v4170_v56  ;;  %v8462_v21 = vld [vmem:[#allocation3 + $0x514] ss:$8 sps:$4 sm:$0xff]  }
 0x258   : > { %3837 = vst [vmem:[#allocation2 + $0x48] sm:$0xff] %v10220_v11  ;;  %v3644_v40 = vadd.f32 %v3624_v29, %v10134_v52  ;;  %4135 = vmatprep.mubr.bf16.mxu1 %v10220_v11  ;;  %v4210_v54 = vshrl.u32 %v10220_v11, 16  ;;  %4434 = vmatmul.mubr.bf16.gmra.mrb[88].mxu0 %v10230_v30  ;;  %v3626_v22 = vpop.f32.mrb[78].mxu0  ;;  %v4213_v0 = vshll.u32 %v10220_v11, 16  ;;  %v4849_v33 = vsel %vm4144_vm2, %v4846_v60, %v10177_v6  ;;  %v8477_v60 = vld [vmem:[#allocation3 + $0x454] ss:$8 sps:$4 sm:$0xff]  }
 0x259   : > { %v3671_v16 = vadd.f32 %v10145_v8, %v3643_v51  ;;  %4136 = vmatmul.mubr.bf16.gmra.mrb[76].mxu1 %v10217_v26  ;;  %v10242_v36 = vrot.slane %v4202_v38, 7  ;;  %v3628_v7 = vpop.f32.mrb[79].mxu0  ;;  %v4524_v56 = vsel %vm1057_vm1, %v4519_v47, %v4523_v18  ;;  %v5459_v13 = vshrl.u32 %v10292_v57, 16  ;;  %v8480_v47 = vld [vmem:[#allocation3 + $0x544] ss:$8 sps:$4 sm:$0xff]  }
 0x25a   : > { %v3672_v52 = vadd.f32 %v10149_v58, %v3644_v40  ;;  %v10246_v42 = vrot.slane %v4210_v54, 7  ;;  %4765 = vmatprep.mubr.bf16.mxu1 %v4516_v3  ;;  %v5473_v19 = vrot.slane %v4213_v0, 1 }
 0x25b   : > { %v3687_v32 = vmax.f32 %v3671_v16, 0.0  ;;  %v4207_v8 = vor.u32 %v4205_v61, %v10242_v36  ;;  %v8465_v16 = vld [vmem:[#allocation3 + $0x434] ss:$8 sps:$4 sm:$0xff]  }
 0x25c   : > { %v3688_v31 = vmax.f32 %v3672_v52, 0.0  ;;  %v4215_v4 = vor.u32 %v4213_v0, %v10246_v42  ;;  %v10286_v46 = vsel %vm1057_vm1, %v5469_v14, %v5473_v19  ;;  %v10288_v53 = vor.u32 %v5473_v19, %v4210_v54  ;;  %v8460_v52 = vld [vmem:[#allocation3 + $0x510] ss:$8 sps:$4 sm:$0xff]   ;;  %v8474_v19 = vld [vmem:[#allocation3 + $0x534] ss:$8 sps:$4 sm:$0xff]  }
 0x25d   : > { %v10256_v58 = vpack.c.bf16 %v8735_v44, %v3687_v32  ;;  %v10267_v63 = vsel %vm4144_vm2, %v4188_v25, %v4207_v8  ;;  %v5443_v54 = vshll.u32 %v10292_v57, 16  ;;  %v8463_v32 = vld [vmem:[#allocation3 + $0x430] ss:$8 sps:$4 sm:$0xff]   ;;  %v8468_v8 = vld [vmem:[#allocation3 + $0x524] ss:$8 sps:$4 sm:$0xff]  }
 0x25e   : > { %v10259_v48 = vpack.c.bf16 %v8735_v44, %v3688_v31  ;;  %v10262_v3 = vsel %vm4144_vm2, %v4196_v15, %v4215_v4  ;;  %v4504_v44 = vsel %vm1057_vm1, %v10101_v35, %v4503_v41  ;;  %v8459_v15 = vld [vmem:[#allocation3 + $0x424] ss:$8 sps:$4 sm:$0xff]  }
 0x25f   : > { %3838 = vst [vmem:[#allocation2 + $0x50] sm:$0xff] %v10256_v58  ;;  %4441 = vmatprep.mubr.bf16.mxu0 %v10262_v3  ;;  %v10300_v51 = vld [vmem:[#allocation2 + $0x40] sm:$0xff]  ;;  %v10323_v9 = vrot.slane %v5443_v54, 1 }
 0x260   : > { %3839 = vst [vmem:[#allocation2 + $0x58] sm:$0xff] %v10259_v48  ;;  %4442 = vmatmul.mubr.bf16.gmra.mrb[92].mxu0 %v10267_v63  ;;  %v4878_v25 = vshrl.u32 %v10259_v48, 16  ;;  %v4881_v7 = vshll.u32 %v10259_v48, 16  ;;  %v5463_v0 = vshll.u32 %v10300_v51, 16  ;;  %v8471_v4 = vld [vmem:[#allocation3 + $0x444] ss:$8 sps:$4 sm:$0xff]  }
 0x261   : > { %4766 = vmatmul.mubr.bf16.vlgmr.msra.gmra.mrb[80].mxu1 %v4504_v44  ;;  %5085 = vmatprep.mubr.bf16.mxu0 %v4856_v37  ;;  %v4535_v37 = vor.u32 %v4523_v18, %v4186_v55  ;;  %v8472_v55 = vld [vmem:[#allocation3 + $0x530] ss:$8 sps:$4 sm:$0xff]  }
 0x262   : > { %5320 = vmatpush1.bf16.msra.mxu1 %v8445_v49  ;;  %4773 = vmatprep.mubr.bf16.mxu1 %v10281_v50  ;;  %v10298_v27 = vrot.slane %v4878_v25, 7  ;;  %v10339_v44 = vrot.slane %v5463_v0, 1 }
 0x263   : > { %5321 = vmatprep.subr.bf16.mxu1 %v8453_v10 }
 0x264   : > { %v5809_v31 = vor.u32 %v4881_v7, %v10298_v27 }
 0x266   : > { %5322 = vmatpush1.bf16.msra.mxu1 %v8451_v2  ;;  %v10302_v29 = vld [vmem:[#allocation2 + $0x50] sm:$0xff]  ;;  %v10334_v49 = vsel %vm4144_vm2, %v10246_v42, %v5809_v31  ;;  %v6383_v42 = vor.u32 %v5459_v13, %v10323_v9 }
 0x267   : > { %5323 = vmatprep.subr.bf16.mxu1 %v8459_v15  ;;  %v4459_v40 = vld [vmem:[#allocation2 + $0x58] sm:$0x1]  ;;  %v5479_v22 = vshll.u32 %v10302_v29, 16  ;;  %v5491_v34 = vshrl.u32 %v10302_v29, 16  ;;  %v4458_v10 = vld [vmem:[#allocation2 + $0x50] sm:$0x1] }
 0x268   : > { %5086 = vmatmul.mubr.bf16.vlgmr.msra.gmra.mrb[96].mxu0 %v4849_v33  ;;  %v4561_v41 = vshll.u32 %v4459_v40, 16  ;;  %v4553_v15 = vshll.u32 %v4458_v10, 16  ;;  %v10355_v18 = vsel %vm1057_vm1, %v6383_v42, %v10339_v44  ;;  %v4113_v33 = vpop.f32.mrb[64].mxu1  ;;  %v4870_v40 = vshrl.u32 %v10256_v58, 16  ;;  %v8492_v42 = vld [vmem:[#allocation3 + $0x564] ss:$8 sps:$4 sm:$0xff]  }
 0x269   : > { %5676 = vmatpush1.bf16.msra.mxu0 %v8454_v1  ;;  %4774 = vmatmul.mubr.bf16.gmra.mrb[84].mxu1 %v4524_v56  ;;  %v10313_v6 = vrot.slane %v5479_v22, 1  ;;  %v4115_v56 = vpop.f32.mrb[65].mxu1 }
 0x26a   : > { %5093 = vmatprep.mubr.bf16.mxu0 %v10224_v28  ;;  %5324 = vmatpush1.bf16.msra.mxu1 %v8457_v5  ;;  %v4539_v28 = vrot.slane %v4205_v61, 1  ;;  %v8469_v61 = vld [vmem:[#allocation3 + $0x440] ss:$8 sps:$4 sm:$0xff]   ;;  %v4563_v14 = vrot.slane %v4561_v41, 1  ;;  %v8475_v5 = vld [vmem:[#allocation3 + $0x450] ss:$8 sps:$4 sm:$0xff]  }
 0x26b   : > { %4781 = vmatprep.mubr.bf16.mxu1 %v10286_v46  ;;  %5677 = vmatprep.subr.bf16.mxu0 %v8462_v21  ;;  %v10330_v62 = vor.u32 %v5491_v34, %v10313_v6  ;;  %v8483_v21 = vld [vmem:[#allocation3 + $0x464] ss:$8 sps:$4 sm:$0xff]   ;;  %v8481_v41 = vld [vmem:[#allocation3 + $0x460] ss:$8 sps:$4 sm:$0xff]  }
 0x26c   : > { %5325 = vmatprep.subr.bf16.mxu1 %v8465_v16  ;;  %v4540_v2 = vsel %vm1057_vm1, %v4535_v37, %v4539_v28  ;;  %v4555_v16 = vrot.slane %v4553_v15, 1  ;;  %v4551_v31 = vor.u32 %v4539_v28, %v4202_v38  ;;  %v8484_v37 = vld [vmem:[#allocation3 + $0x550] ss:$8 sps:$4 sm:$0xff]   ;;  %v8495_v28 = vld [vmem:[#allocation3 + $0x484] ss:$8 sps:$4 sm:$0xff]  }
 0x26d   : > { %5678 = vmatpush1.bf16.msra.mxu0 %v8460_v52  ;;  %v10351_v1 = vsel %vm1057_vm1, %v10330_v62, %v10101_v35  ;;  %v4117_v52 = vpop.f32.mrb[66].mxu1 }
 0x26e   : > { %5326 = vmatpush1.bf16.msra.mxu1 %v8463_v32  ;;  %5679 = vmatprep.subr.bf16.mxu0 %v8468_v8  ;;  %v8478_v32 = vld [vmem:[#allocation3 + $0x540] ss:$8 sps:$4 sm:$0xff]   ;;  %v4118_v8 = vpop.f32.mrb[67].mxu1  ;;  %v4556_v10 = vsel %vm1057_vm1, %v4551_v31, %v4555_v16  ;;  %v8499_v52 = vld [vmem:[#allocation3 + $0x490] ss:$8 sps:$4 sm:$0xff]  }
 0x26f   : > { %5327 = vmatprep.subr.bf16.mxu1 %v8471_v4  ;;  %v8486_v4 = vld [vmem:[#allocation3 + $0x554] ss:$8 sps:$4 sm:$0xff]   ;;  %v8502_v8 = vld [vmem:[#allocation3 + $0x580] ss:$8 sps:$4 sm:$0xff]   ;;  %v8508_v31 = vld [vmem:[#allocation3 + $0x590] ss:$8 sps:$4 sm:$0xff]  }
 0x270   : > { %5094 = vmatmul.mubr.bf16.gmra.mrb[100].mxu0 %v10230_v30  ;;  %v4564_v30 = vsel %vm1057_vm1, %v10288_v53, %v4563_v14  ;;  %v4873_v14 = vshll.u32 %v10256_v58, 16 }
 0x271   : > { %5680 = vmatpush1.bf16.msra.mxu0 %v8466_v20  ;;  %4782 = vmatmul.mubr.bf16.gmra.mrb[88].mxu1 %v4540_v2  ;;  %v4872_v20 = vrot.slane %v4870_v40, 7  ;;  %v8493_v2 = vld [vmem:[#allocation3 + $0x480] ss:$8 sps:$4 sm:$0xff]   ;;  %v8496_v40 = vld [vmem:[#allocation3 + $0x570] ss:$8 sps:$4 sm:$0xff]  }
 0x272   : > { %5101 = vmatprep.mubr.bf16.mxu0 %v10262_v3  ;;  %5328 = vmatpush1.bf16.msra.mxu1 %v8469_v61  ;;  %v8489_v61 = vld [vmem:[#allocation3 + $0x474] ss:$8 sps:$4 sm:$0xff]  }
 0x273   : > { %4789 = vmatprep.mubr.bf16.mxu1 %v4564_v30  ;;  %5681 = vmatprep.subr.bf16.mxu0 %v8474_v19  ;;  %v8487_v19 = vld [vmem:[#allocation3 + $0x470] ss:$8 sps:$4 sm:$0xff]   ;;  %v4875_v38 = vor.u32 %v4873_v14, %v4872_v20  ;;  %v8501_v30 = vld [vmem:[#allocation3 + $0x494] ss:$8 sps:$4 sm:$0xff]   ;;  %v8519_v20 = vld [vmem:[#allocation3 + $0x4c4] ss:$8 sps:$4 sm:$0xff]  }
 0x274   : > { %5329 = vmatprep.subr.bf16.mxu1 %v8477_v60  ;;  %v8498_v60 = vld [vmem:[#allocation3 + $0x574] ss:$8 sps:$4 sm:$0xff]  }
 0x275   : > { %5682 = vmatpush1.bf16.msra.mxu0 %v8472_v55  ;;  %v4876_v55 = vsel %vm4144_vm2, %v10242_v36, %v4875_v38  ;;  %v8507_v36 = vld [vmem:[#allocation3 + $0x4a4] ss:$8 sps:$4 sm:$0xff]   ;;  %v8525_v14 = vld [vmem:[#allocation3 + $0x4d4] ss:$8 sps:$4 sm:$0xff]  }
 0x276   : > { %5330 = vmatpush1.bf16.msra.mxu1 %v8475_v5  ;;  %5683 = vmatprep.subr.bf16.mxu0 %v8480_v47  ;;  %v8528_v38 = vld [vmem:[#allocation3 + $0x5c4] ss:$8 sps:$4 sm:$0xff]  }
 0x277   : > { %5331 = vmatprep.subr.bf16.mxu1 %v8483_v21 }
 0x278   : > { %5102 = vmatmul.mubr.bf16.gmra.mrb[104].mxu0 %v10267_v63  ;;  %v8490_v63 = vld [vmem:[#allocation3 + $0x560] ss:$8 sps:$4 sm:$0xff]  }
 0x279   : > { %5684 = vmatpush1.bf16.msra.mxu0 %v8478_v32  ;;  %4790 = vmatmul.mubr.bf16.gmra.mrb[92].mxu1 %v4556_v10  ;;  %v8504_v32 = vld [vmem:[#allocation3 + $0x584] ss:$8 sps:$4 sm:$0xff]   ;;  %v8514_v10 = vld [vmem:[#allocation3 + $0x5a0] ss:$8 sps:$4 sm:$0xff]  }
 0x27a   : > { %5109 = vmatprep.mubr.bf16.mxu0 %v10334_v49  ;;  %5332 = vmatpush1.bf16.msra.mxu1 %v8481_v41  ;;  %v8510_v41 = vld [vmem:[#allocation3 + $0x594] ss:$8 sps:$4 sm:$0xff]  }
 0x27b   : > { %5351 = vmatprep.mubr.bf16.mxu1 %v10157_v45  ;;  %5685 = vmatprep.subr.bf16.mxu0 %v8486_v4  ;;  %v8516_v4 = vld [vmem:[#allocation3 + $0x5a4] ss:$8 sps:$4 sm:$0xff]  }
 0x27c   : > { %5333 = vmatprep.subr.bf16.mxu1 %v8489_v61  ;;  %v8517_v61 = vld [vmem:[#allocation3 + $0x4c0] ss:$8 sps:$4 sm:$0xff]  }
 0x27d   : > { %5686 = vmatpush1.bf16.msra.mxu0 %v8484_v37  ;;  %v8522_v37 = vld [vmem:[#allocation3 + $0x5b4] ss:$8 sps:$4 sm:$0xff]  }
 0x27e   : > { %5334 = vmatpush1.bf16.msra.mxu1 %v8487_v19  ;;  %5687 = vmatprep.subr.bf16.mxu0 %v8492_v42  ;;  %v4419_v15 = vpop.f32.mrb[80].mxu0  ;;  %v8520_v19 = vld [vmem:[#allocation3 + $0x5b0] ss:$8 sps:$4 sm:$0xff]  }
 0x27f   : > { %5335 = vmatprep.subr.bf16.mxu1 %v8495_v28  ;;  %v10370_v5 = vadd.f32 %v4419_v15, %v4113_v33  ;;  %v4421_v47 = vpop.f32.mrb[81].mxu0  ;;  %v8505_v33 = vld [vmem:[#allocation3 + $0x4a0] ss:$8 sps:$4 sm:$0xff]   ;;  %v8523_v42 = vld [vmem:[#allocation3 + $0x4d0] ss:$8 sps:$4 sm:$0xff]  }
 0x280   : > { %5110 = vmatmul.mubr.bf16.gmra.mrb[108].mxu0 %v4876_v55  ;;  %v10372_v45 = vadd.f32 %v4421_v47, %v4115_v56  ;;  %v4423_v21 = vpop.f32.mrb[82].mxu0  ;;  %v8513_v56 = vld [vmem:[#allocation3 + $0x4b4] ss:$8 sps:$4 sm:$0xff]   ;;  %v8531_v28 = vld [vmem:[#allocation3 + $0x4e4] ss:$8 sps:$4 sm:$0xff]  }
 0x281   : > { %5688 = vmatpush1.bf16.msra.mxu0 %v8490_v63  ;;  %5707 = vmatprep.mubr.bf16.mxu0 %v10281_v50  ;;  %v4424_v16 = vpop.f32.mrb[83].mxu0  ;;  %v8511_v50 = vld [vmem:[#allocation3 + $0x4b0] ss:$8 sps:$4 sm:$0xff]   ;;  %v8526_v63 = vld [vmem:[#allocation3 + $0x5c0] ss:$8 sps:$4 sm:$0xff]  }
 0x282   : > { %5336 = vmatpush1.bf16.msra.mxu1 %v8493_v2  ;;  %5689 = vmatprep.subr.bf16.mxu0 %v8498_v60  ;;  %v8529_v2 = vld [vmem:[#allocation3 + $0x4e0] ss:$8 sps:$4 sm:$0xff]   ;;  %v8534_v60 = vld [vmem:[#allocation3 + $0x5d4] ss:$8 sps:$4 sm:$0xff]   ;;  %v8532_v55 = vld [vmem:[#allocation3 + $0x5d0] ss:$8 sps:$4 sm:$0xff]  }
 0x283   : > { %5337 = vmatprep.subr.bf16.mxu1 %v8501_v30  ;;  %v8537_v15 = vld [vmem:[#allocation3 + $0x4f4] ss:$8 sps:$4 sm:$0xff]   ;;  %v8535_v30 = vld [vmem:[#allocation3 + $0x4f0] ss:$8 sps:$4 sm:$0xff]   ;;  %v8540_v47 = vld [vmem:[#allocation3 + $0x5e4] ss:$8 sps:$4 sm:$0xff]  }
 0x284   : > { %v5392_v21 = vld [vmem:[#allocation2 + $0x20] sm:$0xff] }
 0x285   : > { %5690 = vmatpush1.bf16.msra.mxu0 %v8496_v40  ;;  %v8543_v40 = vld [vmem:[#allocation3 + $0x604] ss:$8 sps:$4 sm:$0xff]   ;;  %v8538_v16 = vld [vmem:[#allocation3 + $0x5e0] ss:$8 sps:$4 sm:$0xff]  }
 0x286   : > { %5338 = vmatpush1.bf16.msra.mxu1 %v8499_v52  ;;  %5691 = vmatprep.subr.bf16.mxu0 %v8504_v32  ;;  %v5438_v52 = vshll.u32 %v5392_v21, 16  ;;  %v8541_v32 = vld [vmem:[#allocation3 + $0x600] ss:$8 sps:$4 sm:$0xff]  }
 0x287   : > { %5339 = vmatprep.subr.bf16.mxu1 %v8507_v36  ;;  %v8546_v36 = vld [vmem:[#allocation3 + $0x5f4] ss:$8 sps:$4 sm:$0xff]  }
 0x289   : > { %5692 = vmatpush1.bf16.msra.mxu0 %v8502_v8  ;;  %v8549_v8 = vld [vmem:[#allocation3 + $0x614] ss:$8 sps:$4 sm:$0xff]  }
 0x28a   : > { %5340 = vmatpush1.bf16.msra.mxu1 %v8505_v33  ;;  %5693 = vmatprep.subr.bf16.mxu0 %v8510_v41  ;;  %v8544_v33 = vld [vmem:[#allocation3 + $0x5f0] ss:$8 sps:$4 sm:$0xff]   ;;  %v5440_v41 = vrot.slane %v5438_v52, 1 }
 0x28b   : > { %5341 = vmatprep.subr.bf16.mxu1 %v8513_v56  ;;  %v8547_v56 = vld [vmem:[#allocation3 + $0x610] ss:$8 sps:$4 sm:$0xff]  }
 0x28d   : > { %5694 = vmatpush1.bf16.msra.mxu0 %v8508_v31  ;;  %v8552_v31 = vld [vmem:[#allocation3 + $0x704] ss:$8 sps:$4 sm:$0xff]  }
 0x28e   : > { %5342 = vmatpush1.bf16.msra.mxu1 %v8511_v50  ;;  %5695 = vmatprep.subr.bf16.mxu0 %v8516_v4  ;;  %v5436_v50 = vshrl.u32 %v5392_v21, 16  ;;  %v8555_v4 = vld [vmem:[#allocation3 + $0x624] ss:$8 sps:$4 sm:$0xff]   ;;  %v5475_v21 = vshrl.u32 %v10300_v51, 16 }
 0x28f   : > { %5343 = vmatprep.subr.bf16.mxu1 %v8519_v20 }
 0x290   : > { %v5441_v20 = vor.u32 %v5440_v41, %v5436_v50  ;;  %v8577_v41 = vld [vmem:[#allocation3 + $0x660] ss:$8 sps:$4 sm:$0xff]  }
 0x291   : > { %5696 = vmatpush1.bf16.msra.mxu0 %v8514_v10  ;;  %v8550_v10 = vld [vmem:[#allocation3 + $0x700] ss:$8 sps:$4 sm:$0xff]  }
 0x292   : > { %5344 = vmatpush1.bf16.msra.mxu1 %v8517_v61  ;;  %5697 = vmatprep.subr.bf16.mxu0 %v8522_v37  ;;  %v8553_v61 = vld [vmem:[#allocation3 + $0x620] ss:$8 sps:$4 sm:$0xff]   ;;  %v8558_v37 = vld [vmem:[#allocation3 + $0x714] ss:$8 sps:$4 sm:$0xff]  }
 0x293   : > { %5345 = vmatprep.subr.bf16.mxu1 %v8525_v14  ;;  %v8561_v14 = vld [vmem:[#allocation3 + $0x634] ss:$8 sps:$4 sm:$0xff]  }
 0x295   : > { %5698 = vmatpush1.bf16.msra.mxu0 %v8520_v19  ;;  %v8556_v19 = vld [vmem:[#allocation3 + $0x710] ss:$8 sps:$4 sm:$0xff]  }
 0x296   : > { %5346 = vmatpush1.bf16.msra.mxu1 %v8523_v42  ;;  %5699 = vmatprep.subr.bf16.mxu0 %v8528_v38  ;;  %v8559_v42 = vld [vmem:[#allocation3 + $0x630] ss:$8 sps:$4 sm:$0xff]   ;;  %v8564_v38 = vld [vmem:[#allocation3 + $0x724] ss:$8 sps:$4 sm:$0xff]  }
 0x297   : > { %5347 = vmatprep.subr.bf16.mxu1 %v8531_v28  ;;  %v8567_v28 = vld [vmem:[#allocation3 + $0x644] ss:$8 sps:$4 sm:$0xff]  }
 0x299   : > { %5700 = vmatpush1.bf16.msra.mxu0 %v8526_v63  ;;  %v5401_v63 = vld [vmem:[#allocation2 + $0x68] sm:$0x1] }
 0x29a   : > { %5348 = vmatpush1.bf16.msra.mxu1 %v8529_v2  ;;  %5701 = vmatprep.subr.bf16.mxu0 %v8534_v60  ;;  %v8562_v2 = vld [vmem:[#allocation3 + $0x720] ss:$8 sps:$4 sm:$0xff]  }
 0x29b   : > { %5349 = vmatprep.subr.bf16.mxu1 %v8537_v15  ;;  %v8573_v15 = vld [vmem:[#allocation3 + $0x654] ss:$8 sps:$4 sm:$0xff]  }
 0x29d   : > { %5702 = vmatpush1.bf16.msra.mxu0 %v8532_v55  ;;  %v5503_v55 = vshll.u32 %v5401_v63, 16  ;;  %v8598_v63 = vld [vmem:[#allocation3 + $0x780] ss:$8 sps:$4 sm:$0xff]  }
 0x29e   : > { %5350 = vmatpush1.bf16.msra.mxu1 %v8535_v30  ;;  %5703 = vmatprep.subr.bf16.mxu0 %v8540_v47  ;;  %v5749_v30 = vld [vmem:[#allocation2 + $0x28] sm:$0x80]  ;;  %v8571_v47 = vld [vmem:[#allocation3 + $0x650] ss:$8 sps:$4 sm:$0xff]  }
 0x29f   : > { %5995 = vmatprep.subr.bf16.mxu1 %v8543_v40  ;;  %v8576_v40 = vld [vmem:[#allocation3 + $0x744] ss:$8 sps:$4 sm:$0xff]   ;;  %v5505_v52 = vrot.slane %v5503_v55, 1  ;;  %v8610_v55 = vld [vmem:[#allocation3 + $0x7a0] ss:$8 sps:$4 sm:$0xff]  }
 0x2a1   : > { %5352 = vmatmul.mubr.bf16.vlgmr.msra.gmra.mrb[96].mxu1 %v10154_v59  ;;  %5704 = vmatpush1.bf16.msra.mxu0 %v8538_v16  ;;  %v5446_v59 = vsel %vm1057_vm1, %v5441_v20, %v10323_v9  ;;  %v5489_v9 = vrot.slane %v4881_v7, 1  ;;  %v8568_v7 = vld [vmem:[#allocation3 + $0x730] ss:$8 sps:$4 sm:$0xff]   ;;  %v5793_v16 = vshrl.u32 %v5749_v30, 16  ;;  %v8613_v30 = vld [vmem:[#allocation3 + $0x6c0] ss:$8 sps:$4 sm:$0xff]  }
 0x2a2   : > { %5359 = vmatprep.mubr.bf16.mxu1 %v10188_v12  ;;  %5996 = vmatpush1.bf16.msra.mxu1 %v8541_v32  ;;  %v8579_v32 = vld [vmem:[#allocation3 + $0x664] ss:$8 sps:$4 sm:$0xff]   ;;  %v8583_v20 = vld [vmem:[#allocation3 + $0x670] ss:$8 sps:$4 sm:$0xff]  }
 0x2a3   : > { %5705 = vmatprep.subr.bf16.mxu0 %v8546_v36  ;;  %5997 = vmatprep.subr.bf16.mxu1 %v8549_v8  ;;  %v5490_v60 = vsel %vm1057_vm1, %v10288_v53, %v5489_v9  ;;  %v5501_v53 = vor.u32 %v5489_v9, %v4878_v25  ;;  %v5400_v36 = vld [vmem:[#allocation2 + $0x60] sm:$0x1]  ;;  %v8600_v9 = vld [vmem:[#allocation3 + $0x784] ss:$8 sps:$4 sm:$0xff]  }
 0x2a4   : > { %v8574_v8 = vld [vmem:[#allocation3 + $0x740] ss:$8 sps:$4 sm:$0xff]   ;;  %v5495_v50 = vshll.u32 %v5400_v36, 16 }
 0x2a5   : > { %5706 = vmatpush1.bf16.msra.mxu0 %v8544_v33  ;;  %v5506_v25 = vsel %vm1057_vm1, %v5501_v53, %v5505_v52  ;;  %v8624_v53 = vld [vmem:[#allocation3 + $0x7c4] ss:$8 sps:$4 sm:$0xff]   ;;  %v8625_v36 = vld [vmem:[#allocation3 + $0x6e0] ss:$8 sps:$4 sm:$0xff]  }
 0x2a6   : > { %5998 = vmatpush1.bf16.msra.mxu1 %v8547_v56  ;;  %6261 = vmatprep.subr.bf16.mxu0 %v8552_v31  ;;  %v5795_v56 = vrot.slane %v5793_v16, 7  ;;  %v8582_v31 = vld [vmem:[#allocation3 + $0x754] ss:$8 sps:$4 sm:$0xff]   ;;  %v8619_v16 = vld [vmem:[#allocation3 + $0x6d0] ss:$8 sps:$4 sm:$0xff]  }
 0x2a7   : > { %5999 = vmatprep.subr.bf16.mxu1 %v8555_v4  ;;  %v8585_v4 = vld [vmem:[#allocation3 + $0x674] ss:$8 sps:$4 sm:$0xff]   ;;  %v8627_v52 = vld [vmem:[#allocation3 + $0x6e4] ss:$8 sps:$4 sm:$0xff]  }
 0x2a8   : > { %5708 = vmatmul.mubr.bf16.vlgmr.msra.gmra.mrb[112].mxu0 %v5446_v59  ;;  %v8588_v59 = vld [vmem:[#allocation3 + $0x764] ss:$8 sps:$4 sm:$0xff]  }
 0x2a9   : > { %5360 = vmatmul.mubr.bf16.gmra.mrb[100].mxu1 %v10185_v43  ;;  %5715 = vmatprep.mubr.bf16.mxu0 %v10286_v46  ;;  %v8565_v43 = vld [vmem:[#allocation3 + $0x640] ss:$8 sps:$4 sm:$0xff]   ;;  %v8570_v46 = vld [vmem:[#allocation3 + $0x734] ss:$8 sps:$4 sm:$0xff]  }
 0x2aa   : > { %6262 = vmatpush1.bf16.msra.mxu0 %v8550_v10  ;;  %5367 = vmatprep.mubr.bf16.mxu1 %v10220_v11  ;;  %v5497_v10 = vrot.slane %v5495_v50, 1  ;;  %v8631_v50 = vld [vmem:[#allocation3 + $0x6f0] ss:$8 sps:$4 sm:$0xff]  }
 0x2ab   : > { %6000 = vmatpush1.bf16.msra.mxu1 %v8553_v61  ;;  %6263 = vmatprep.subr.bf16.mxu0 %v8558_v37  ;;  %v8591_v61 = vld [vmem:[#allocation3 + $0x684] ss:$8 sps:$4 sm:$0xff]   ;;  %v8586_v37 = vld [vmem:[#allocation3 + $0x760] ss:$8 sps:$4 sm:$0xff]  }
 0x2ac   : > { %6001 = vmatprep.subr.bf16.mxu1 %v8561_v14  ;;  %v8589_v14 = vld [vmem:[#allocation3 + $0x680] ss:$8 sps:$4 sm:$0xff]  }
 0x2ae   : > { %6264 = vmatpush1.bf16.msra.mxu0 %v8556_v19  ;;  %v8594_v19 = vld [vmem:[#allocation3 + $0x774] ss:$8 sps:$4 sm:$0xff]  }
 0x2af   : > { %6002 = vmatpush1.bf16.msra.mxu1 %v8559_v42  ;;  %6265 = vmatprep.subr.bf16.mxu0 %v8564_v38  ;;  %v8592_v42 = vld [vmem:[#allocation3 + $0x770] ss:$8 sps:$4 sm:$0xff]  }
 0x2b0   : > { %5716 = vmatmul.mubr.bf16.gmra.mrb[116].mxu0 %v10355_v18  ;;  %6003 = vmatprep.subr.bf16.mxu1 %v8567_v28  ;;  %v8595_v38 = vld [vmem:[#allocation3 + $0x690] ss:$8 sps:$4 sm:$0xff]   ;;  %v8603_v28 = vld [vmem:[#allocation3 + $0x6a4] ss:$8 sps:$4 sm:$0xff]  }
 0x2b1   : > { %5368 = vmatmul.mubr.bf16.gmra.mrb[104].mxu1 %v10217_v26  ;;  %5723 = vmatprep.mubr.bf16.mxu0 %v5490_v60  ;;  %v5477_v26 = vor.u32 %v5475_v21, %v10339_v44  ;;  %v5798_v44 = vsel %vm4144_vm2, %v5795_v56, %v10214_v24  ;;  %v8597_v24 = vld [vmem:[#allocation3 + $0x694] ss:$8 sps:$4 sm:$0xff]   ;;  %v8612_v60 = vld [vmem:[#allocation3 + $0x7a4] ss:$8 sps:$4 sm:$0xff]   ;;  %v5789_v56 = vrot.slane %v5459_v13, 7 }
 0x2b2   : > { %6266 = vmatpush1.bf16.msra.mxu0 %v8562_v2  ;;  %5375 = vmatprep.mubr.bf16.mxu1 %v10259_v48  ;;  %v8606_v2 = vld [vmem:[#allocation3 + $0x794] ss:$8 sps:$4 sm:$0xff]  }
 0x2b3   : > { %6004 = vmatpush1.bf16.msra.mxu1 %v8565_v43  ;;  %6267 = vmatprep.subr.bf16.mxu0 %v8570_v46  ;;  %v10397_v33 = vsel %vm1057_vm1, %v5477_v26, %v10313_v6  ;;  %v8580_v6 = vld [vmem:[#allocation3 + $0x750] ss:$8 sps:$4 sm:$0xff]   ;;  %v8609_v43 = vld [vmem:[#allocation3 + $0x6b4] ss:$8 sps:$4 sm:$0xff]  }
 0x2b4   : > { %6005 = vmatprep.subr.bf16.mxu1 %v8573_v15  ;;  %v8604_v46 = vld [vmem:[#allocation3 + $0x790] ss:$8 sps:$4 sm:$0xff]   ;;  %v8615_v15 = vld [vmem:[#allocation3 + $0x6c4] ss:$8 sps:$4 sm:$0xff]   ;;  %v8630_v26 = vld [vmem:[#allocation3 + $0x7d4] ss:$8 sps:$4 sm:$0xff]  }
 0x2b5   : > { %v8642_v13 = vld [vmem:[#allocation3 + $0x7f4] ss:$8 sps:$4 sm:$0xff]  }
 0x2b6   : > { %6268 = vmatpush1.bf16.msra.mxu0 %v8568_v7  ;;  %v8618_v7 = vld [vmem:[#allocation3 + $0x7b4] ss:$8 sps:$4 sm:$0xff]  }
 0x2b7   : > { %6006 = vmatpush1.bf16.msra.mxu1 %v8571_v47  ;;  %6269 = vmatprep.subr.bf16.mxu0 %v8576_v40  ;;  %v8621_v47 = vld [vmem:[#allocation3 + $0x6d4] ss:$8 sps:$4 sm:$0xff]   ;;  %v8616_v40 = vld [vmem:[#allocation3 + $0x7b0] ss:$8 sps:$4 sm:$0xff]  }
 0x2b8   : > { %5724 = vmatmul.mubr.bf16.gmra.mrb[120].mxu0 %v10397_v33  ;;  %6007 = vmatprep.subr.bf16.mxu1 %v8579_v32  ;;  %v8622_v32 = vld [vmem:[#allocation3 + $0x7c0] ss:$8 sps:$4 sm:$0xff]  }
 0x2b9   : > { %5376 = vmatmul.mubr.bf16.gmra.mrb[108].mxu1 %v10256_v58  ;;  %5731 = vmatprep.mubr.bf16.mxu0 %v5506_v25  ;;  %v5498_v58 = vsel %vm1057_vm1, %v10330_v62, %v5497_v10  ;;  %v8601_v62 = vld [vmem:[#allocation3 + $0x6a0] ss:$8 sps:$4 sm:$0xff]   ;;  %v8636_v25 = vld [vmem:[#allocation3 + $0x7e4] ss:$8 sps:$4 sm:$0xff]  }
 0x2ba   : > { %6270 = vmatpush1.bf16.msra.mxu0 %v8574_v8  ;;  %6027 = vmatprep.mubr.bf16.mxu1 %v5798_v44  ;;  %v8633_v8 = vld [vmem:[#allocation3 + $0x6f4] ss:$8 sps:$4 sm:$0xff]   ;;  %v8639_v44 = vld [vmem:[#allocation3 + $0x804] ss:$8 sps:$4 sm:$0xff]  }
 0x2bb   : > { %6008 = vmatpush1.bf16.msra.mxu1 %v8577_v41  ;;  %6271 = vmatprep.subr.bf16.mxu0 %v8582_v31  ;;  %v5748_v41 = vld [vmem:[#allocation2 + $0x20] sm:$0x80]  ;;  %v8628_v31 = vld [vmem:[#allocation3 + $0x7d0] ss:$8 sps:$4 sm:$0xff]  }
 0x2bc   : > { %6009 = vmatprep.subr.bf16.mxu1 %v8585_v4  ;;  %v5786_v4 = vshrl.u32 %v5748_v41, 16  ;;  %v8673_v41 = vld [vmem:[#allocation3 + $0x8b0] ss:$8 sps:$4 sm:$0xff]  }
 0x2be   : > { %6272 = vmatpush1.bf16.msra.mxu0 %v8580_v6  ;;  %v5790_v6 = vor.u32 %v5789_v56, %v5443_v54  ;;  %v5788_v10 = vrot.slane %v5786_v4, 7  ;;  %v8643_v54 = vld [vmem:[#allocation3 + $0x810] ss:$8 sps:$4 sm:$0xff]   ;;  %v8684_v4 = vld [vmem:[#allocation3 + $0x8e4] ss:$8 sps:$4 sm:$0xff]  }
 0x2bf   : > { %6010 = vmatpush1.bf16.msra.mxu1 %v8583_v20  ;;  %6273 = vmatprep.subr.bf16.mxu0 %v8588_v59  ;;  %v8634_v20 = vld [vmem:[#allocation3 + $0x7e0] ss:$8 sps:$4 sm:$0xff]  }
 0x2c0   : > { %5732 = vmatmul.mubr.bf16.gmra.mrb[124].mxu0 %v5498_v58  ;;  %6011 = vmatprep.subr.bf16.mxu1 %v8591_v61  ;;  %v8637_v59 = vld [vmem:[#allocation3 + $0x800] ss:$8 sps:$4 sm:$0xff]   ;;  %v8645_v61 = vld [vmem:[#allocation3 + $0x814] ss:$8 sps:$4 sm:$0xff]   ;;  %v5799_v58 = vrot.slane %v5475_v21, 7 }
 0x2c1   : > { %6293 = vmatprep.mubr.bf16.mxu0 %v10188_v12  ;;  %v8607_v12 = vld [vmem:[#allocation3 + $0x6b0] ss:$8 sps:$4 sm:$0xff]   ;;  %v8646_v21 = vld [vmem:[#allocation3 + $0x820] ss:$8 sps:$4 sm:$0xff]  }
 0x2c2   : > { %6274 = vmatpush1.bf16.msra.mxu0 %v8586_v37  ;;  %v5791_v37 = vsel %vm4144_vm2, %v5788_v10, %v5790_v6  ;;  %v6339_v6 = vld [vmem:[#allocation2 + $0x58] sm:$0xff] }
 0x2c3   : > { %6012 = vmatpush1.bf16.msra.mxu1 %v8589_v14  ;;  %6275 = vmatprep.subr.bf16.mxu0 %v8594_v19  ;;  %v8640_v14 = vld [vmem:[#allocation3 + $0x7f0] ss:$8 sps:$4 sm:$0xff]   ;;  %v8648_v19 = vld [vmem:[#allocation3 + $0x824] ss:$8 sps:$4 sm:$0xff]   ;;  %v6413_v10 = vshll.u32 %v6339_v6, 16 }
 0x2c4   : > { %6013 = vmatprep.subr.bf16.mxu1 %v8597_v24  ;;  %v5800_v24 = vor.u32 %v5799_v58, %v5463_v0 }
 0x2c6   : > { %6276 = vmatpush1.bf16.msra.mxu0 %v8592_v42  ;;  %v10417_v42 = vld [vmem:[#allocation2 + $0x18] sm:$0xff] }
 0x2c7   : > { %6014 = vmatpush1.bf16.msra.mxu1 %v8595_v38  ;;  %6277 = vmatprep.subr.bf16.mxu0 %v8600_v9  ;;  %v5820_v38 = vshrl.u32 %v10417_v42, 16  ;;  %v8651_v9 = vld [vmem:[#allocation3 + $0x834] ss:$8 sps:$4 sm:$0xff]  }
 0x2c8   : > { %6015 = vmatprep.subr.bf16.mxu1 %v8603_v28  ;;  %v5805_v28 = vrot.slane %v5491_v34, 7  ;;  %v8657_v34 = vld [vmem:[#allocation3 + $0x854] ss:$8 sps:$4 sm:$0xff]  }
 0x2c9   : > { %v5822_v0 = vrot.slane %v5820_v38, 7 }
 0x2ca   : > { %6278 = vmatpush1.bf16.msra.mxu0 %v8598_v63  ;;  %v8649_v63 = vld [vmem:[#allocation3 + $0x830] ss:$8 sps:$4 sm:$0xff]  }
 0x2cb   : > { %6016 = vmatpush1.bf16.msra.mxu1 %v8601_v62  ;;  %6279 = vmatprep.subr.bf16.mxu0 %v8606_v2  ;;  %v8654_v62 = vld [vmem:[#allocation3 + $0x844] ss:$8 sps:$4 sm:$0xff]   ;;  %v6335_v2 = vld [vmem:[#allocation2 + $0x38] sm:$0xff] }
 0x2cc   : > { %6017 = vmatprep.subr.bf16.mxu1 %v8609_v43  ;;  %v8652_v43 = vld [vmem:[#allocation3 + $0x840] ss:$8 sps:$4 sm:$0xff]  }
 0x2ce   : > { %6280 = vmatpush1.bf16.msra.mxu0 %v8604_v46  ;;  %v10430_v46 = vld [vmem:[#allocation2 + $0x48] sm:$0xff] }
 0x2cf   : > { %6018 = vmatpush1.bf16.msra.mxu1 %v8607_v12  ;;  %6281 = vmatprep.subr.bf16.mxu0 %v8612_v60  ;;  %v8655_v60 = vld [vmem:[#allocation3 + $0x850] ss:$8 sps:$4 sm:$0xff]  }
 0x2d0   : > { %6019 = vmatprep.subr.bf16.mxu1 %v8615_v15  ;;  %v8660_v15 = vld [vmem:[#allocation3 + $0x864] ss:$8 sps:$4 sm:$0xff]  }
 0x2d2   : > { %6282 = vmatpush1.bf16.msra.mxu0 %v8610_v55 }
 0x2d3   : > { %6020 = vmatpush1.bf16.msra.mxu1 %v8613_v30  ;;  %6283 = vmatprep.subr.bf16.mxu0 %v8618_v7  ;;  %v6390_v30 = vshrl.u32 %v6335_v2, 16 }
 0x2d4   : > { %6021 = vmatprep.subr.bf16.mxu1 %v8621_v47 }
 0x2d6   : > { %6284 = vmatpush1.bf16.msra.mxu0 %v8616_v40  ;;  %v8663_v40 = vld [vmem:[#allocation3 + $0x874] ss:$8 sps:$4 sm:$0xff]  }
 0x2d7   : > { %6022 = vmatpush1.bf16.msra.mxu1 %v8619_v16  ;;  %6285 = vmatprep.subr.bf16.mxu0 %v8624_v53  ;;  %v8661_v16 = vld [vmem:[#allocation3 + $0x870] ss:$8 sps:$4 sm:$0xff]   ;;  %v8666_v53 = vld [vmem:[#allocation3 + $0x884] ss:$8 sps:$4 sm:$0xff]  }
 0x2d8   : > { %6023 = vmatprep.subr.bf16.mxu1 %v8627_v52  ;;  %v8664_v52 = vld [vmem:[#allocation3 + $0x880] ss:$8 sps:$4 sm:$0xff]  }
 0x2da   : > { %6286 = vmatpush1.bf16.msra.mxu0 %v8622_v32  ;;  %v8669_v32 = vld [vmem:[#allocation3 + $0x894] ss:$8 sps:$4 sm:$0xff]  }
 0x2db   : > { %6024 = vmatpush1.bf16.msra.mxu1 %v8625_v36  ;;  %6287 = vmatprep.subr.bf16.mxu0 %v8630_v26  ;;  %v8672_v36 = vld [vmem:[#allocation3 + $0x8a4] ss:$8 sps:$4 sm:$0xff]   ;;  %v8670_v26 = vld [vmem:[#allocation3 + $0x8a0] ss:$8 sps:$4 sm:$0xff]  }
 0x2dc   : > { %6025 = vmatprep.subr.bf16.mxu1 %v8633_v8  ;;  %v8675_v8 = vld [vmem:[#allocation3 + $0x8b4] ss:$8 sps:$4 sm:$0xff]  }
 0x2de   : > { %6288 = vmatpush1.bf16.msra.mxu0 %v8628_v31  ;;  %v8676_v31 = vld [vmem:[#allocation3 + $0x8c0] ss:$8 sps:$4 sm:$0xff]  }
 0x2df   : > { %6026 = vmatpush1.bf16.msra.mxu1 %v8631_v50  ;;  %6289 = vmatprep.subr.bf16.mxu0 %v8636_v25  ;;  %v8681_v50 = vld [vmem:[#allocation3 + $0x8d4] ss:$8 sps:$4 sm:$0xff]   ;;  %v8679_v25 = vld [vmem:[#allocation3 + $0x8d0] ss:$8 sps:$4 sm:$0xff]  }
 0x2e0   : > { %6617 = vmatprep.subr.bf16.mxu1 %v8639_v44  ;;  %v8682_v44 = vld [vmem:[#allocation3 + $0x8e0] ss:$8 sps:$4 sm:$0xff]  }
 0x2e2   : > { %6028 = vmatmul.mubr.bf16.vlgmr.msra.gmra.mrb[112].mxu1 %v5791_v37  ;;  %6290 = vmatpush1.bf16.msra.mxu0 %v8634_v20  ;;  %v8687_v20 = vld [vmem:[#allocation3 + $0x8f4] ss:$8 sps:$4 sm:$0xff]  }
 0x2e3   : > { %6035 = vmatprep.mubr.bf16.mxu1 %v10262_v3  ;;  %6618 = vmatpush1.bf16.msra.mxu1 %v8637_v59  ;;  %v5801_v3 = vsel %vm4144_vm2, %v5789_v56, %v5800_v24  ;;  %v8678_v56 = vld [vmem:[#allocation3 + $0x8c4] ss:$8 sps:$4 sm:$0xff]   ;;  %v8685_v59 = vld [vmem:[#allocation3 + $0x8f0] ss:$8 sps:$4 sm:$0xff]  }
 0x2e4   : > { %6291 = vmatprep.subr.bf16.mxu0 %v8642_v13  ;;  %6619 = vmatprep.subr.bf16.mxu1 %v8645_v61 }
 0x2e6   : > { %6292 = vmatpush1.bf16.msra.mxu0 %v8640_v14  ;;  %v6415_v14 = vrot.slane %v6413_v10, 1 }
 0x2e7   : > { %6620 = vmatpush1.bf16.msra.mxu1 %v8643_v54 }
 0x2e8   : > { %6621 = vmatprep.subr.bf16.mxu1 %v8648_v19 }
 0x2e9   : > { %6294 = vmatmul.mubr.bf16.vlgmr.msra.gmra.mrb[128].mxu0 %v10292_v57  ;;  %v5806_v57 = vor.u32 %v5805_v28, %v5479_v22  ;;  %v6397_v22 = vshll.u32 %v10430_v46, 16 }
 0x2ea   : > { %6036 = vmatmul.mubr.bf16.gmra.mrb[116].mxu1 %v5801_v3  ;;  %6301 = vmatprep.mubr.bf16.mxu0 %v10220_v11  ;;  %v6392_v11 = vshll.u32 %v6335_v2, 16  ;;  %v6343_v2 = vld [vmem:[#allocation2 + $0x78] sm:$0x1] }
 0x2eb   : > { %6043 = vmatprep.mubr.bf16.mxu1 %v10334_v49  ;;  %6622 = vmatpush1.bf16.msra.mxu1 %v8646_v21  ;;  %v5807_v12 = vsel %vm4144_vm2, %v5799_v58, %v5806_v57  ;;  %v5826_v49 = vsel %vm4144_vm2, %v10298_v27, %v5822_v0  ;;  %v6399_v7 = vrot.slane %v6397_v22, 1  ;;  %v6409_v58 = vshrl.u32 %v10430_v46, 16 }
 0x2ec   : > { %6623 = vmatprep.subr.bf16.mxu1 %v8651_v9  ;;  %v6394_v55 = vrot.slane %v6392_v11, 1 }
 0x2ed   : > { %v6411_v19 = vor.u32 %v6409_v58, %v6399_v7 }
 0x2ee   : > { %v6395_v47 = vor.u32 %v6394_v55, %v6390_v30  ;;  %v6443_v55 = vor.u32 %v5820_v38, %v10101_v35 }
 0x2ef   : > { %6624 = vmatpush1.bf16.msra.mxu1 %v8649_v63  ;;  %v6416_v24 = vsel %vm1057_vm1, %v6411_v19, %v6415_v14 }
 0x2f0   : > { %6625 = vmatprep.subr.bf16.mxu1 %v8654_v62  ;;  %v6400_v27 = vsel %vm1057_vm1, %v6395_v47, %v6399_v7  ;;  %v6342_v7 = vld [vmem:[#allocation2 + $0x70] sm:$0x1] }
 0x2f1   : > { %6302 = vmatmul.mubr.bf16.gmra.mrb[132].mxu0 %v10300_v51  ;;  %v8658_v51 = vld [vmem:[#allocation3 + $0x860] ss:$8 sps:$4 sm:$0xff]  }
 0x2f2   : > { %6044 = vmatmul.mubr.bf16.gmra.mrb[120].mxu1 %v5807_v12  ;;  %6309 = vmatprep.mubr.bf16.mxu0 %v10259_v48  ;;  %v5818_v48 = vsel %vm4144_vm2, %v5805_v28, %v5822_v0  ;;  %v6425_v0 = vshrl.u32 %v6339_v6, 16  ;;  %v6445_v12 = vshll.u32 %v6343_v2, 16 }
 0x2f3   : > { %6051 = vmatprep.mubr.bf16.mxu1 %v5826_v49  ;;  %6626 = vmatpush1.bf16.msra.mxu1 %v8652_v43 }
 0x2f4   : > { %6627 = vmatprep.subr.bf16.mxu1 %v8657_v34  ;;  %v6427_v34 = vor.u32 %v6425_v0, %v6415_v14  ;;  %v6447_v30 = vrot.slane %v6445_v12, 1 }
 0x2f7   : > { %6628 = vmatpush1.bf16.msra.mxu1 %v8655_v60 }
 0x2f8   : > { %6629 = vmatprep.subr.bf16.mxu1 %v8660_v15 }
 0x2f9   : > { %6310 = vmatmul.mubr.bf16.gmra.mrb[136].mxu0 %v10302_v29  ;;  %v8667_v29 = vld [vmem:[#allocation3 + $0x890] ss:$8 sps:$4 sm:$0xff]  }
 0x2fa   : > { %6052 = vmatmul.mubr.bf16.gmra.mrb[124].mxu1 %v5818_v48  ;;  %6317 = vmatprep.mubr.bf16.mxu0 %v10417_v42 }
 0x2fb   : > { %6630 = vmatpush1.bf16.msra.mxu1 %v8658_v51  ;;  %6649 = vmatprep.mubr.bf16.mxu1 %v6400_v27 }
 0x2fc   : > { %6631 = vmatprep.subr.bf16.mxu1 %v8663_v40 }
 0x2ff   : > { %6632 = vmatpush1.bf16.msra.mxu1 %v8661_v16  ;;  %v6437_v16 = vshll.u32 %v6342_v7, 16 }
 0x300   : > { %6633 = vmatprep.subr.bf16.mxu1 %v8666_v53  ;;  %v6448_v53 = vsel %vm1057_vm1, %v6443_v55, %v6447_v30 }
 0x301   : > { %6318 = vmatmul.mubr.bf16.gmra.mrb[140].mxu0 %v10417_v42 }
 0x303   : > { %6634 = vmatpush1.bf16.msra.mxu1 %v8664_v52 }
 0x304   : > { %6635 = vmatprep.subr.bf16.mxu1 %v8669_v32  ;;  %v6439_v32 = vrot.slane %v6437_v16, 1 }
 0x307   : > { %6636 = vmatpush1.bf16.msra.mxu1 %v8667_v29 }
 0x308   : > { %6637 = vmatprep.subr.bf16.mxu1 %v8672_v36 }
 0x30b   : > { %6638 = vmatpush1.bf16.msra.mxu1 %v8670_v26 }
 0x30c   : > { %6639 = vmatprep.subr.bf16.mxu1 %v8675_v8 }
 0x30f   : > { %6640 = vmatpush1.bf16.msra.mxu1 %v8673_v41 }
 0x310   : > { %6641 = vmatprep.subr.bf16.mxu1 %v8678_v56 }
 0x313   : > { %6642 = vmatpush1.bf16.msra.mxu1 %v8676_v31 }
 0x314   : > { %6643 = vmatprep.subr.bf16.mxu1 %v8681_v50 }
 0x317   : > { %6644 = vmatpush1.bf16.msra.mxu1 %v8679_v25  ;;  %v6440_v25 = vsel %vm1057_vm1, %v6443_v55, %v6439_v32 }
 0x318   : > { %6645 = vmatprep.subr.bf16.mxu1 %v8684_v4 }
 0x31b   : > { %6646 = vmatpush1.bf16.msra.mxu1 %v8682_v44 }
 0x31c   : > { %v4121_v13 = vpop.f32.mrb[68].mxu1  ;;  %6647 = vmatprep.subr.bf16.mxu1 %v8687_v20 }
 0x31d   : > { %v4123_v61 = vpop.f32.mrb[69].mxu1 }
 0x31e   : > { %v4125_v37 = vpop.f32.mrb[70].mxu1 }
 0x31f   : > { %6648 = vmatpush1.bf16.msra.mxu1 %v8685_v59  ;;  %v4126_v54 = vpop.f32.mrb[71].mxu1 }
 0x322   : > { %6650 = vmatmul.mubr.bf16.vlgmr.msra.gmra.mrb[128].mxu1 %v10355_v18  ;;  %v6432_v18 = vsel %vm1057_vm1, %v6427_v34, %v10101_v35 }
 0x323   : > { %6657 = vmatprep.mubr.bf16.mxu1 %v6416_v24  ;;  %v4427_v21 = vpop.f32.mrb[84].mxu0 }
 0x324   : > { %v4428_v9 = vadd.f32 %v4427_v21, %v4121_v13  ;;  %v4129_v3 = vpop.f32.mrb[72].mxu1  ;;  %v4429_v28 = vpop.f32.mrb[85].mxu0 }
 0x325   : > { %v4430_v63 = vadd.f32 %v4429_v28, %v4123_v61  ;;  %v4131_v62 = vpop.f32.mrb[73].mxu1  ;;  %v4431_v57 = vpop.f32.mrb[86].mxu0 }
 0x326   : > { %v4133_v43 = vpop.f32.mrb[74].mxu1  ;;  %v4432_v46 = vpop.f32.mrb[87].mxu0 }
 0x327   : > { %v4134_v11 = vpop.f32.mrb[75].mxu1 }
 0x32a   : > { %6658 = vmatmul.mubr.bf16.gmra.mrb[132].mxu1 %v10397_v33 }
 0x32b   : > { %6665 = vmatprep.mubr.bf16.mxu1 %v6432_v18  ;;  %v4435_v49 = vpop.f32.mrb[88].mxu0 }
 0x32c   : > { %v4436_v22 = vadd.f32 %v4435_v49, %v4129_v3  ;;  %v4137_v60 = vpop.f32.mrb[76].mxu1  ;;  %v4437_v15 = vpop.f32.mrb[89].mxu0 }
 0x32d   : > { %v4438_v51 = vadd.f32 %v4437_v15, %v4131_v62  ;;  %v4139_v47 = vpop.f32.mrb[77].mxu1  ;;  %v4439_v40 = vpop.f32.mrb[90].mxu0 }
 0x32e   : > { %v4141_v48 = vpop.f32.mrb[78].mxu1  ;;  %v4440_v27 = vpop.f32.mrb[91].mxu0 }
 0x32f   : > { %v4142_v33 = vpop.f32.mrb[79].mxu1 }
 0x332   : > { %6666 = vmatmul.mubr.bf16.gmra.mrb[136].mxu1 %v10351_v1 }
 0x333   : > { %v4443_v52 = vpop.f32.mrb[92].mxu0  ;;  %6673 = vmatprep.mubr.bf16.mxu1 %v6448_v53 }
 0x334   : > { %v4444_v29 = vadd.f32 %v4443_v52, %v4137_v60  ;;  %v4445_v36 = vpop.f32.mrb[93].mxu0  ;;  %v4767_v42 = vpop.f32.mrb[80].mxu1 }
 0x335   : > { %v4446_v35 = vadd.f32 %v4445_v36, %v4139_v47  ;;  %v4798_v38 = vadd.f32 %v4767_v42, %v10370_v5  ;;  %v4447_v26 = vpop.f32.mrb[94].mxu0  ;;  %v4769_v8 = vpop.f32.mrb[81].mxu1 }
 0x336   : > { %v4799_v41 = vadd.f32 %v4769_v8, %v10372_v45  ;;  %v4448_v56 = vpop.f32.mrb[95].mxu0  ;;  %v4771_v31 = vpop.f32.mrb[82].mxu1 }
 0x337   : > { %v4772_v50 = vpop.f32.mrb[83].mxu1 }
 0x33a   : > { %6674 = vmatmul.mubr.bf16.gmra.mrb[140].mxu1 %v6440_v25 }
 0x33b   : > { %v5087_v1 = vpop.f32.mrb[96].mxu0 }
 0x33c   : > { %v5118_v4 = vadd.f32 %v5087_v1, %v4798_v38  ;;  %v4775_v44 = vpop.f32.mrb[84].mxu1  ;;  %v5089_v6 = vpop.f32.mrb[97].mxu0 }
 0x33d   : > { %v4800_v20 = vadd.f32 %v4775_v44, %v4428_v9  ;;  %v5119_v10 = vadd.f32 %v5089_v6, %v4799_v41  ;;  %v4777_v59 = vpop.f32.mrb[85].mxu1  ;;  %v5091_v13 = vpop.f32.mrb[98].mxu0 }
 0x33e   : > { %v4801_v61 = vadd.f32 %v4777_v59, %v4430_v63  ;;  %v4779_v5 = vpop.f32.mrb[86].mxu1  ;;  %v5092_v37 = vpop.f32.mrb[99].mxu0 }
 0x33f   : > { %v4780_v58 = vpop.f32.mrb[87].mxu1 }
 0x343   : > { %v5095_v14 = vpop.f32.mrb[100].mxu0 }
 0x344   : > { %v5120_v45 = vadd.f32 %v5095_v14, %v4800_v20  ;;  %v4783_v54 = vpop.f32.mrb[88].mxu1  ;;  %v5097_v19 = vpop.f32.mrb[101].mxu0 }
 0x345   : > { %v4802_v24 = vadd.f32 %v4783_v54, %v4436_v22  ;;  %v5121_v21 = vadd.f32 %v5097_v19, %v4801_v61  ;;  %v4785_v3 = vpop.f32.mrb[89].mxu1  ;;  %v5099_v28 = vpop.f32.mrb[102].mxu0 }
 0x346   : > { %v4803_v0 = vadd.f32 %v4785_v3, %v4438_v51  ;;  %v4787_v62 = vpop.f32.mrb[90].mxu1  ;;  %v5100_v57 = vpop.f32.mrb[103].mxu0 }
 0x347   : > { %v4788_v2 = vpop.f32.mrb[91].mxu1 }
 0x34b   : > { %v5103_v9 = vpop.f32.mrb[104].mxu0 }
 0x34c   : > { %v5122_v43 = vadd.f32 %v5103_v9, %v4802_v24  ;;  %v4791_v46 = vpop.f32.mrb[92].mxu1  ;;  %v5105_v34 = vpop.f32.mrb[105].mxu0 }
 0x34d   : > { %v4804_v63 = vadd.f32 %v4791_v46, %v4444_v29  ;;  %v5123_v11 = vadd.f32 %v5105_v34, %v4803_v0  ;;  %v4793_v12 = vpop.f32.mrb[93].mxu1  ;;  %v5107_v18 = vpop.f32.mrb[106].mxu0 }
 0x34e   : > { %v4805_v49 = vadd.f32 %v4793_v12, %v4446_v35  ;;  %v4795_v60 = vpop.f32.mrb[94].mxu1  ;;  %v5108_v15 = vpop.f32.mrb[107].mxu0 }
 0x34f   : > { %v4796_v55 = vpop.f32.mrb[95].mxu1 }
 0x353   : > { %v5111_v22 = vpop.f32.mrb[108].mxu0 }
 0x354   : > { %v5124_v30 = vadd.f32 %v5111_v22, %v4804_v63  ;;  %v5113_v7 = vpop.f32.mrb[109].mxu0 }
 0x355   : > { %v5125_v47 = vadd.f32 %v5113_v7, %v4805_v49  ;;  %v5115_v51 = vpop.f32.mrb[110].mxu0 }
 0x356   : > { %v5116_v40 = vpop.f32.mrb[111].mxu0 }
 0x374   : > { %v5353_v48 = vpop.f32.mrb[96].mxu1 }
 0x375   : > { %v5384_v27 = vadd.f32 %v5353_v48, %v5118_v4  ;;  %v5355_v33 = vpop.f32.mrb[97].mxu1 }
 0x376   : > { %v5385_v16 = vadd.f32 %v5355_v33, %v5119_v10  ;;  %v5357_v53 = vpop.f32.mrb[98].mxu1 }
 0x377   : > { %v5358_v52 = vpop.f32.mrb[99].mxu1 }
 0x37b   : > { %v5709_v32 = vpop.f32.mrb[112].mxu0 }
 0x37c   : > { %v5740_v29 = vadd.f32 %v5709_v32, %v5384_v27  ;;  %v5361_v36 = vpop.f32.mrb[100].mxu1  ;;  %v5711_v42 = vpop.f32.mrb[113].mxu0 }
 0x37d   : > { %v5386_v35 = vadd.f32 %v5361_v36, %v5120_v45  ;;  %v5741_v38 = vadd.f32 %v5711_v42, %v5385_v16  ;;  %v5363_v26 = vpop.f32.mrb[101].mxu1  ;;  %v5713_v8 = vpop.f32.mrb[114].mxu0 }
 0x37e   : > { %v5387_v41 = vadd.f32 %v5363_v26, %v5121_v21  ;;  %v5365_v56 = vpop.f32.mrb[102].mxu1  ;;  %v5714_v31 = vpop.f32.mrb[115].mxu0 }
 0x37f   : > { %v5366_v50 = vpop.f32.mrb[103].mxu1 }
 0x383   : > { %v5717_v25 = vpop.f32.mrb[116].mxu0 }
 0x384   : > { %v5742_v1 = vadd.f32 %v5717_v25, %v5386_v35  ;;  %v5369_v44 = vpop.f32.mrb[104].mxu1  ;;  %v5719_v4 = vpop.f32.mrb[117].mxu0 }
 0x385   : > { %v5388_v6 = vadd.f32 %v5369_v44, %v5122_v43  ;;  %v5743_v20 = vadd.f32 %v5719_v4, %v5387_v41  ;;  %v5371_v10 = vpop.f32.mrb[105].mxu1  ;;  %v5721_v59 = vpop.f32.mrb[118].mxu0 }
 0x386   : > { %v5389_v13 = vadd.f32 %v5371_v10, %v5123_v11  ;;  %v5373_v61 = vpop.f32.mrb[106].mxu1  ;;  %v5722_v5 = vpop.f32.mrb[119].mxu0 }
 0x387   : > { %v5374_v37 = vpop.f32.mrb[107].mxu1 }
 0x38b   : > { %v5725_v58 = vpop.f32.mrb[120].mxu0 }
 0x38c   : > { %v5744_v14 = vadd.f32 %v5725_v58, %v5388_v6  ;;  %v5377_v45 = vpop.f32.mrb[108].mxu1  ;;  %v5727_v54 = vpop.f32.mrb[121].mxu0 }
 0x38d   : > { %v5390_v19 = vadd.f32 %v5377_v45, %v5124_v30  ;;  %v5745_v24 = vadd.f32 %v5727_v54, %v5389_v13  ;;  %v5379_v21 = vpop.f32.mrb[109].mxu1  ;;  %v5729_v3 = vpop.f32.mrb[122].mxu0 }
 0x38e   : > { %v5391_v28 = vadd.f32 %v5379_v21, %v5125_v47  ;;  %v5381_v0 = vpop.f32.mrb[110].mxu1  ;;  %v5730_v62 = vpop.f32.mrb[123].mxu0 }
 0x38f   : > { %v5382_v57 = vpop.f32.mrb[111].mxu1 }
 0x390   : > { %v6710_v57 = vld [vmem:[%s10464_s8] sm:$0xff] }
 0x393   : > { %v5733_v2 = vpop.f32.mrb[124].mxu0 }
 0x394   : > { %v5746_v9 = vadd.f32 %v5733_v2, %v5390_v19  ;;  %v5735_v43 = vpop.f32.mrb[125].mxu0 }
 0x395   : > { %v5747_v46 = vadd.f32 %v5735_v43, %v5391_v28  ;;  %v5737_v34 = vpop.f32.mrb[126].mxu0 }
 0x396   : > { %v5738_v63 = vpop.f32.mrb[127].mxu0 }
 0x3b5   : > { %v6029_v11 = vpop.f32.mrb[112].mxu1 }
 0x3b6   : > { %v6060_v12 = vadd.f32 %v6029_v11, %v5740_v29  ;;  %v6031_v18 = vpop.f32.mrb[113].mxu1 }
 0x3b7   : > { %v6061_v49 = vadd.f32 %v6031_v18, %v5741_v38  ;;  %v6033_v60 = vpop.f32.mrb[114].mxu1  ;;  %v6716_v18 = vld [vmem:[%s10464_s8 + $0x10] sm:$0xff] }
 0x3b8   : > { %v6034_v15 = vpop.f32.mrb[115].mxu1 }
 0x3bc   : > { %v6295_v55 = vpop.f32.mrb[128].mxu0 }
 0x3bd   : > { %v6326_v22 = vadd.f32 %v6295_v55, %v6060_v12  ;;  %v6037_v30 = vpop.f32.mrb[116].mxu1  ;;  %v6297_v7 = vpop.f32.mrb[129].mxu0  ;;  %v6717_v55 = vld [vmem:[%s10464_s8 + $0x18] sm:$0xff] }
 0x3be   : > { %v6062_v47 = vadd.f32 %v6037_v30, %v5742_v1  ;;  %v6327_v51 = vadd.f32 %v6297_v7, %v6061_v49  ;;  %v6039_v40 = vpop.f32.mrb[117].mxu1  ;;  %v6299_v48 = vpop.f32.mrb[130].mxu0 }
 0x3bf   : > { %v6063_v27 = vadd.f32 %v6039_v40, %v5743_v20  ;;  %v6041_v33 = vpop.f32.mrb[118].mxu1  ;;  %v6300_v16 = vpop.f32.mrb[131].mxu0 }
 0x3c0   : > { %v6042_v53 = vpop.f32.mrb[119].mxu1 }
 0x3c4   : > { %v6303_v52 = vpop.f32.mrb[132].mxu0 }
 0x3c5   : > { %v6328_v32 = vadd.f32 %v6303_v52, %v6062_v47  ;;  %v6045_v36 = vpop.f32.mrb[120].mxu1  ;;  %v6305_v29 = vpop.f32.mrb[133].mxu0  ;;  %v6723_v52 = vld [vmem:[%s10464_s8 + $0x28] sm:$0xff] }
 0x3c6   : > { %v6064_v42 = vadd.f32 %v6045_v36, %v5744_v14  ;;  %v6329_v35 = vadd.f32 %v6305_v29, %v6063_v27  ;;  %v6047_v38 = vpop.f32.mrb[121].mxu1  ;;  %v6307_v26 = vpop.f32.mrb[134].mxu0  ;;  %v6722_v27 = vld [vmem:[%s10464_s8 + $0x20] sm:$0xff] }
 0x3c7   : > { %v6065_v8 = vadd.f32 %v6047_v38, %v5745_v24  ;;  %v6049_v41 = vpop.f32.mrb[122].mxu1  ;;  %v6308_v56 = vpop.f32.mrb[135].mxu0  ;;  %v6690_v24 = vld [vmem:[%s10499_s5] sm:$0x3] }
 0x3c8   : > { %v6050_v31 = vpop.f32.mrb[123].mxu1  ;;  %v6695_v21 = vrot.slane %v6690_v24, %v3651_v17  ;;  %v6699_v28 = vrot.slane %v6690_v24, %v3655_v23 }
 0x3cc   : > { %v6311_v50 = vpop.f32.mrb[136].mxu0 }
 0x3cd   : > { %v6330_v25 = vadd.f32 %v6311_v50, %v6064_v42  ;;  %v6053_v1 = vpop.f32.mrb[124].mxu1  ;;  %v6313_v44 = vpop.f32.mrb[137].mxu0  ;;  %v6729_v50 = vld [vmem:[%s10464_s8 + $0x38] sm:$0xff] }
 0x3ce   : > { %v6066_v4 = vadd.f32 %v6053_v1, %v5746_v9  ;;  %v6331_v6 = vadd.f32 %v6313_v44, %v6065_v8  ;;  %v6055_v20 = vpop.f32.mrb[125].mxu1  ;;  %v6315_v10 = vpop.f32.mrb[138].mxu0  ;;  %v6728_v8 = vld [vmem:[%s10464_s8 + $0x30] sm:$0xff] }
 0x3cf   : > { %v6067_v59 = vadd.f32 %v6055_v20, %v5747_v46  ;;  %v6057_v13 = vpop.f32.mrb[126].mxu1  ;;  %v6316_v61 = vpop.f32.mrb[139].mxu0  ;;  %v6711_v46 = vld [vmem:[%s10464_s8 + $0x8] sm:$0xff] }
 0x3d0   : > { %v6058_v5 = vpop.f32.mrb[127].mxu1 }
 0x3d4   : > { %v6319_v37 = vpop.f32.mrb[140].mxu0 }
 0x3d5   : > { %v6332_v58 = vadd.f32 %v6319_v37, %v6066_v4  ;;  %v6321_v14 = vpop.f32.mrb[141].mxu0 }
 0x3d6   : > { %v6333_v45 = vadd.f32 %v6321_v14, %v6067_v59  ;;  %v6323_v54 = vpop.f32.mrb[142].mxu0 }
 0x3d7   : > { %v6324_v19 = vpop.f32.mrb[143].mxu0 }
 0x3f5   : > { %v6651_v3 = vpop.f32.mrb[128].mxu1 }
 0x3f6   : > { %v6682_v0 = vadd.f32 %v6651_v3, %v6326_v22  ;;  %v6653_v62 = vpop.f32.mrb[129].mxu1 }
 0x3f7   : > { %v6683_v2 = vadd.f32 %v6653_v62, %v6327_v51  ;;  %v6655_v9 = vpop.f32.mrb[130].mxu1 }
 0x3f8   : > { %v6702_v43 = vadd.f32 %v6695_v21, %v6682_v0  ;;  %v6656_v34 = vpop.f32.mrb[131].mxu1 }
 0x3f9   : > { %v6703_v17 = vadd.f32 %v6699_v28, %v6683_v2 }
 0x3fa   : > { %v6712_v39 = vadd.f32 %v6710_v57, %v6702_v43 }
 0x3fb   : > { %v6713_v23 = vadd.f32 %v6711_v46, %v6703_v17 }
 0x3fc   : > { %6714 = vst [vmem:[%s10475_s10] sm:$0xff] %v6712_v39 }
 0x3fd   : > { %6715 = vst [vmem:[%s10475_s10 + $0x8] sm:$0xff] %v6713_v23  ;;  %v6659_v63 = vpop.f32.mrb[132].mxu1 }
 0x3fe   : > { %v6684_v11 = vadd.f32 %v6659_v63, %v6328_v32  ;;  %v6661_v12 = vpop.f32.mrb[133].mxu1 }
 0x3ff   : > { %v6685_v49 = vadd.f32 %v6661_v12, %v6329_v35  ;;  %v6663_v60 = vpop.f32.mrb[134].mxu1 }
 0x400   : > { %v6704_v15 = vadd.f32 %v6695_v21, %v6684_v11  ;;  %v6664_v22 = vpop.f32.mrb[135].mxu1 }
 0x401   : > { %v6705_v30 = vadd.f32 %v6699_v28, %v6685_v49 }
 0x402   : > { %v6718_v7 = vadd.f32 %v6716_v18, %v6704_v15 }
 0x403   : > { %v6719_v47 = vadd.f32 %v6717_v55, %v6705_v30 }
 0x404   : > { %6720 = vst [vmem:[%s10475_s10 + $0x10] sm:$0xff] %v6718_v7 }
 0x405   : > { %6721 = vst [vmem:[%s10475_s10 + $0x18] sm:$0xff] %v6719_v47  ;;  %v6667_v51 = vpop.f32.mrb[136].mxu1 }
 0x406   : > { %v6686_v40 = vadd.f32 %v6667_v51, %v6330_v25  ;;  %v6669_v48 = vpop.f32.mrb[137].mxu1 }
 0x407   : > { %v6687_v33 = vadd.f32 %v6669_v48, %v6331_v6  ;;  %v6671_v16 = vpop.f32.mrb[138].mxu1 }
 0x408   : > { %v6706_v53 = vadd.f32 %v6695_v21, %v6686_v40  ;;  %v6672_v32 = vpop.f32.mrb[139].mxu1 }
 0x409   : > { %v6707_v36 = vadd.f32 %v6699_v28, %v6687_v33 }
 0x40a   : > { %v6724_v29 = vadd.f32 %v6722_v27, %v6706_v53 }
 0x40b   : > { %v6725_v42 = vadd.f32 %v6723_v52, %v6707_v36 }
 0x40c   : > { %6726 = vst [vmem:[%s10475_s10 + $0x20] sm:$0xff] %v6724_v29 }
 0x40d   : > { %6727 = vst [vmem:[%s10475_s10 + $0x28] sm:$0xff] %v6725_v42  ;;  %v6675_v35 = vpop.f32.mrb[140].mxu1 }
 0x40e   : > { %v6688_v38 = vadd.f32 %v6675_v35, %v6332_v58  ;;  %v6677_v26 = vpop.f32.mrb[141].mxu1 }
 0x40f   : > { %v6689_v41 = vadd.f32 %v6677_v26, %v6333_v45  ;;  %v6679_v56 = vpop.f32.mrb[142].mxu1 }
 0x410   : > { %v6708_v31 = vadd.f32 %v6695_v21, %v6688_v38  ;;  %v6680_v25 = vpop.f32.mrb[143].mxu1 }
 0x411   : > { %v6709_v1 = vadd.f32 %v6699_v28, %v6689_v41 }
 0x412   : > { %v6730_v44 = vadd.f32 %v6728_v8, %v6708_v31 }
 0x413   : > { %v6731_v4 = vadd.f32 %v6729_v50, %v6709_v1 }
 0x414   : > { %6732 = vst [vmem:[%s10475_s10 + $0x30] sm:$0xff] %v6730_v44 }
 0x415   : > { %6733 = vst [vmem:[%s10475_s10 + $0x38] sm:$0xff] %v6731_v4 }
 0x416 PF: > { %s17_s21 = sadd.s32 1, %s8729_s21  }
 0x417   : > { %p14_p3 = scmp.ge.s32.totalorder %s17_s21, 4  }
 0x419   :  { %16 = sbr.rel (!%p14_p3) target bundleno = 1 (0x1), region = 98 }
 0x420   :  { %6755 = vsyncpa [#allocation4], 1 }
 0x421   :  { %6757 = vsyncpa [#allocation4 + $0x1], 1 }

</bundles_post_ra>
